<compile_context>
chip_gen: v5e
topology: v5e:2x2
jax: 0.10.0
libtpu: 0.0.40
codegen_flags: <defaults>
</compile_context>

<pallas_src>
import jax
import jax.numpy as jnp
from jax.experimental import pallas as pl
from jax.experimental.pallas import tpu as pltpu

EPS = 1e-5   # PyTorch BatchNorm3d default eps
K = 3        # kernel_size=3, padding=1 -> "same" spatial output


def band_weight(w, W):
    """(3,3,3,Ci,Co) conv weight -> (3,3, W*Ci, W*Co) banded matmul weight.

    band[kd, kh, wi*Ci+ci, wo*Co+co] = w[kd, kh, wi-wo+1, ci, co] when
    0 <= wi-wo+1 < 3, else 0.  Out-of-range W taps (the padding=1 halo along
    W) simply vanish, so activations only need explicit padding along D and H.
    """
    Kd, Kh, Kw, Ci, Co = w.shape
    wi = jnp.arange(W)[:, None]
    wo = jnp.arange(W)[None, :]
    kw = wi - wo + 1                                    # (W, W)
    valid = ((kw >= 0) & (kw < Kw)).astype(w.dtype)
    band = w[:, :, jnp.clip(kw, 0, Kw - 1), :, :]       # (Kd, Kh, W, W, Ci, Co)
    band = band * valid[None, None, :, :, None, None]
    band = band.transpose(0, 1, 2, 4, 3, 5)             # (Kd, Kh, wi, Ci, wo, Co)
    return band.reshape(Kd, Kh, W * Ci, W * Co)


def make_kernel(N, D, H, W, Cin, Cout):
    M = N * D * H
    inv_cnt = 1.0 / float(N * D * H * W)

    def ch_sum(v):
        """(1, W*Cout) -> (1, Cout): sum the W lane-groups."""
        t = v[:, 0:Cout]
        for wi in range(1, W):
            t = t + v[:, wi * Cout:(wi + 1) * Cout]
        return t

    def ch_tile(v):
        """(1, Cout) -> (1, W*Cout): replicate per-channel values across W."""
        return jnp.concatenate([v] * W, axis=1)

    def kernel(xp_ref, w1_ref, g1_ref, be1_ref, w2_ref, g2_ref, be2_ref,
               o_ref, a2_ref):
        f32 = jnp.float32

        def conv(ap_ref, w_ref, Ci):
            # ap_ref: (N, D+2, H+2, W*Ci) D/H zero-padded activation
            # w_ref:  (3, 3, W*Ci, W*Cout) banded weights
            acc = jnp.zeros((M, W * Cout), dtype=f32)
            for kd in range(K):
                for kh in range(K):
                    blk = ap_ref[:, kd:kd + D, kh:kh + H, :].reshape(M, W * Ci)
                    acc = acc + jnp.dot(blk, w_ref[kd, kh],
                                        preferred_element_type=f32)
            return acc

        def bn_relu(c, gamma, beta):
            # Training-mode BatchNorm3d: batch stats over (N, D, H, W), biased
            # variance.  Conv bias cancels under the mean subtraction, so it is
            # never added.  Normalize + affine folded into one scale/offset.
            mean = ch_sum(jnp.sum(c, axis=0, keepdims=True)) * inv_cnt   # (1, Cout)
            centered = c - ch_tile(mean)
            var = ch_sum(jnp.sum(centered * centered,
                                 axis=0, keepdims=True)) * inv_cnt       # (1, Cout)
            scale = gamma * jax.lax.rsqrt(var + EPS)                     # (1, Cout)
            y = centered * ch_tile(scale) + ch_tile(beta)
            return jnp.maximum(y, 0.0)

        # ---- layer 1: input already D/H-padded by the wrapper ----
        y1 = bn_relu(conv(xp_ref, w1_ref, Cin), g1_ref[...], be1_ref[...])

        # ---- layer 2: intermediate never leaves VMEM; pad halo in scratch ----
        a2_ref[...] = jnp.zeros_like(a2_ref)
        a2_ref[:, 1:1 + D, 1:1 + H, :] = y1.reshape(N, D, H, W * Cout)
        y2 = bn_relu(conv(a2_ref, w2_ref, Cout), g2_ref[...], be2_ref[...])

        o_ref[...] = y2                                  # (N*D*H, W*Cout)

    return kernel


def conv_block_forward(x, params):
    """x: (N, D, H, W, Cin) NDHWC. Returns (N, D, H, W, Cout)."""
    N, D, H, W, Cin = x.shape
    Cout = params["g1"].shape[0]

    wb1 = band_weight(params["w1"], W)                   # (3, 3, W*Cin,  W*Cout)
    wb2 = band_weight(params["w2"], W)                   # (3, 3, W*Cout, W*Cout)
    # Zero-pad the D/H halo of the input once on the host side (few KB).
    xp = jnp.pad(x.reshape(N, D, H, W * Cin),
                 ((0, 0), (1, 1), (1, 1), (0, 0)))       # (N, D+2, H+2, W*Cin)

    vmem = pl.BlockSpec(memory_space=pltpu.MemorySpace.VMEM)
    out2d = pl.pallas_call(
        make_kernel(N, D, H, W, Cin, Cout),
        out_shape=jax.ShapeDtypeStruct((N * D * H, W * Cout), jnp.float32),
        in_specs=[vmem] * 7,
        out_specs=vmem,
        scratch_shapes=[
            pltpu.VMEM((N, D + 2, H + 2, W * Cout), jnp.float32),
        ],
    )(xp, wb1,
      params["g1"].reshape(1, Cout), params["be1"].reshape(1, Cout),
      wb2,
      params["g2"].reshape(1, Cout), params["be2"].reshape(1, Cout))
    # conv biases b1/b2 are intentionally not passed: they cancel under BN.
    return out2d.reshape(N, D, H, W, Cout)               # free (same layout)


if __name__ == "__main__":
    N, Cin, Cout, D, H, W = 2, 4, 8, 8, 8, 8

    key = jax.random.PRNGKey(0)
    kx, kw1, kw2 = jax.random.split(key, 3)

    x = jax.random.normal(kx, (N, D, H, W, Cin), jnp.float32)

    # Deterministic synthetic parameters (shapes from the module's __init__).
    fan1 = Cin * K ** 3
    w1 = jax.random.normal(kw1, (K, K, K, Cin, Cout), jnp.float32) / jnp.sqrt(fan1)
    b1 = 0.01 * jnp.arange(Cout, dtype=jnp.float32)
    g1 = 1.0 + 0.05 * jnp.arange(Cout, dtype=jnp.float32)   # bn1 weight (gamma)
    be1 = 0.02 * jnp.arange(Cout, dtype=jnp.float32)        # bn1 bias (beta)

    fan2 = Cout * K ** 3
    w2 = jax.random.normal(kw2, (K, K, K, Cout, Cout), jnp.float32) / jnp.sqrt(fan2)
    b2 = -0.01 * jnp.arange(Cout, dtype=jnp.float32)
    g2 = 1.0 - 0.03 * jnp.arange(Cout, dtype=jnp.float32)   # bn2 weight (gamma)
    be2 = 0.01 * jnp.arange(Cout, dtype=jnp.float32)        # bn2 bias (beta)

    params = dict(w1=w1, b1=b1, g1=g1, be1=be1,
                  w2=w2, b2=b2, g2=g2, be2=be2)

    out = jax.jit(conv_block_forward)(x, params)
    out = jax.block_until_ready(out)

    # Pure-JAX reference (same NDHWC layout), INCLUDING the conv bias, which
    # must cancel exactly under training-mode BN.
    def ref_block(x, w, b, g, be):
        y = jax.lax.conv_general_dilated(
            x, w, window_strides=(1, 1, 1), padding="SAME",
            dimension_numbers=("NDHWC", "DHWIO", "NDHWC")) + b
        mean = jnp.mean(y, axis=(0, 1, 2, 3), keepdims=True)
        var = jnp.mean((y - mean) ** 2, axis=(0, 1, 2, 3), keepdims=True)
        y = (y - mean) * jax.lax.rsqrt(var + EPS) * g + be
        return jnp.maximum(y, 0.0)

    ref = ref_block(ref_block(x, w1, b1, g1, be1), w2, b2, g2, be2)
    max_err = float(jnp.max(jnp.abs(out - ref)))
    assert out.shape == (N, D, H, W, Cout), out.shape
    assert jnp.allclose(out, ref, atol=2e-3, rtol=2e-3), max_err

    print("KERNEL_OK")
</pallas_src>

<mosaic_0001>
module attributes {stable_mosaic.version = 11 : i64} {
  func.func @kernel(%arg0: memref<2x10x10x32xf32, #tpu.memory_space<vmem>>, %arg1: memref<3x3x32x64xf32, #tpu.memory_space<vmem>>, %arg2: memref<1x8xf32, #tpu.memory_space<vmem>>, %arg3: memref<1x8xf32, #tpu.memory_space<vmem>>, %arg4: memref<3x3x64x64xf32, #tpu.memory_space<vmem>>, %arg5: memref<1x8xf32, #tpu.memory_space<vmem>>, %arg6: memref<1x8xf32, #tpu.memory_space<vmem>>, %arg7: memref<128x64xf32, #tpu.memory_space<vmem>>, %arg8: memref<2x10x10x64xf32, #tpu.memory_space<vmem>>) attributes {dimension_semantics = [], scalar_prefetch = 0 : i64, scratch_operands = 1 : i64, tpu.core_type = #tpu.core_type<tc>} {
    %cst = arith.constant 0.000000e+00 : f32
    %0 = vector.broadcast %cst : f32 to vector<128x64xf32>
    %c0 = arith.constant 0 : index
    %c0_0 = arith.constant 0 : index
    %c0_1 = arith.constant 0 : index
    %c0_2 = arith.constant 0 : index
    %1 = vector.load %arg0[%c0, %c0_0, %c0_1, %c0_2] : memref<2x10x10x32xf32, #tpu.memory_space<vmem>>, vector<2x8x8x32xf32>
    %2 = vector.shape_cast %1 : vector<2x8x8x32xf32> to vector<128x32xf32>
    %c0_3 = arith.constant 0 : index
    %c0_4 = arith.constant 0 : index
    %c0_5 = arith.constant 0 : index
    %c0_6 = arith.constant 0 : index
    %3 = vector.load %arg1[%c0_3, %c0_4, %c0_5, %c0_6] : memref<3x3x32x64xf32, #tpu.memory_space<vmem>>, vector<1x1x32x64xf32>
    %4 = vector.shape_cast %3 : vector<1x1x32x64xf32> to vector<32x64xf32>
    %cst_7 = arith.constant dense<0.000000e+00> : vector<128x64xf32>
    %5 = tpu.matmul %2, %4, %cst_7 {dimension_numbers = #tpu.dot_dimension_numbers<[1], [0], [0], [1], [0, 0, 1, 1], [], []>} : vector<128x32xf32>, vector<32x64xf32>, vector<128x64xf32> -> vector<128x64xf32>
    %6 = arith.addf %0, %5 : vector<128x64xf32>
    %c0_8 = arith.constant 0 : index
    %c0_9 = arith.constant 0 : index
    %c1 = arith.constant 1 : index
    %c0_10 = arith.constant 0 : index
    %7 = vector.load %arg0[%c0_8, %c0_9, %c1, %c0_10] : memref<2x10x10x32xf32, #tpu.memory_space<vmem>>, vector<2x8x8x32xf32>
    %8 = vector.shape_cast %7 : vector<2x8x8x32xf32> to vector<128x32xf32>
    %c0_11 = arith.constant 0 : index
    %c1_12 = arith.constant 1 : index
    %c0_13 = arith.constant 0 : index
    %c0_14 = arith.constant 0 : index
    %9 = vector.load %arg1[%c0_11, %c1_12, %c0_13, %c0_14] : memref<3x3x32x64xf32, #tpu.memory_space<vmem>>, vector<1x1x32x64xf32>
    %10 = vector.shape_cast %9 : vector<1x1x32x64xf32> to vector<32x64xf32>
    %cst_15 = arith.constant dense<0.000000e+00> : vector<128x64xf32>
    %11 = tpu.matmul %8, %10, %cst_15 {dimension_numbers = #tpu.dot_dimension_numbers<[1], [0], [0], [1], [0, 0, 1, 1], [], []>} : vector<128x32xf32>, vector<32x64xf32>, vector<128x64xf32> -> vector<128x64xf32>
    %12 = arith.addf %6, %11 : vector<128x64xf32>
    %c0_16 = arith.constant 0 : index
    %c0_17 = arith.constant 0 : index
    %c2 = arith.constant 2 : index
    %c0_18 = arith.constant 0 : index
    %13 = vector.load %arg0[%c0_16, %c0_17, %c2, %c0_18] : memref<2x10x10x32xf32, #tpu.memory_space<vmem>>, vector<2x8x8x32xf32>
    %14 = vector.shape_cast %13 : vector<2x8x8x32xf32> to vector<128x32xf32>
    %c0_19 = arith.constant 0 : index
    %c2_20 = arith.constant 2 : index
    %c0_21 = arith.constant 0 : index
    %c0_22 = arith.constant 0 : index
    %15 = vector.load %arg1[%c0_19, %c2_20, %c0_21, %c0_22] : memref<3x3x32x64xf32, #tpu.memory_space<vmem>>, vector<1x1x32x64xf32>
    %16 = vector.shape_cast %15 : vector<1x1x32x64xf32> to vector<32x64xf32>
    %cst_23 = arith.constant dense<0.000000e+00> : vector<128x64xf32>
    %17 = tpu.matmul %14, %16, %cst_23 {dimension_numbers = #tpu.dot_dimension_numbers<[1], [0], [0], [1], [0, 0, 1, 1], [], []>} : vector<128x32xf32>, vector<32x64xf32>, vector<128x64xf32> -> vector<128x64xf32>
    %18 = arith.addf %12, %17 : vector<128x64xf32>
    %c0_24 = arith.constant 0 : index
    %c1_25 = arith.constant 1 : index
    %c0_26 = arith.constant 0 : index
    %c0_27 = arith.constant 0 : index
    %19 = vector.load %arg0[%c0_24, %c1_25, %c0_26, %c0_27] : memref<2x10x10x32xf32, #tpu.memory_space<vmem>>, vector<2x8x8x32xf32>
    %20 = vector.shape_cast %19 : vector<2x8x8x32xf32> to vector<128x32xf32>
    %c1_28 = arith.constant 1 : index
    %c0_29 = arith.constant 0 : index
    %c0_30 = arith.constant 0 : index
    %c0_31 = arith.constant 0 : index
    %21 = vector.load %arg1[%c1_28, %c0_29, %c0_30, %c0_31] : memref<3x3x32x64xf32, #tpu.memory_space<vmem>>, vector<1x1x32x64xf32>
    %22 = vector.shape_cast %21 : vector<1x1x32x64xf32> to vector<32x64xf32>
    %cst_32 = arith.constant dense<0.000000e+00> : vector<128x64xf32>
    %23 = tpu.matmul %20, %22, %cst_32 {dimension_numbers = #tpu.dot_dimension_numbers<[1], [0], [0], [1], [0, 0, 1, 1], [], []>} : vector<128x32xf32>, vector<32x64xf32>, vector<128x64xf32> -> vector<128x64xf32>
    %24 = arith.addf %18, %23 : vector<128x64xf32>
    %c0_33 = arith.constant 0 : index
    %c1_34 = arith.constant 1 : index
    %c1_35 = arith.constant 1 : index
    %c0_36 = arith.constant 0 : index
    %25 = vector.load %arg0[%c0_33, %c1_34, %c1_35, %c0_36] : memref<2x10x10x32xf32, #tpu.memory_space<vmem>>, vector<2x8x8x32xf32>
    %26 = vector.shape_cast %25 : vector<2x8x8x32xf32> to vector<128x32xf32>
    %c1_37 = arith.constant 1 : index
    %c1_38 = arith.constant 1 : index
    %c0_39 = arith.constant 0 : index
    %c0_40 = arith.constant 0 : index
    %27 = vector.load %arg1[%c1_37, %c1_38, %c0_39, %c0_40] : memref<3x3x32x64xf32, #tpu.memory_space<vmem>>, vector<1x1x32x64xf32>
    %28 = vector.shape_cast %27 : vector<1x1x32x64xf32> to vector<32x64xf32>
    %cst_41 = arith.constant dense<0.000000e+00> : vector<128x64xf32>
    %29 = tpu.matmul %26, %28, %cst_41 {dimension_numbers = #tpu.dot_dimension_numbers<[1], [0], [0], [1], [0, 0, 1, 1], [], []>} : vector<128x32xf32>, vector<32x64xf32>, vector<128x64xf32> -> vector<128x64xf32>
    %30 = arith.addf %24, %29 : vector<128x64xf32>
    %c0_42 = arith.constant 0 : index
    %c1_43 = arith.constant 1 : index
    %c2_44 = arith.constant 2 : index
    %c0_45 = arith.constant 0 : index
    %31 = vector.load %arg0[%c0_42, %c1_43, %c2_44, %c0_45] : memref<2x10x10x32xf32, #tpu.memory_space<vmem>>, vector<2x8x8x32xf32>
    %32 = vector.shape_cast %31 : vector<2x8x8x32xf32> to vector<128x32xf32>
    %c1_46 = arith.constant 1 : index
    %c2_47 = arith.constant 2 : index
    %c0_48 = arith.constant 0 : index
    %c0_49 = arith.constant 0 : index
    %33 = vector.load %arg1[%c1_46, %c2_47, %c0_48, %c0_49] : memref<3x3x32x64xf32, #tpu.memory_space<vmem>>, vector<1x1x32x64xf32>
    %34 = vector.shape_cast %33 : vector<1x1x32x64xf32> to vector<32x64xf32>
    %cst_50 = arith.constant dense<0.000000e+00> : vector<128x64xf32>
    %35 = tpu.matmul %32, %34, %cst_50 {dimension_numbers = #tpu.dot_dimension_numbers<[1], [0], [0], [1], [0, 0, 1, 1], [], []>} : vector<128x32xf32>, vector<32x64xf32>, vector<128x64xf32> -> vector<128x64xf32>
    %36 = arith.addf %30, %35 : vector<128x64xf32>
    %c0_51 = arith.constant 0 : index
    %c2_52 = arith.constant 2 : index
    %c0_53 = arith.constant 0 : index
    %c0_54 = arith.constant 0 : index
    %37 = vector.load %arg0[%c0_51, %c2_52, %c0_53, %c0_54] : memref<2x10x10x32xf32, #tpu.memory_space<vmem>>, vector<2x8x8x32xf32>
    %38 = vector.shape_cast %37 : vector<2x8x8x32xf32> to vector<128x32xf32>
    %c2_55 = arith.constant 2 : index
    %c0_56 = arith.constant 0 : index
    %c0_57 = arith.constant 0 : index
    %c0_58 = arith.constant 0 : index
    %39 = vector.load %arg1[%c2_55, %c0_56, %c0_57, %c0_58] : memref<3x3x32x64xf32, #tpu.memory_space<vmem>>, vector<1x1x32x64xf32>
    %40 = vector.shape_cast %39 : vector<1x1x32x64xf32> to vector<32x64xf32>
    %cst_59 = arith.constant dense<0.000000e+00> : vector<128x64xf32>
    %41 = tpu.matmul %38, %40, %cst_59 {dimension_numbers = #tpu.dot_dimension_numbers<[1], [0], [0], [1], [0, 0, 1, 1], [], []>} : vector<128x32xf32>, vector<32x64xf32>, vector<128x64xf32> -> vector<128x64xf32>
    %42 = arith.addf %36, %41 : vector<128x64xf32>
    %c0_60 = arith.constant 0 : index
    %c2_61 = arith.constant 2 : index
    %c1_62 = arith.constant 1 : index
    %c0_63 = arith.constant 0 : index
    %43 = vector.load %arg0[%c0_60, %c2_61, %c1_62, %c0_63] : memref<2x10x10x32xf32, #tpu.memory_space<vmem>>, vector<2x8x8x32xf32>
    %44 = vector.shape_cast %43 : vector<2x8x8x32xf32> to vector<128x32xf32>
    %c2_64 = arith.constant 2 : index
    %c1_65 = arith.constant 1 : index
    %c0_66 = arith.constant 0 : index
    %c0_67 = arith.constant 0 : index
    %45 = vector.load %arg1[%c2_64, %c1_65, %c0_66, %c0_67] : memref<3x3x32x64xf32, #tpu.memory_space<vmem>>, vector<1x1x32x64xf32>
    %46 = vector.shape_cast %45 : vector<1x1x32x64xf32> to vector<32x64xf32>
    %cst_68 = arith.constant dense<0.000000e+00> : vector<128x64xf32>
    %47 = tpu.matmul %44, %46, %cst_68 {dimension_numbers = #tpu.dot_dimension_numbers<[1], [0], [0], [1], [0, 0, 1, 1], [], []>} : vector<128x32xf32>, vector<32x64xf32>, vector<128x64xf32> -> vector<128x64xf32>
    %48 = arith.addf %42, %47 : vector<128x64xf32>
    %c0_69 = arith.constant 0 : index
    %c2_70 = arith.constant 2 : index
    %c2_71 = arith.constant 2 : index
    %c0_72 = arith.constant 0 : index
    %49 = vector.load %arg0[%c0_69, %c2_70, %c2_71, %c0_72] : memref<2x10x10x32xf32, #tpu.memory_space<vmem>>, vector<2x8x8x32xf32>
    %50 = vector.shape_cast %49 : vector<2x8x8x32xf32> to vector<128x32xf32>
    %c2_73 = arith.constant 2 : index
    %c2_74 = arith.constant 2 : index
    %c0_75 = arith.constant 0 : index
    %c0_76 = arith.constant 0 : index
    %51 = vector.load %arg1[%c2_73, %c2_74, %c0_75, %c0_76] : memref<3x3x32x64xf32, #tpu.memory_space<vmem>>, vector<1x1x32x64xf32>
    %52 = vector.shape_cast %51 : vector<1x1x32x64xf32> to vector<32x64xf32>
    %cst_77 = arith.constant dense<0.000000e+00> : vector<128x64xf32>
    %53 = tpu.matmul %50, %52, %cst_77 {dimension_numbers = #tpu.dot_dimension_numbers<[1], [0], [0], [1], [0, 0, 1, 1], [], []>} : vector<128x32xf32>, vector<32x64xf32>, vector<128x64xf32> -> vector<128x64xf32>
    %54 = arith.addf %48, %53 : vector<128x64xf32>
    %c0_78 = arith.constant 0 : index
    %c0_79 = arith.constant 0 : index
    %55 = vector.load %arg2[%c0_78, %c0_79] : memref<1x8xf32, #tpu.memory_space<vmem>>, vector<1x8xf32>
    %c0_80 = arith.constant 0 : index
    %c0_81 = arith.constant 0 : index
    %56 = vector.load %arg3[%c0_80, %c0_81] : memref<1x8xf32, #tpu.memory_space<vmem>>, vector<1x8xf32>
    %cst_82 = arith.constant dense<0.000000e+00> : vector<64xf32>
    %57 = vector.multi_reduction <add>, %54, %cst_82 [0] : vector<128x64xf32> to vector<64xf32>
    %58 = vector.shape_cast %57 : vector<64xf32> to vector<1x64xf32>
    %59 = vector.extract_strided_slice %58 {offsets = [0, 0], sizes = [1, 8], strides = [1, 1]} : vector<1x64xf32> to vector<1x8xf32>
    %60 = vector.extract_strided_slice %58 {offsets = [0, 8], sizes = [1, 8], strides = [1, 1]} : vector<1x64xf32> to vector<1x8xf32>
    %61 = arith.addf %59, %60 : vector<1x8xf32>
    %62 = vector.extract_strided_slice %58 {offsets = [0, 16], sizes = [1, 8], strides = [1, 1]} : vector<1x64xf32> to vector<1x8xf32>
    %63 = arith.addf %61, %62 : vector<1x8xf32>
    %64 = vector.extract_strided_slice %58 {offsets = [0, 24], sizes = [1, 8], strides = [1, 1]} : vector<1x64xf32> to vector<1x8xf32>
    %65 = arith.addf %63, %64 : vector<1x8xf32>
    %66 = vector.extract_strided_slice %58 {offsets = [0, 32], sizes = [1, 8], strides = [1, 1]} : vector<1x64xf32> to vector<1x8xf32>
    %67 = arith.addf %65, %66 : vector<1x8xf32>
    %68 = vector.extract_strided_slice %58 {offsets = [0, 40], sizes = [1, 8], strides = [1, 1]} : vector<1x64xf32> to vector<1x8xf32>
    %69 = arith.addf %67, %68 : vector<1x8xf32>
    %70 = vector.extract_strided_slice %58 {offsets = [0, 48], sizes = [1, 8], strides = [1, 1]} : vector<1x64xf32> to vector<1x8xf32>
    %71 = arith.addf %69, %70 : vector<1x8xf32>
    %72 = vector.extract_strided_slice %58 {offsets = [0, 56], sizes = [1, 8], strides = [1, 1]} : vector<1x64xf32> to vector<1x8xf32>
    %73 = arith.addf %71, %72 : vector<1x8xf32>
    %cst_83 = arith.constant 9.765625E-4 : f32
    %74 = vector.broadcast %cst_83 : f32 to vector<1x8xf32>
    %75 = arith.mulf %73, %74 : vector<1x8xf32>
    %76 = tpu.concatenate %75, %75, %75, %75, %75, %75, %75, %75 in 1 : vector<1x8xf32>, vector<1x8xf32>, vector<1x8xf32>, vector<1x8xf32>, vector<1x8xf32>, vector<1x8xf32>, vector<1x8xf32>, vector<1x8xf32> -> vector<1x64xf32>
    %77 = vector.broadcast %76 : vector<1x64xf32> to vector<128x64xf32>
    %78 = arith.subf %54, %77 : vector<128x64xf32>
    %79 = arith.mulf %78, %78 : vector<128x64xf32>
    %cst_84 = arith.constant dense<0.000000e+00> : vector<64xf32>
    %80 = vector.multi_reduction <add>, %79, %cst_84 [0] : vector<128x64xf32> to vector<64xf32>
    %81 = vector.shape_cast %80 : vector<64xf32> to vector<1x64xf32>
    %82 = vector.extract_strided_slice %81 {offsets = [0, 0], sizes = [1, 8], strides = [1, 1]} : vector<1x64xf32> to vector<1x8xf32>
    %83 = vector.extract_strided_slice %81 {offsets = [0, 8], sizes = [1, 8], strides = [1, 1]} : vector<1x64xf32> to vector<1x8xf32>
    %84 = arith.addf %82, %83 : vector<1x8xf32>
    %85 = vector.extract_strided_slice %81 {offsets = [0, 16], sizes = [1, 8], strides = [1, 1]} : vector<1x64xf32> to vector<1x8xf32>
    %86 = arith.addf %84, %85 : vector<1x8xf32>
    %87 = vector.extract_strided_slice %81 {offsets = [0, 24], sizes = [1, 8], strides = [1, 1]} : vector<1x64xf32> to vector<1x8xf32>
    %88 = arith.addf %86, %87 : vector<1x8xf32>
    %89 = vector.extract_strided_slice %81 {offsets = [0, 32], sizes = [1, 8], strides = [1, 1]} : vector<1x64xf32> to vector<1x8xf32>
    %90 = arith.addf %88, %89 : vector<1x8xf32>
    %91 = vector.extract_strided_slice %81 {offsets = [0, 40], sizes = [1, 8], strides = [1, 1]} : vector<1x64xf32> to vector<1x8xf32>
    %92 = arith.addf %90, %91 : vector<1x8xf32>
    %93 = vector.extract_strided_slice %81 {offsets = [0, 48], sizes = [1, 8], strides = [1, 1]} : vector<1x64xf32> to vector<1x8xf32>
    %94 = arith.addf %92, %93 : vector<1x8xf32>
    %95 = vector.extract_strided_slice %81 {offsets = [0, 56], sizes = [1, 8], strides = [1, 1]} : vector<1x64xf32> to vector<1x8xf32>
    %96 = arith.addf %94, %95 : vector<1x8xf32>
    %cst_85 = arith.constant 9.765625E-4 : f32
    %97 = vector.broadcast %cst_85 : f32 to vector<1x8xf32>
    %98 = arith.mulf %96, %97 : vector<1x8xf32>
    %cst_86 = arith.constant 9.99999974E-6 : f32
    %99 = vector.broadcast %cst_86 : f32 to vector<1x8xf32>
    %100 = arith.addf %98, %99 : vector<1x8xf32>
    %101 = math.rsqrt %100 : vector<1x8xf32>
    %102 = arith.mulf %55, %101 : vector<1x8xf32>
    %103 = tpu.concatenate %102, %102, %102, %102, %102, %102, %102, %102 in 1 : vector<1x8xf32>, vector<1x8xf32>, vector<1x8xf32>, vector<1x8xf32>, vector<1x8xf32>, vector<1x8xf32>, vector<1x8xf32>, vector<1x8xf32> -> vector<1x64xf32>
    %104 = vector.broadcast %103 : vector<1x64xf32> to vector<128x64xf32>
    %105 = arith.mulf %78, %104 : vector<128x64xf32>
    %106 = tpu.concatenate %56, %56, %56, %56, %56, %56, %56, %56 in 1 : vector<1x8xf32>, vector<1x8xf32>, vector<1x8xf32>, vector<1x8xf32>, vector<1x8xf32>, vector<1x8xf32>, vector<1x8xf32>, vector<1x8xf32> -> vector<1x64xf32>
    %107 = vector.broadcast %106 : vector<1x64xf32> to vector<128x64xf32>
    %108 = arith.addf %105, %107 : vector<128x64xf32>
    %cst_87 = arith.constant 0.000000e+00 : f32
    %109 = vector.broadcast %cst_87 : f32 to vector<128x64xf32>
    %110 = arith.maximumf %108, %109 : vector<128x64xf32>
    %cst_88 = arith.constant 0.000000e+00 : f32
    %111 = vector.broadcast %cst_88 : f32 to vector<2x10x10x64xf32>
    %c0_89 = arith.constant 0 : index
    %c0_90 = arith.constant 0 : index
    %c0_91 = arith.constant 0 : index
    %c0_92 = arith.constant 0 : index
    %112 = vector.load %arg8[%c0_89, %c0_90, %c0_91, %c0_92] : memref<2x10x10x64xf32, #tpu.memory_space<vmem>>, vector<2x10x10x64xf32>
    tpu.vector_store %arg8[%c0_89, %c0_90, %c0_91, %c0_92], %111 {strides = array<i32>} : memref<2x10x10x64xf32, #tpu.memory_space<vmem>>, vector<2x10x10x64xf32>,
    %113 = vector.shape_cast %110 : vector<128x64xf32> to vector<2x8x8x64xf32>
    %c0_93 = arith.constant 0 : index
    %c1_94 = arith.constant 1 : index
    %c1_95 = arith.constant 1 : index
    %c0_96 = arith.constant 0 : index
    %114 = vector.load %arg8[%c0_93, %c1_94, %c1_95, %c0_96] : memref<2x10x10x64xf32, #tpu.memory_space<vmem>>, vector<2x8x8x64xf32>
    tpu.vector_store %arg8[%c0_93, %c1_94, %c1_95, %c0_96], %113 {strides = array<i32>} : memref<2x10x10x64xf32, #tpu.memory_space<vmem>>, vector<2x8x8x64xf32>,
    %cst_97 = arith.constant 0.000000e+00 : f32
    %115 = vector.broadcast %cst_97 : f32 to vector<128x64xf32>
    %c0_98 = arith.constant 0 : index
    %c0_99 = arith.constant 0 : index
    %c0_100 = arith.constant 0 : index
    %c0_101 = arith.constant 0 : index
    %116 = vector.load %arg8[%c0_98, %c0_99, %c0_100, %c0_101] : memref<2x10x10x64xf32, #tpu.memory_space<vmem>>, vector<2x8x8x64xf32>
    %117 = vector.shape_cast %116 : vector<2x8x8x64xf32> to vector<128x64xf32>
    %c0_102 = arith.constant 0 : index
    %c0_103 = arith.constant 0 : index
    %c0_104 = arith.constant 0 : index
    %c0_105 = arith.constant 0 : index
    %118 = vector.load %arg4[%c0_102, %c0_103, %c0_104, %c0_105] : memref<3x3x64x64xf32, #tpu.memory_space<vmem>>, vector<1x1x64x64xf32>
    %119 = vector.shape_cast %118 : vector<1x1x64x64xf32> to vector<64x64xf32>
    %cst_106 = arith.constant dense<0.000000e+00> : vector<128x64xf32>
    %120 = tpu.matmul %117, %119, %cst_106 {dimension_numbers = #tpu.dot_dimension_numbers<[1], [0], [0], [1], [0, 0, 1, 1], [], []>} : vector<128x64xf32>, vector<64x64xf32>, vector<128x64xf32> -> vector<128x64xf32>
    %121 = arith.addf %115, %120 : vector<128x64xf32>
    %c0_107 = arith.constant 0 : index
    %c0_108 = arith.constant 0 : index
    %c1_109 = arith.constant 1 : index
    %c0_110 = arith.constant 0 : index
    %122 = vector.load %arg8[%c0_107, %c0_108, %c1_109, %c0_110] : memref<2x10x10x64xf32, #tpu.memory_space<vmem>>, vector<2x8x8x64xf32>
    %123 = vector.shape_cast %122 : vector<2x8x8x64xf32> to vector<128x64xf32>
    %c0_111 = arith.constant 0 : index
    %c1_112 = arith.constant 1 : index
    %c0_113 = arith.constant 0 : index
    %c0_114 = arith.constant 0 : index
    %124 = vector.load %arg4[%c0_111, %c1_112, %c0_113, %c0_114] : memref<3x3x64x64xf32, #tpu.memory_space<vmem>>, vector<1x1x64x64xf32>
    %125 = vector.shape_cast %124 : vector<1x1x64x64xf32> to vector<64x64xf32>
    %cst_115 = arith.constant dense<0.000000e+00> : vector<128x64xf32>
    %126 = tpu.matmul %123, %125, %cst_115 {dimension_numbers = #tpu.dot_dimension_numbers<[1], [0], [0], [1], [0, 0, 1, 1], [], []>} : vector<128x64xf32>, vector<64x64xf32>, vector<128x64xf32> -> vector<128x64xf32>
    %127 = arith.addf %121, %126 : vector<128x64xf32>
    %c0_116 = arith.constant 0 : index
    %c0_117 = arith.constant 0 : index
    %c2_118 = arith.constant 2 : index
    %c0_119 = arith.constant 0 : index
    %128 = vector.load %arg8[%c0_116, %c0_117, %c2_118, %c0_119] : memref<2x10x10x64xf32, #tpu.memory_space<vmem>>, vector<2x8x8x64xf32>
    %129 = vector.shape_cast %128 : vector<2x8x8x64xf32> to vector<128x64xf32>
    %c0_120 = arith.constant 0 : index
    %c2_121 = arith.constant 2 : index
    %c0_122 = arith.constant 0 : index
    %c0_123 = arith.constant 0 : index
    %130 = vector.load %arg4[%c0_120, %c2_121, %c0_122, %c0_123] : memref<3x3x64x64xf32, #tpu.memory_space<vmem>>, vector<1x1x64x64xf32>
    %131 = vector.shape_cast %130 : vector<1x1x64x64xf32> to vector<64x64xf32>
    %cst_124 = arith.constant dense<0.000000e+00> : vector<128x64xf32>
    %132 = tpu.matmul %129, %131, %cst_124 {dimension_numbers = #tpu.dot_dimension_numbers<[1], [0], [0], [1], [0, 0, 1, 1], [], []>} : vector<128x64xf32>, vector<64x64xf32>, vector<128x64xf32> -> vector<128x64xf32>
    %133 = arith.addf %127, %132 : vector<128x64xf32>
    %c0_125 = arith.constant 0 : index
    %c1_126 = arith.constant 1 : index
    %c0_127 = arith.constant 0 : index
    %c0_128 = arith.constant 0 : index
    %134 = vector.load %arg8[%c0_125, %c1_126, %c0_127, %c0_128] : memref<2x10x10x64xf32, #tpu.memory_space<vmem>>, vector<2x8x8x64xf32>
    %135 = vector.shape_cast %134 : vector<2x8x8x64xf32> to vector<128x64xf32>
    %c1_129 = arith.constant 1 : index
    %c0_130 = arith.constant 0 : index
    %c0_131 = arith.constant 0 : index
    %c0_132 = arith.constant 0 : index
    %136 = vector.load %arg4[%c1_129, %c0_130, %c0_131, %c0_132] : memref<3x3x64x64xf32, #tpu.memory_space<vmem>>, vector<1x1x64x64xf32>
    %137 = vector.shape_cast %136 : vector<1x1x64x64xf32> to vector<64x64xf32>
    %cst_133 = arith.constant dense<0.000000e+00> : vector<128x64xf32>
    %138 = tpu.matmul %135, %137, %cst_133 {dimension_numbers = #tpu.dot_dimension_numbers<[1], [0], [0], [1], [0, 0, 1, 1], [], []>} : vector<128x64xf32>, vector<64x64xf32>, vector<128x64xf32> -> vector<128x64xf32>
    %139 = arith.addf %133, %138 : vector<128x64xf32>
    %c0_134 = arith.constant 0 : index
    %c1_135 = arith.constant 1 : index
    %c1_136 = arith.constant 1 : index
    %c0_137 = arith.constant 0 : index
    %140 = vector.load %arg8[%c0_134, %c1_135, %c1_136, %c0_137] : memref<2x10x10x64xf32, #tpu.memory_space<vmem>>, vector<2x8x8x64xf32>
    %141 = vector.shape_cast %140 : vector<2x8x8x64xf32> to vector<128x64xf32>
    %c1_138 = arith.constant 1 : index
    %c1_139 = arith.constant 1 : index
    %c0_140 = arith.constant 0 : index
    %c0_141 = arith.constant 0 : index
    %142 = vector.load %arg4[%c1_138, %c1_139, %c0_140, %c0_141] : memref<3x3x64x64xf32, #tpu.memory_space<vmem>>, vector<1x1x64x64xf32>
    %143 = vector.shape_cast %142 : vector<1x1x64x64xf32> to vector<64x64xf32>
    %cst_142 = arith.constant dense<0.000000e+00> : vector<128x64xf32>
    %144 = tpu.matmul %141, %143, %cst_142 {dimension_numbers = #tpu.dot_dimension_numbers<[1], [0], [0], [1], [0, 0, 1, 1], [], []>} : vector<128x64xf32>, vector<64x64xf32>, vector<128x64xf32> -> vector<128x64xf32>
    %145 = arith.addf %139, %144 : vector<128x64xf32>
    %c0_143 = arith.constant 0 : index
    %c1_144 = arith.constant 1 : index
    %c2_145 = arith.constant 2 : index
    %c0_146 = arith.constant 0 : index
    %146 = vector.load %arg8[%c0_143, %c1_144, %c2_145, %c0_146] : memref<2x10x10x64xf32, #tpu.memory_space<vmem>>, vector<2x8x8x64xf32>
    %147 = vector.shape_cast %146 : vector<2x8x8x64xf32> to vector<128x64xf32>
    %c1_147 = arith.constant 1 : index
    %c2_148 = arith.constant 2 : index
    %c0_149 = arith.constant 0 : index
    %c0_150 = arith.constant 0 : index
    %148 = vector.load %arg4[%c1_147, %c2_148, %c0_149, %c0_150] : memref<3x3x64x64xf32, #tpu.memory_space<vmem>>, vector<1x1x64x64xf32>
    %149 = vector.shape_cast %148 : vector<1x1x64x64xf32> to vector<64x64xf32>
    %cst_151 = arith.constant dense<0.000000e+00> : vector<128x64xf32>
    %150 = tpu.matmul %147, %149, %cst_151 {dimension_numbers = #tpu.dot_dimension_numbers<[1], [0], [0], [1], [0, 0, 1, 1], [], []>} : vector<128x64xf32>, vector<64x64xf32>, vector<128x64xf32> -> vector<128x64xf32>
    %151 = arith.addf %145, %150 : vector<128x64xf32>
    %c0_152 = arith.constant 0 : index
    %c2_153 = arith.constant 2 : index
    %c0_154 = arith.constant 0 : index
    %c0_155 = arith.constant 0 : index
    %152 = vector.load %arg8[%c0_152, %c2_153, %c0_154, %c0_155] : memref<2x10x10x64xf32, #tpu.memory_space<vmem>>, vector<2x8x8x64xf32>
    %153 = vector.shape_cast %152 : vector<2x8x8x64xf32> to vector<128x64xf32>
    %c2_156 = arith.constant 2 : index
    %c0_157 = arith.constant 0 : index
    %c0_158 = arith.constant 0 : index
    %c0_159 = arith.constant 0 : index
    %154 = vector.load %arg4[%c2_156, %c0_157, %c0_158, %c0_159] : memref<3x3x64x64xf32, #tpu.memory_space<vmem>>, vector<1x1x64x64xf32>
    %155 = vector.shape_cast %154 : vector<1x1x64x64xf32> to vector<64x64xf32>
    %cst_160 = arith.constant dense<0.000000e+00> : vector<128x64xf32>
    %156 = tpu.matmul %153, %155, %cst_160 {dimension_numbers = #tpu.dot_dimension_numbers<[1], [0], [0], [1], [0, 0, 1, 1], [], []>} : vector<128x64xf32>, vector<64x64xf32>, vector<128x64xf32> -> vector<128x64xf32>
    %157 = arith.addf %151, %156 : vector<128x64xf32>
    %c0_161 = arith.constant 0 : index
    %c2_162 = arith.constant 2 : index
    %c1_163 = arith.constant 1 : index
    %c0_164 = arith.constant 0 : index
    %158 = vector.load %arg8[%c0_161, %c2_162, %c1_163, %c0_164] : memref<2x10x10x64xf32, #tpu.memory_space<vmem>>, vector<2x8x8x64xf32>
    %159 = vector.shape_cast %158 : vector<2x8x8x64xf32> to vector<128x64xf32>
    %c2_165 = arith.constant 2 : index
    %c1_166 = arith.constant 1 : index
    %c0_167 = arith.constant 0 : index
    %c0_168 = arith.constant 0 : index
    %160 = vector.load %arg4[%c2_165, %c1_166, %c0_167, %c0_168] : memref<3x3x64x64xf32, #tpu.memory_space<vmem>>, vector<1x1x64x64xf32>
    %161 = vector.shape_cast %160 : vector<1x1x64x64xf32> to vector<64x64xf32>
    %cst_169 = arith.constant dense<0.000000e+00> : vector<128x64xf32>
    %162 = tpu.matmul %159, %161, %cst_169 {dimension_numbers = #tpu.dot_dimension_numbers<[1], [0], [0], [1], [0, 0, 1, 1], [], []>} : vector<128x64xf32>, vector<64x64xf32>, vector<128x64xf32> -> vector<128x64xf32>
    %163 = arith.addf %157, %162 : vector<128x64xf32>
    %c0_170 = arith.constant 0 : index
    %c2_171 = arith.constant 2 : index
    %c2_172 = arith.constant 2 : index
    %c0_173 = arith.constant 0 : index
    %164 = vector.load %arg8[%c0_170, %c2_171, %c2_172, %c0_173] : memref<2x10x10x64xf32, #tpu.memory_space<vmem>>, vector<2x8x8x64xf32>
    %165 = vector.shape_cast %164 : vector<2x8x8x64xf32> to vector<128x64xf32>
    %c2_174 = arith.constant 2 : index
    %c2_175 = arith.constant 2 : index
    %c0_176 = arith.constant 0 : index
    %c0_177 = arith.constant 0 : index
    %166 = vector.load %arg4[%c2_174, %c2_175, %c0_176, %c0_177] : memref<3x3x64x64xf32, #tpu.memory_space<vmem>>, vector<1x1x64x64xf32>
    %167 = vector.shape_cast %166 : vector<1x1x64x64xf32> to vector<64x64xf32>
    %cst_178 = arith.constant dense<0.000000e+00> : vector<128x64xf32>
    %168 = tpu.matmul %165, %167, %cst_178 {dimension_numbers = #tpu.dot_dimension_numbers<[1], [0], [0], [1], [0, 0, 1, 1], [], []>} : vector<128x64xf32>, vector<64x64xf32>, vector<128x64xf32> -> vector<128x64xf32>
    %169 = arith.addf %163, %168 : vector<128x64xf32>
    %c0_179 = arith.constant 0 : index
    %c0_180 = arith.constant 0 : index
    %170 = vector.load %arg5[%c0_179, %c0_180] : memref<1x8xf32, #tpu.memory_space<vmem>>, vector<1x8xf32>
    %c0_181 = arith.constant 0 : index
    %c0_182 = arith.constant 0 : index
    %171 = vector.load %arg6[%c0_181, %c0_182] : memref<1x8xf32, #tpu.memory_space<vmem>>, vector<1x8xf32>
    %cst_183 = arith.constant dense<0.000000e+00> : vector<64xf32>
    %172 = vector.multi_reduction <add>, %169, %cst_183 [0] : vector<128x64xf32> to vector<64xf32>
    %173 = vector.shape_cast %172 : vector<64xf32> to vector<1x64xf32>
    %174 = vector.extract_strided_slice %173 {offsets = [0, 0], sizes = [1, 8], strides = [1, 1]} : vector<1x64xf32> to vector<1x8xf32>
    %175 = vector.extract_strided_slice %173 {offsets = [0, 8], sizes = [1, 8], strides = [1, 1]} : vector<1x64xf32> to vector<1x8xf32>
    %176 = arith.addf %174, %175 : vector<1x8xf32>
    %177 = vector.extract_strided_slice %173 {offsets = [0, 16], sizes = [1, 8], strides = [1, 1]} : vector<1x64xf32> to vector<1x8xf32>
    %178 = arith.addf %176, %177 : vector<1x8xf32>
    %179 = vector.extract_strided_slice %173 {offsets = [0, 24], sizes = [1, 8], strides = [1, 1]} : vector<1x64xf32> to vector<1x8xf32>
    %180 = arith.addf %178, %179 : vector<1x8xf32>
    %181 = vector.extract_strided_slice %173 {offsets = [0, 32], sizes = [1, 8], strides = [1, 1]} : vector<1x64xf32> to vector<1x8xf32>
    %182 = arith.addf %180, %181 : vector<1x8xf32>
    %183 = vector.extract_strided_slice %173 {offsets = [0, 40], sizes = [1, 8], strides = [1, 1]} : vector<1x64xf32> to vector<1x8xf32>
    %184 = arith.addf %182, %183 : vector<1x8xf32>
    %185 = vector.extract_strided_slice %173 {offsets = [0, 48], sizes = [1, 8], strides = [1, 1]} : vector<1x64xf32> to vector<1x8xf32>
    %186 = arith.addf %184, %185 : vector<1x8xf32>
    %187 = vector.extract_strided_slice %173 {offsets = [0, 56], sizes = [1, 8], strides = [1, 1]} : vector<1x64xf32> to vector<1x8xf32>
    %188 = arith.addf %186, %187 : vector<1x8xf32>
    %cst_184 = arith.constant 9.765625E-4 : f32
    %189 = vector.broadcast %cst_184 : f32 to vector<1x8xf32>
    %190 = arith.mulf %188, %189 : vector<1x8xf32>
    %191 = tpu.concatenate %190, %190, %190, %190, %190, %190, %190, %190 in 1 : vector<1x8xf32>, vector<1x8xf32>, vector<1x8xf32>, vector<1x8xf32>, vector<1x8xf32>, vector<1x8xf32>, vector<1x8xf32>, vector<1x8xf32> -> vector<1x64xf32>
    %192 = vector.broadcast %191 : vector<1x64xf32> to vector<128x64xf32>
    %193 = arith.subf %169, %192 : vector<128x64xf32>
    %194 = arith.mulf %193, %193 : vector<128x64xf32>
    %cst_185 = arith.constant dense<0.000000e+00> : vector<64xf32>
    %195 = vector.multi_reduction <add>, %194, %cst_185 [0] : vector<128x64xf32> to vector<64xf32>
    %196 = vector.shape_cast %195 : vector<64xf32> to vector<1x64xf32>
    %197 = vector.extract_strided_slice %196 {offsets = [0, 0], sizes = [1, 8], strides = [1, 1]} : vector<1x64xf32> to vector<1x8xf32>
    %198 = vector.extract_strided_slice %196 {offsets = [0, 8], sizes = [1, 8], strides = [1, 1]} : vector<1x64xf32> to vector<1x8xf32>
    %199 = arith.addf %197, %198 : vector<1x8xf32>
    %200 = vector.extract_strided_slice %196 {offsets = [0, 16], sizes = [1, 8], strides = [1, 1]} : vector<1x64xf32> to vector<1x8xf32>
    %201 = arith.addf %199, %200 : vector<1x8xf32>
    %202 = vector.extract_strided_slice %196 {offsets = [0, 24], sizes = [1, 8], strides = [1, 1]} : vector<1x64xf32> to vector<1x8xf32>
    %203 = arith.addf %201, %202 : vector<1x8xf32>
    %204 = vector.extract_strided_slice %196 {offsets = [0, 32], sizes = [1, 8], strides = [1, 1]} : vector<1x64xf32> to vector<1x8xf32>
    %205 = arith.addf %203, %204 : vector<1x8xf32>
    %206 = vector.extract_strided_slice %196 {offsets = [0, 40], sizes = [1, 8], strides = [1, 1]} : vector<1x64xf32> to vector<1x8xf32>
    %207 = arith.addf %205, %206 : vector<1x8xf32>
    %208 = vector.extract_strided_slice %196 {offsets = [0, 48], sizes = [1, 8], strides = [1, 1]} : vector<1x64xf32> to vector<1x8xf32>
    %209 = arith.addf %207, %208 : vector<1x8xf32>
    %210 = vector.extract_strided_slice %196 {offsets = [0, 56], sizes = [1, 8], strides = [1, 1]} : vector<1x64xf32> to vector<1x8xf32>
    %211 = arith.addf %209, %210 : vector<1x8xf32>
    %cst_186 = arith.constant 9.765625E-4 : f32
    %212 = vector.broadcast %cst_186 : f32 to vector<1x8xf32>
    %213 = arith.mulf %211, %212 : vector<1x8xf32>
    %cst_187 = arith.constant 9.99999974E-6 : f32
    %214 = vector.broadcast %cst_187 : f32 to vector<1x8xf32>
    %215 = arith.addf %213, %214 : vector<1x8xf32>
    %216 = math.rsqrt %215 : vector<1x8xf32>
    %217 = arith.mulf %170, %216 : vector<1x8xf32>
    %218 = tpu.concatenate %217, %217, %217, %217, %217, %217, %217, %217 in 1 : vector<1x8xf32>, vector<1x8xf32>, vector<1x8xf32>, vector<1x8xf32>, vector<1x8xf32>, vector<1x8xf32>, vector<1x8xf32>, vector<1x8xf32> -> vector<1x64xf32>
    %219 = vector.broadcast %218 : vector<1x64xf32> to vector<128x64xf32>
    %220 = arith.mulf %193, %219 : vector<128x64xf32>
    %221 = tpu.concatenate %171, %171, %171, %171, %171, %171, %171, %171 in 1 : vector<1x8xf32>, vector<1x8xf32>, vector<1x8xf32>, vector<1x8xf32>, vector<1x8xf32>, vector<1x8xf32>, vector<1x8xf32>, vector<1x8xf32> -> vector<1x64xf32>
    %222 = vector.broadcast %221 : vector<1x64xf32> to vector<128x64xf32>
    %223 = arith.addf %220, %222 : vector<128x64xf32>
    %cst_188 = arith.constant 0.000000e+00 : f32
    %224 = vector.broadcast %cst_188 : f32 to vector<128x64xf32>
    %225 = arith.maximumf %223, %224 : vector<128x64xf32>
    %c0_189 = arith.constant 0 : index
    %c0_190 = arith.constant 0 : index
    %226 = vector.load %arg7[%c0_189, %c0_190] : memref<128x64xf32, #tpu.memory_space<vmem>>, vector<128x64xf32>
    tpu.vector_store %arg7[%c0_189, %c0_190], %225 {strides = array<i32>} : memref<128x64xf32, #tpu.memory_space<vmem>>, vector<128x64xf32>,
    return
  }
}

</mosaic_0001>

<bundles_post_ra>
// kernel: conv_block_forward.1
= control target key start
LH: loop header
LB: loop body
LE: loop exit
PB: predicated region body
PF: predicated region fallthrough
CT: control target
= control target key end

     0   :  { %vm67_vm0 = vcmask 261120   ;;  %vm1348_vm1 = vcmask 523264   ;;  %s3935_s30 = smov 104   ;;  %s3936_s8 = smov 120   ;;  %vm1438_vm2 = vcmask 64512   ;;  %vm1440_vm3 = vcmask 130048   ;;  %s6243_s1 = inlined_call_operand.vmem [shape: f32[3,3,32,64], index: 1, kind: input, shape index: {}]   ;;  %s6244_s0 = inlined_call_operand.vmem [shape: f32[2,10,10,32], index: 0, kind: input, shape index: {}]   ;;  %s6245_s3 = inlined_call_operand.vmem [shape: f32[1,8], index: 3, kind: input, shape index: {}]   ;;  %s6246_s4 = inlined_call_operand.vmem [shape: f32[3,3,64,64], index: 4, kind: input, shape index: {}]   ;;  %s6247_s2 = inlined_call_operand.vmem [shape: f32[1,8], index: 2, kind: input, shape index: {}]   ;;  %s6248_s6 = inlined_call_operand.vmem [shape: f32[1,8], index: 6, kind: input, shape index: {}]   ;;  %s6249_s5 = inlined_call_operand.vmem [shape: f32[1,8], index: 5, kind: input, shape index: {}]   ;;  %s6250_s7 = inlined_call_operand.vmem [shape: f32[128,64], index: 7, kind: output, shape index: {}]  }
   0x1   :  { %v3428_v0 = vld [vmem:[%s6243_s1 + $0x38] sm:$0xff]  ;;  %v3427_v2 = vld [vmem:[%s6243_s1 + $0x30] sm:$0xff]  ;;  %v3426_v4 = vld [vmem:[%s6243_s1 + $0x28] sm:$0xff]  ;;  %s3937_s9 = smov 80   ;;  %s3938_s10 = smov 96   ;;  %vm1442_vm4 = vcmask 195584  }
   0x2   :  { %v45_v1 = vld [vmem:[%s6243_s1 + $0x18] sm:$0xff]  ;;  %3905 = vmatpush.msra.mxu2 %v3428_v0  ;;  %v44_v3 = vld [vmem:[%s6243_s1 + $0x10] sm:$0xff]  ;;  %v43_v5 = vld [vmem:[%s6243_s1 + $0x8] sm:$0xff]  ;;  %128 = vmatpush.msra.mxu0 %v3428_v0  ;;  %s3939_s11 = smov 112   ;;  %s3940_s12 = smov 72   ;;  %vm1445_vm5 = vcmask 326656  }
   0x3   :  { %3909 = vmatpush.msra.mxu3 %v45_v1  ;;  %241 = vmatpush.msra.mxu1 %v45_v1  ;;  %v3425_v6 = vld [vmem:[%s6243_s1 + $0x20] sm:$0xff]  ;;  %v3464_v10 = vld [vmem:[%s6243_s1 + $0x58] sm:$0xff]  ;;  %v3463_v15 = vld [vmem:[%s6243_s1 + $0x50] sm:$0xff]  ;;  %s3941_s13 = smov 24   ;;  %s3942_s14 = smov 16   ;;  %vm1447_vm6 = vcmask 392192  }
   0x4   :  { %3906 = vmatpush.msra.mxu2 %v3427_v2  ;;  %v42_v7 = vld [vmem:[%s6243_s1] sm:$0xff]  ;;  %129 = vmatpush.msra.mxu0 %v3427_v2  ;;  %v3500_v11 = vld [vmem:[%s6243_s1 + $0x78] sm:$0xff]  ;;  %v3499_v16 = vld [vmem:[%s6243_s1 + $0x70] sm:$0xff]  ;;  %s3943_s15 = smov 8   ;;  %s3944_s16 = smov 48   ;;  %vm1449_vm7 = vcmask 457728  }
   0x5   :  { %3910 = vmatpush.msra.mxu3 %v44_v3  ;;  %242 = vmatpush.msra.mxu1 %v44_v3  ;;  %v54_v8 = vld [vmem:[%s6244_s0 + $0xa1] sm:$0xff]  ;;  %v3536_v14 = vld [vmem:[%s6243_s1 + $0x98] sm:$0xff]  ;;  %v3535_v17 = vld [vmem:[%s6243_s1 + $0x90] sm:$0xff]  ;;  %s3945_s17 = smov 40   ;;  %s3946_s18 = smov 32   ;;  %vm1674_vm11 = vcmask 517120  }
   0x6   :  { %3907 = vmatpush.msra.mxu2 %v3426_v4  ;;  %v34_v9 = vld [vmem:[%s6244_s0 + $0xa0] sm:$0xff]  ;;  %130 = vmatpush.msra.mxu0 %v3426_v4  ;;  %v3462_v18 = vld [vmem:[%s6243_s1 + $0x48] sm:$0xff]  ;;  %v4056_v20 = vld [vmem:[%s6244_s0 + $0xb1] sm:$0xff]  ;;  %s3947_s19 = smov 56  }
   0x7   :  { %3911 = vmatpush.msra.mxu3 %v43_v5  ;;  %243 = vmatpush.msra.mxu1 %v43_v5  ;;  %v46_v12 = vld [vmem:[%s6244_s0 + $0x1] sm:$0xff]  ;;  %v4061_v21 = vld [vmem:[%s6244_s0 + $0xb0] sm:$0xff]  ;;  %v3608_v40 = vld [vmem:[%s6243_s1 + $0xd8] sm:$0xff] }
   0x8   :  { %3908 = vmatpush.msra.mxu2 %v3425_v6  ;;  %v26_v13 = vld [vmem:[%s6244_s0] sm:$0xff]  ;;  %131 = vmatpush.msra.mxu0 %v3425_v6  ;;  %v3498_v19 = vld [vmem:[%s6243_s1 + $0x68] sm:$0xff]  ;;  %v4070_v22 = vld [vmem:[%s6244_s0 + $0x11] sm:$0xff] }
   0x9   :  { %3912 = vmatpush.msra.mxu3 %v42_v7  ;;  %3437 = vmatmul.msk.f32.vlgmr.msra.gmra.mxu2 %vm67_vm0, %v54_v8  ;;  %v4075_v23 = vld [vmem:[%s6244_s0 + $0x10] sm:$0xff]  ;;  %v3534_v24 = vld [vmem:[%s6243_s1 + $0x88] sm:$0xff]  ;;  %v4092_v26 = vld [vmem:[%s6244_s0 + $0xc0] sm:$0xff] }
   0xa   :  { %3453 = vmatmul.msk.f32.vlgmr.msra.gmra.mxu3 %vm67_vm0, %v34_v9  ;;  %375 = vmatpush.msrb.mxu2 %v3464_v10  ;;  %v4087_v25 = vld [vmem:[%s6244_s0 + $0xc1] sm:$0xff]  ;;  %v4121_v31 = vld [vmem:[%s6244_s0 + $0xd1] sm:$0xff] }
   0xb   :  { %526 = vmatpush.msrb.mxu3 %v3500_v11  ;;  %244 = vmatpush.msra.mxu1 %v42_v7  ;;  %v4101_v27 = vld [vmem:[%s6244_s0 + $0x21] sm:$0xff]  ;;  %v4126_v32 = vld [vmem:[%s6244_s0 + $0xd0] sm:$0xff]  ;;  %v3644_v41 = vld [vmem:[%s6243_s1 + $0xf8] sm:$0xff] }
   0xc   :  { %3429 = vmatmul.msk.f32.vlgmr.msra.gmra.mxu0 %vm67_vm0, %v46_v12  ;;  %3445 = vmatmul.msk.f32.vlgmr.msra.gmra.mxu1 %vm67_vm0, %v26_v13  ;;  %v4106_v28 = vld [vmem:[%s6244_s0 + $0x20] sm:$0xff]  ;;  %v4135_v33 = vld [vmem:[%s6244_s0 + $0x31] sm:$0xff]  ;;  %v3570_v48 = vld [vmem:[%s6243_s1 + $0xa8] sm:$0xff] }
   0xd   :  { %676 = vmatpush.msrb.mxu0 %v3536_v14  ;;  %376 = vmatpush.msrb.mxu2 %v3463_v15  ;;  %v3461_v29 = vld [vmem:[%s6243_s1 + $0x40] sm:$0xff]  ;;  %v4140_v34 = vld [vmem:[%s6244_s0 + $0x30] sm:$0xff]  ;;  %v3572_v42 = vld [vmem:[%s6243_s1 + $0xb8] sm:$0xff] }
   0xe   :  { %527 = vmatpush.msrb.mxu3 %v3499_v16  ;;  %v3497_v30 = vld [vmem:[%s6243_s1 + $0x60] sm:$0xff]  ;;  %v3571_v43 = vld [vmem:[%s6243_s1 + $0xb0] sm:$0xff]  ;;  %826 = vmatpush.msrb.mxu1 %v3572_v42  ;;  %v3680_v49 = vld [vmem:[%s6243_s1 + $0x118] sm:$0xff] }
   0xf   :  { %677 = vmatpush.msrb.mxu0 %v3535_v17  ;;  %377 = vmatpush.msrb.mxu2 %v3462_v18  ;;  %v3533_v35 = vld [vmem:[%s6243_s1 + $0x80] sm:$0xff]  ;;  %v4192_v44 = vld [vmem:[%s6244_s0 + $0xf1] sm:$0xff]  ;;  %v3606_v3 = vld [vmem:[%s6243_s1 + $0xc8] sm:$0xff] }
  0x10   :  { %528 = vmatpush.msrb.mxu3 %v3498_v19  ;;  %v4152_v36 = vld [vmem:[%s6244_s0 + $0xe1] sm:$0xff]  ;;  %827 = vmatpush.msrb.mxu1 %v3571_v43  ;;  %v4197_v45 = vld [vmem:[%s6244_s0 + $0xf0] sm:$0xff] }
  0x11   :  { %3438 = vmatmul.msk.f32.gmra.mxu2 %vm67_vm0, %v4056_v20  ;;  %678 = vmatpush.msrb.mxu0 %v3534_v24  ;;  %v4157_v37 = vld [vmem:[%s6244_s0 + $0xe0] sm:$0xff]  ;;  %v4202_v46 = vld [vmem:[%s6244_s0 + $0x51] sm:$0xff]  ;;  %v3642_v4 = vld [vmem:[%s6243_s1 + $0xe8] sm:$0xff] }
  0x12   :  { %3454 = vmatmul.msk.f32.gmra.mxu3 %vm67_vm0, %v4061_v21  ;;  %378 = vmatpush.msrb.mxu2 %v3461_v29  ;;  %v4166_v38 = vld [vmem:[%s6244_s0 + $0x41] sm:$0xff]  ;;  %v4211_v47 = vld [vmem:[%s6244_s0 + $0x50] sm:$0xff] }
  0x13   :  { %529 = vmatpush.msrb.mxu3 %v3497_v30  ;;  %679 = vmatpush.msrb.mxu0 %v3533_v35  ;;  %v4171_v39 = vld [vmem:[%s6244_s0 + $0x40] sm:$0xff]  ;;  %v4257_v55 = vld [vmem:[%s6244_s0 + $0x111] sm:$0xff]  ;;  %v3678_v6 = vld [vmem:[%s6243_s1 + $0x108] sm:$0xff] }
  0x14   :  { %3430 = vmatmul.msk.f32.gmra.mxu0 %vm67_vm0, %v4070_v22  ;;  %3446 = vmatmul.msk.f32.gmra.mxu1 %vm67_vm0, %v4075_v23  ;;  %v3569_v50 = vld [vmem:[%s6243_s1 + $0xa0] sm:$0xff]  ;;  %v4262_v56 = vld [vmem:[%s6244_s0 + $0x110] sm:$0xff] }
  0x15   :  { %977 = vmatpush.msra.mxu2 %v3608_v40  ;;  %1127 = vmatpush.msra.mxu3 %v3644_v41  ;;  %v4229_v51 = vld [vmem:[%s6244_s0 + $0x101] sm:$0xff]  ;;  %v4271_v57 = vld [vmem:[%s6244_s0 + $0x71] sm:$0xff] }
  0x16   :  { %828 = vmatpush.msrb.mxu1 %v3570_v48  ;;  %1277 = vmatpush.msra.mxu0 %v3680_v49  ;;  %v4234_v52 = vld [vmem:[%s6244_s0 + $0x100] sm:$0xff]  ;;  %v4276_v58 = vld [vmem:[%s6244_s0 + $0x70] sm:$0xff] }
  0x17   :  { %v4243_v53 = vld [vmem:[%s6244_s0 + $0x61] sm:$0xff]  ;;  %v3607_v60 = vld [vmem:[%s6243_s1 + $0xd0] sm:$0xff] }
  0x18   :  { %829 = vmatpush.msrb.mxu1 %v3569_v50  ;;  %v4248_v54 = vld [vmem:[%s6244_s0 + $0x60] sm:$0xff]  ;;  %v3643_v61 = vld [vmem:[%s6243_s1 + $0xf0] sm:$0xff]  ;;  %978 = vmatpush.msra.mxu2 %v3607_v60 }
  0x19   :  { %3439 = vmatmul.msk.f32.gmra.mxu2 %vm67_vm0, %v4087_v25  ;;  %v294_v59 = vld [vmem:[%s6244_s0 + $0x2] sm:$0xff]  ;;  %1128 = vmatpush.msra.mxu3 %v3643_v61  ;;  %v295_v62 = vld [vmem:[%s6244_s0 + $0x12] sm:$0xff] }
  0x1a   :  { %3455 = vmatmul.msk.f32.gmra.mxu3 %vm67_vm0, %v4092_v26  ;;  %v3679_v63 = vld [vmem:[%s6243_s1 + $0x110] sm:$0xff]  ;;  %v4309_v0 = vld [vmem:[%s6244_s0 + $0x22] sm:$0xff]  ;;  %979 = vmatpush.msra.mxu2 %v3606_v3 }
  0x1b   :  { %1278 = vmatpush.msra.mxu0 %v3679_v63  ;;  %v4322_v1 = vld [vmem:[%s6244_s0 + $0x32] sm:$0xff]  ;;  %v4335_v2 = vld [vmem:[%s6244_s0 + $0x42] sm:$0xff]  ;;  %1129 = vmatpush.msra.mxu3 %v3642_v4 }
  0x1c   :  { %3431 = vmatmul.msk.f32.gmra.mxu0 %vm67_vm0, %v4101_v27  ;;  %3447 = vmatmul.msk.f32.gmra.mxu1 %vm67_vm0, %v4106_v28  ;;  %v4354_v5 = vld [vmem:[%s6244_s0 + $0x52] sm:$0xff]  ;;  %v4370_v7 = vld [vmem:[%s6244_s0 + $0x62] sm:$0xff] }
  0x1d   :  { %1279 = vmatpush.msra.mxu0 %v3678_v6  ;;  %v4383_v8 = vld [vmem:[%s6244_s0 + $0x72] sm:$0xff]  ;;  %v4392_v9 = vld [vmem:[%s6244_s0 + $0x80] sm:$0xff] }
  0x1e   :  { %v4401_v10 = vld [vmem:[%s6244_s0 + $0x81] sm:$0xff]  ;;  %v303_v16 = vld [vmem:[%s6244_s0 + $0xb2] sm:$0xff] }
  0x1f   :  { %v4406_v11 = vld [vmem:[%s6244_s0 + $0x82] sm:$0xff]  ;;  %v4462_v35 = vld [vmem:[%s6244_s0 + $0xd2] sm:$0xff] }
  0x20   :  { %v302_v12 = vld [vmem:[%s6244_s0 + $0xa2] sm:$0xff]  ;;  %v4496_v61 = vld [vmem:[%s6244_s0 + $0xf2] sm:$0xff] }
  0x21   :  { %3440 = vmatmul.msk.f32.gmra.mxu2 %vm67_vm0, %v4121_v31  ;;  %v3605_v14 = vld [vmem:[%s6243_s1 + $0xc0] sm:$0xff] }
  0x22   :  { %3456 = vmatmul.msk.f32.gmra.mxu3 %vm67_vm0, %v4126_v32  ;;  %v3641_v15 = vld [vmem:[%s6243_s1 + $0xe0] sm:$0xff]  ;;  %980 = vmatpush.msra.mxu2 %v3605_v14 }
  0x23   :  { %1130 = vmatpush.msra.mxu3 %v3641_v15  ;;  %v4479_v48 = vld [vmem:[%s6244_s0 + $0xe2] sm:$0xff] }
  0x24   :  { %3432 = vmatmul.msk.f32.gmra.mxu0 %vm67_vm0, %v4135_v33  ;;  %3448 = vmatmul.msk.f32.gmra.mxu1 %vm67_vm0, %v4140_v34  ;;  %v4513_v6 = vld [vmem:[%s6244_s0 + $0x102] sm:$0xff] }
  0x29   :  { %3441 = vmatmul.msk.f32.gmra.mxu2 %vm67_vm0, %v4152_v36 }
  0x2a   :  { %3457 = vmatmul.msk.f32.gmra.mxu3 %vm67_vm0, %v4157_v37 }
  0x2c   :  { %3433 = vmatmul.msk.f32.gmra.mxu0 %vm67_vm0, %v4166_v38  ;;  %3449 = vmatmul.msk.f32.gmra.mxu1 %vm67_vm0, %v4171_v39 }
  0x31   :  { %3442 = vmatmul.msk.f32.gmra.mxu2 %vm67_vm0, %v4192_v44 }
  0x32   :  { %3458 = vmatmul.msk.f32.gmra.mxu3 %vm67_vm0, %v4197_v45 }
  0x34   :  { %3434 = vmatmul.msk.f32.gmra.mxu0 %vm67_vm0, %v4202_v46  ;;  %3450 = vmatmul.msk.f32.gmra.mxu1 %vm67_vm0, %v4211_v47 }
  0x39   :  { %3443 = vmatmul.msk.f32.gmra.mxu2 %vm67_vm0, %v4229_v51 }
  0x3a   :  { %3459 = vmatmul.msk.f32.gmra.mxu3 %vm67_vm0, %v4234_v52 }
  0x3c   :  { %3435 = vmatmul.msk.f32.gmra.mxu0 %vm67_vm0, %v4243_v53  ;;  %3451 = vmatmul.msk.f32.gmra.mxu1 %vm67_vm0, %v4248_v54 }
  0x41   :  { %3444 = vmatmul.msk.f32.gmra.mxu2 %vm67_vm0, %v4257_v55 }
  0x42   :  { %3460 = vmatmul.msk.f32.gmra.mxu3 %vm67_vm0, %v4262_v56 }
  0x44   :  { %3436 = vmatmul.msk.f32.gmra.mxu0 %vm67_vm0, %v4271_v57  ;;  %3452 = vmatmul.msk.f32.gmra.mxu1 %vm67_vm0, %v4276_v58 }
  0x49   :  { %3465 = vmatmul.msk.f32.vlgmr.msrb.gmra.mxu2 %vm67_vm0, %v294_v59 }
  0x4a   :  { %3501 = vmatmul.msk.f32.vlgmr.msrb.gmra.mxu3 %vm67_vm0, %v4075_v23 }
  0x4c   :  { %3537 = vmatmul.msk.f32.vlgmr.msrb.gmra.mxu0 %vm67_vm0, %v4070_v22  ;;  %3573 = vmatmul.msk.f32.vlgmr.msrb.gmra.mxu1 %vm67_vm0, %v295_v62  ;;  %v3677_v22 = vld [vmem:[%s6243_s1 + $0x100] sm:$0xff] }
  0x4d   :  { %1280 = vmatpush.msra.mxu0 %v3677_v22 }
  0x51   :  { %3466 = vmatmul.msk.f32.gmra.mxu2 %vm67_vm0, %v295_v62 }
  0x52   :  { %3502 = vmatmul.msk.f32.gmra.mxu3 %vm67_vm0, %v4106_v28 }
  0x54   :  { %3538 = vmatmul.msk.f32.gmra.mxu0 %vm67_vm0, %v4101_v27  ;;  %3574 = vmatmul.msk.f32.gmra.mxu1 %vm67_vm0, %v4309_v0 }
  0x59   :  { %3467 = vmatmul.msk.f32.gmra.mxu2 %vm67_vm0, %v4309_v0 }
  0x5a   :  { %3503 = vmatmul.msk.f32.gmra.mxu3 %vm67_vm0, %v4140_v34 }
  0x5c   :  { %3539 = vmatmul.msk.f32.gmra.mxu0 %vm67_vm0, %v4135_v33  ;;  %3575 = vmatmul.msk.f32.gmra.mxu1 %vm67_vm0, %v4322_v1 }
  0x61   :  { %3468 = vmatmul.msk.f32.gmra.mxu2 %vm67_vm0, %v4322_v1 }
  0x62   :  { %3504 = vmatmul.msk.f32.gmra.mxu3 %vm67_vm0, %v4171_v39 }
  0x64   :  { %3540 = vmatmul.msk.f32.gmra.mxu0 %vm67_vm0, %v4166_v38  ;;  %3576 = vmatmul.msk.f32.gmra.mxu1 %vm67_vm0, %v4335_v2 }
  0x69   :  { %3469 = vmatmul.msk.f32.gmra.mxu2 %vm67_vm0, %v4335_v2 }
  0x6a   :  { %3505 = vmatmul.msk.f32.gmra.mxu3 %vm67_vm0, %v4211_v47 }
  0x6c   :  { %3541 = vmatmul.msk.f32.gmra.mxu0 %vm67_vm0, %v4202_v46  ;;  %3577 = vmatmul.msk.f32.gmra.mxu1 %vm67_vm0, %v4354_v5 }
  0x71   :  { %3470 = vmatmul.msk.f32.gmra.mxu2 %vm67_vm0, %v4354_v5 }
  0x72   :  { %3506 = vmatmul.msk.f32.gmra.mxu3 %vm67_vm0, %v4248_v54 }
  0x74   :  { %3542 = vmatmul.msk.f32.gmra.mxu0 %vm67_vm0, %v4243_v53  ;;  %3578 = vmatmul.msk.f32.gmra.mxu1 %vm67_vm0, %v4370_v7 }
  0x79   :  { %3471 = vmatmul.msk.f32.gmra.mxu2 %vm67_vm0, %v4370_v7 }
  0x7a   :  { %3507 = vmatmul.msk.f32.gmra.mxu3 %vm67_vm0, %v4276_v58 }
  0x7c   :  { %3543 = vmatmul.msk.f32.gmra.mxu0 %vm67_vm0, %v4271_v57  ;;  %3579 = vmatmul.msk.f32.gmra.mxu1 %vm67_vm0, %v4383_v8 }
  0x81   :  { %3472 = vmatmul.msk.f32.gmra.mxu2 %vm67_vm0, %v4383_v8 }
  0x82   :  { %3508 = vmatmul.msk.f32.gmra.mxu3 %vm67_vm0, %v4392_v9 }
  0x84   :  { %3544 = vmatmul.msk.f32.gmra.mxu0 %vm67_vm0, %v4401_v10  ;;  %3580 = vmatmul.msk.f32.gmra.mxu1 %vm67_vm0, %v4406_v11 }
  0x89   :  { %3473 = vmatmul.msk.f32.gmra.mxu2 %vm67_vm0, %v302_v12  ;;  %v4418_v13 = vpop.f32.mrf.mxu0 }
  0x8a   :  { %3509 = vmatmul.msk.f32.gmra.mxu3 %vm67_vm0, %v4061_v21 }
  0x8c   :  { %v157_v17 = vpop.f32.mrf.mxu2  ;;  %3545 = vmatmul.msk.f32.gmra.mxu0 %vm67_vm0, %v4056_v20  ;;  %3581 = vmatmul.msk.f32.gmra.mxu1 %vm67_vm0, %v303_v16  ;;  %v4445_v20 = vld [vmem:[%s6244_s0 + $0xc2] sm:$0xff] }
  0x8d   :  { %v270_v18 = vpop.f32.mrf.mxu3 }
  0x8e   :  { %v4432_v19 = vadd.f32 %v270_v18, %v157_v17  ;;  %v4530_v18 = vld [vmem:[%s6244_s0 + $0x112] sm:$0xff] }
  0x91   :  { %3474 = vmatmul.msk.f32.gmra.mxu2 %vm67_vm0, %v303_v16  ;;  %v4437_v21 = vpop.f32.mrf.mxu0  ;;  %v246_v16 = vpop.f32.mrf.mxu1 }
  0x92   :  { %3510 = vmatmul.msk.f32.gmra.mxu3 %vm67_vm0, %v4092_v26 }
  0x94   :  { %v160_v23 = vpop.f32.mrf.mxu2  ;;  %3546 = vmatmul.msk.f32.gmra.mxu0 %vm67_vm0, %v4087_v25  ;;  %3582 = vmatmul.msk.f32.gmra.mxu1 %vm67_vm0, %v4445_v20 }
  0x95   :  { %v273_v24 = vpop.f32.mrf.mxu3 }
  0x96   :  { %v4451_v29 = vadd.f32 %v273_v24, %v160_v23 }
  0x98   :  { %6251 = vst [vmem:[#allocation3_spill] sm:$0xff] %v4451_v29 }
  0x99   :  { %3475 = vmatmul.msk.f32.gmra.mxu2 %vm67_vm0, %v4445_v20  ;;  %v4457_v30 = vpop.f32.mrf.mxu0 }
  0x9a   :  { %3511 = vmatmul.msk.f32.gmra.mxu3 %vm67_vm0, %v4126_v32 }
  0x9c   :  { %v163_v40 = vpop.f32.mrf.mxu2  ;;  %3547 = vmatmul.msk.f32.gmra.mxu0 %vm67_vm0, %v4121_v31  ;;  %3583 = vmatmul.msk.f32.gmra.mxu1 %vm67_vm0, %v4462_v35 }
  0x9d   :  { %v276_v41 = vpop.f32.mrf.mxu3 }
  0x9e   :  { %v4468_v42 = vadd.f32 %v276_v41, %v163_v40  ;;  %v4541_v40 = vld [vmem:[%s6244_s0 + $0x120] sm:$0xff] }
  0xa0   :  { %6252 = vst [vmem:[#allocation4_spill] sm:$0xff] %v4468_v42 }
  0xa1   :  { %3476 = vmatmul.msk.f32.gmra.mxu2 %vm67_vm0, %v4462_v35  ;;  %v4474_v43 = vpop.f32.mrf.mxu0 }
  0xa2   :  { %3512 = vmatmul.msk.f32.gmra.mxu3 %vm67_vm0, %v4157_v37 }
  0xa4   :  { %v166_v49 = vpop.f32.mrf.mxu2  ;;  %3548 = vmatmul.msk.f32.gmra.mxu0 %vm67_vm0, %v4152_v36  ;;  %3584 = vmatmul.msk.f32.gmra.mxu1 %vm67_vm0, %v4479_v48 }
  0xa5   :  { %v279_v50 = vpop.f32.mrf.mxu3 }
  0xa6   :  { %v4485_v59 = vadd.f32 %v279_v50, %v166_v49  ;;  %v4552_v49 = vld [vmem:[%s6244_s0 + $0x121] sm:$0xff] }
  0xa7   :  { %v4557_v50 = vld [vmem:[%s6244_s0 + $0x122] sm:$0xff] }
  0xa8   :  { %6253 = vst [vmem:[#allocation5_spill] sm:$0xff] %v4485_v59 }
  0xa9   :  { %3477 = vmatmul.msk.f32.gmra.mxu2 %vm67_vm0, %v4479_v48  ;;  %v4491_v60 = vpop.f32.mrf.mxu0 }
  0xaa   :  { %3513 = vmatmul.msk.f32.gmra.mxu3 %vm67_vm0, %v4197_v45 }
  0xac   :  { %v169_v62 = vpop.f32.mrf.mxu2  ;;  %3549 = vmatmul.msk.f32.gmra.mxu0 %vm67_vm0, %v4192_v44  ;;  %3585 = vmatmul.msk.f32.gmra.mxu1 %vm67_vm0, %v4496_v61 }
  0xad   :  { %v282_v63 = vpop.f32.mrf.mxu3 }
  0xae   :  { %v4502_v3 = vadd.f32 %v282_v63, %v169_v62  ;;  %v249_v62 = vpop.f32.mrf.mxu1 }
  0xb0   :  { %6254 = vst [vmem:[#allocation6_spill] sm:$0xff] %v4502_v3 }
  0xb1   :  { %3478 = vmatmul.msk.f32.gmra.mxu2 %vm67_vm0, %v4496_v61  ;;  %v4508_v4 = vpop.f32.mrf.mxu0 }
  0xb2   :  { %3514 = vmatmul.msk.f32.gmra.mxu3 %vm67_vm0, %v4234_v52 }
  0xb4   :  { %v172_v12 = vpop.f32.mrf.mxu2  ;;  %3550 = vmatmul.msk.f32.gmra.mxu0 %vm67_vm0, %v4229_v51  ;;  %3586 = vmatmul.msk.f32.gmra.mxu1 %vm67_vm0, %v4513_v6 }
  0xb5   :  { %v285_v14 = vpop.f32.mrf.mxu3 }
  0xb6   :  { %v4519_v15 = vadd.f32 %v285_v14, %v172_v12  ;;  %v252_v3 = vpop.f32.mrf.mxu1 }
  0xb8   :  { %6255 = vst [vmem:[#allocation7_spill] sm:$0xff] %v4519_v15 }
  0xb9   :  { %3479 = vmatmul.msk.f32.gmra.mxu2 %vm67_vm0, %v4513_v6  ;;  %v4525_v17 = vpop.f32.mrf.mxu0 }
  0xba   :  { %3515 = vmatmul.msk.f32.gmra.mxu3 %vm67_vm0, %v4262_v56 }
  0xbc   :  { %v175_v22 = vpop.f32.mrf.mxu2  ;;  %3551 = vmatmul.msk.f32.gmra.mxu0 %vm67_vm0, %v4257_v55  ;;  %3587 = vmatmul.msk.f32.gmra.mxu1 %vm67_vm0, %v4530_v18 }
  0xbd   :  { %v288_v23 = vpop.f32.mrf.mxu3 }
  0xbe   :  { %v4536_v24 = vadd.f32 %v288_v23, %v175_v22  ;;  %v247_v23 = vadd.f32 %v246_v16, %v4418_v13 }
  0xc0   :  { %6256 = vst [vmem:[#allocation8_spill] sm:$0xff] %v4536_v24 }
  0xc1   :  { %3480 = vmatmul.msk.f32.gmra.mxu2 %vm67_vm0, %v4530_v18  ;;  %v4547_v41 = vpop.f32.mrf.mxu0 }
  0xc2   :  { %3516 = vmatmul.msk.f32.gmra.mxu3 %vm67_vm0, %v4541_v40 }
  0xc4   :  { %v178_v63 = vpop.f32.mrf.mxu2  ;;  %3552 = vmatmul.msk.f32.gmra.mxu0 %vm67_vm0, %v4552_v49  ;;  %3588 = vmatmul.msk.f32.gmra.mxu1 %vm67_vm0, %v4557_v50 }
  0xc5   :  { %v291_v12 = vpop.f32.mrf.mxu3 }
  0xc6   :  { %v4563_v14 = vadd.f32 %v291_v12, %v178_v63  ;;  %v255_v63 = vpop.f32.mrf.mxu1 }
  0xc8   :  { %6257 = vst [vmem:[#allocation9_spill] sm:$0xff] %v4563_v14 }
  0xc9   :  { %3609 = vmatmul.msk.f32.vlgmr.msra.gmra.mxu2 %vm67_vm0, %v4106_v28  ;;  %v681_v22 = vpop.f32.mrf.mxu0  ;;  %v250_v28 = vadd.f32 %v249_v62, %v4437_v21 }
  0xca   :  { %3645 = vmatmul.msk.f32.vlgmr.msra.gmra.mxu3 %vm67_vm0, %v4101_v27 }
  0xcc   :  { %v380_v24 = vpop.f32.mrf.mxu2  ;;  %3681 = vmatmul.msk.f32.vlgmr.msra.gmra.mxu0 %vm67_vm0, %v4309_v0 }
  0xcd   :  { %v531_v15 = vpop.f32.mrf.mxu3  ;;  %v428_v59 = vadd.f32 %v380_v24, %v247_v23 }
  0xce   :  { %v258_v62 = vpop.f32.mrf.mxu1 }
  0xcf   :  { %v579_v42 = vadd.f32 %v531_v15, %v428_v59 }
  0xd1   :  { %v4572_v29 = vadd.f32 %v681_v22, %v579_v42  ;;  %3610 = vmatmul.msk.f32.gmra.mxu2 %vm67_vm0, %v4140_v34  ;;  %v684_v27 = vpop.f32.mrf.mxu0  ;;  %v253_v34 = vadd.f32 %v252_v3, %v4457_v30 }
  0xd2   :  { %3646 = vmatmul.msk.f32.gmra.mxu3 %vm67_vm0, %v4135_v33 }
  0xd4   :  { %v383_v13 = vpop.f32.mrf.mxu2  ;;  %3682 = vmatmul.msk.f32.gmra.mxu0 %vm67_vm0, %v4322_v1 }
  0xd5   :  { %v534_v16 = vpop.f32.mrf.mxu3  ;;  %v429_v0 = vadd.f32 %v383_v13, %v250_v28 }
  0xd7   :  { %v580_v24 = vadd.f32 %v534_v16, %v429_v0 }
  0xd9   :  { %v4581_v59 = vadd.f32 %v684_v27, %v580_v24  ;;  %3611 = vmatmul.msk.f32.gmra.mxu2 %vm67_vm0, %v4171_v39  ;;  %v687_v33 = vpop.f32.mrf.mxu0  ;;  %v256_v39 = vadd.f32 %v255_v63, %v4474_v43  ;;  %v261_v27 = vpop.f32.mrf.mxu1 }
  0xda   :  { %3647 = vmatmul.msk.f32.gmra.mxu3 %vm67_vm0, %v4166_v38 }
  0xdc   :  { %v386_v21 = vpop.f32.mrf.mxu2  ;;  %3683 = vmatmul.msk.f32.gmra.mxu0 %vm67_vm0, %v4335_v2 }
  0xdd   :  { %v537_v42 = vpop.f32.mrf.mxu3  ;;  %v430_v1 = vadd.f32 %v386_v21, %v253_v34  ;;  %v3596_v21 = vld [vmem:[%s6244_s0 + $0x90] sm:$0xff] }
  0xdf   :  { %v581_v15 = vadd.f32 %v537_v42, %v430_v1 }
  0xe1   :  { %v4590_v12 = vadd.f32 %v687_v33, %v581_v15  ;;  %3612 = vmatmul.msk.f32.gmra.mxu2 %vm67_vm0, %v4211_v47  ;;  %v690_v38 = vpop.f32.mrf.mxu0 }
  0xe2   :  { %3648 = vmatmul.msk.f32.gmra.mxu3 %vm67_vm0, %v4202_v46  ;;  %v259_v46 = vadd.f32 %v258_v62, %v4491_v60 }
  0xe4   :  { %v389_v30 = vpop.f32.mrf.mxu2  ;;  %3684 = vmatmul.msk.f32.gmra.mxu0 %vm67_vm0, %v4354_v5 }
  0xe5   :  { %v540_v3 = vpop.f32.mrf.mxu3  ;;  %v431_v2 = vadd.f32 %v389_v30, %v256_v39 }
  0xe7   :  { %v582_v22 = vadd.f32 %v540_v3, %v431_v2 }
  0xe9   :  { %v4599_v23 = vadd.f32 %v690_v38, %v582_v22  ;;  %3613 = vmatmul.msk.f32.gmra.mxu2 %vm67_vm0, %v4248_v54  ;;  %v693_v47 = vpop.f32.mrf.mxu0  ;;  %v262_v54 = vadd.f32 %v261_v27, %v4508_v4 }
  0xea   :  { %3649 = vmatmul.msk.f32.gmra.mxu3 %vm67_vm0, %v4243_v53 }
  0xec   :  { %v392_v43 = vpop.f32.mrf.mxu2  ;;  %3685 = vmatmul.msk.f32.gmra.mxu0 %vm67_vm0, %v4370_v7  ;;  %v264_v7 = vpop.f32.mrf.mxu1 }
  0xed   :  { %v543_v28 = vpop.f32.mrf.mxu3  ;;  %v432_v5 = vadd.f32 %v392_v43, %v259_v46 }
  0xef   :  { %v583_v13 = vadd.f32 %v543_v28, %v432_v5  ;;  %v3676_v28 = vld [vmem:[%s6244_s0 + $0x132] sm:$0xff] }
  0xf1   :  { %v4608_v16 = vadd.f32 %v693_v47, %v583_v13  ;;  %3614 = vmatmul.msk.f32.gmra.mxu2 %vm67_vm0, %v4276_v58  ;;  %v696_v53 = vpop.f32.mrf.mxu0  ;;  %v265_v58 = vadd.f32 %v264_v7, %v4525_v17 }
  0xf2   :  { %3650 = vmatmul.msk.f32.gmra.mxu3 %vm67_vm0, %v4271_v57 }
  0xf4   :  { %v395_v60 = vpop.f32.mrf.mxu2  ;;  %3686 = vmatmul.msk.f32.gmra.mxu0 %vm67_vm0, %v4383_v8  ;;  %v267_v1 = vpop.f32.mrf.mxu1 }
  0xf5   :  { %v546_v0 = vpop.f32.mrf.mxu3  ;;  %v433_v63 = vadd.f32 %v395_v60, %v262_v54  ;;  %v268_v15 = vadd.f32 %v267_v1, %v4547_v41 }
  0xf7   :  { %v584_v24 = vadd.f32 %v546_v0, %v433_v63 }
  0xf9   :  { %v4617_v33 = vadd.f32 %v696_v53, %v584_v24  ;;  %3615 = vmatmul.msk.f32.gmra.mxu2 %vm67_vm0, %v4392_v9  ;;  %v699_v57 = vpop.f32.mrf.mxu0  ;;  %v3632_v9 = vld [vmem:[%s6244_s0 + $0x91] sm:$0xff] }
  0xfa   :  { %3651 = vmatmul.msk.f32.gmra.mxu3 %vm67_vm0, %v4401_v10 }
  0xfc   :  { %v398_v4 = vpop.f32.mrf.mxu2  ;;  %3687 = vmatmul.msk.f32.gmra.mxu0 %vm67_vm0, %v4406_v11  ;;  %v3668_v11 = vld [vmem:[%s6244_s0 + $0x92] sm:$0xff]  ;;  %v4691_v46 = vpop.f32.mrf.mxu1 }
  0xfd   :  { %v549_v34 = vpop.f32.mrf.mxu3  ;;  %v434_v8 = vadd.f32 %v398_v4, %v265_v58 }
  0xff   :  { %v585_v42 = vadd.f32 %v549_v34, %v434_v8 }
 0x101   :  { %v4632_v10 = vadd.f32 %v699_v57, %v585_v42  ;;  %3616 = vmatmul.msk.f32.gmra.mxu2 %vm67_vm0, %v3596_v21  ;;  %v702_v17 = vpop.f32.mrf.mxu0 }
 0x102   :  { %3652 = vmatmul.msk.f32.gmra.mxu3 %vm67_vm0, %v3632_v9 }
 0x104   :  { %v401_v62 = vpop.f32.mrf.mxu2  ;;  %3688 = vmatmul.msk.f32.gmra.mxu0 %vm67_vm0, %v3668_v11 }
 0x105   :  { %v552_v38 = vpop.f32.mrf.mxu3  ;;  %v435_v39 = vadd.f32 %v401_v62, %v268_v15 }
 0x107   :  { %v586_v30 = vadd.f32 %v552_v38, %v435_v39 }
 0x109   :  { %v4641_v3 = vadd.f32 %v702_v17, %v586_v30  ;;  %3617 = vmatmul.msk.f32.gmra.mxu2 %vm67_vm0, %v4092_v26  ;;  %v4647_v2 = vpop.f32.mrf.mxu0 }
 0x10a   :  { %3653 = vmatmul.msk.f32.gmra.mxu3 %vm67_vm0, %v4087_v25 }
 0x10c   :  { %v4649_v22 = vpop.f32.mrf.mxu2  ;;  %3689 = vmatmul.msk.f32.gmra.mxu0 %vm67_vm0, %v4445_v20 }
 0x10d   :  { %v4651_v47 = vpop.f32.mrf.mxu3 }
 0x111   :  { %3618 = vmatmul.msk.f32.gmra.mxu2 %vm67_vm0, %v4126_v32  ;;  %v4659_v41 = vpop.f32.mrf.mxu0 }
 0x112   :  { %3654 = vmatmul.msk.f32.gmra.mxu3 %vm67_vm0, %v4121_v31 }
 0x114   :  { %v4661_v26 = vpop.f32.mrf.mxu2  ;;  %3690 = vmatmul.msk.f32.gmra.mxu0 %vm67_vm0, %v4462_v35 }
 0x115   :  { %v4663_v25 = vpop.f32.mrf.mxu3 }
 0x119   :  { %3619 = vmatmul.msk.f32.gmra.mxu2 %vm67_vm0, %v4157_v37  ;;  %v4671_v20 = vpop.f32.mrf.mxu0 }
 0x11a   :  { %3655 = vmatmul.msk.f32.gmra.mxu3 %vm67_vm0, %v4152_v36 }
 0x11c   :  { %v4673_v32 = vpop.f32.mrf.mxu2  ;;  %3691 = vmatmul.msk.f32.gmra.mxu0 %vm67_vm0, %v4479_v48 }
 0x11d   :  { %v4675_v31 = vpop.f32.mrf.mxu3 }
 0x121   :  { %3620 = vmatmul.msk.f32.gmra.mxu2 %vm67_vm0, %v4197_v45  ;;  %v4683_v35 = vpop.f32.mrf.mxu0 }
 0x122   :  { %3656 = vmatmul.msk.f32.gmra.mxu3 %vm67_vm0, %v4192_v44 }
 0x124   :  { %v4685_v37 = vpop.f32.mrf.mxu2  ;;  %3692 = vmatmul.msk.f32.gmra.mxu0 %vm67_vm0, %v4496_v61 }
 0x125   :  { %v4687_v36 = vpop.f32.mrf.mxu3 }
 0x129   :  { %3621 = vmatmul.msk.f32.gmra.mxu2 %vm67_vm0, %v4234_v52  ;;  %v4697_v45 = vpop.f32.mrf.mxu0  ;;  %v834_v52 = vpop.f32.mrf.mxu1 }
 0x12a   :  { %3657 = vmatmul.msk.f32.gmra.mxu3 %vm67_vm0, %v4229_v51  ;;  %6258 = vst [vmem:[#allocation10_spill] sm:$0xff] %v4697_v45 }
 0x12c   :  { %v4699_v44 = vpop.f32.mrf.mxu2  ;;  %3693 = vmatmul.msk.f32.gmra.mxu0 %vm67_vm0, %v4513_v6 }
 0x12d   :  { %v4701_v48 = vpop.f32.mrf.mxu3 }
 0x131   :  { %3622 = vmatmul.msk.f32.gmra.mxu2 %vm67_vm0, %v4262_v56  ;;  %v4709_v61 = vpop.f32.mrf.mxu0  ;;  %v837_v43 = vpop.f32.mrf.mxu1 }
 0x132   :  { %3658 = vmatmul.msk.f32.gmra.mxu3 %vm67_vm0, %v4257_v55  ;;  %6259 = vst [vmem:[#allocation11_spill] sm:$0xff] %v4709_v61 }
 0x134   :  { %v4711_v27 = vpop.f32.mrf.mxu2  ;;  %3694 = vmatmul.msk.f32.gmra.mxu0 %vm67_vm0, %v4530_v18  ;;  %v3604_v18 = vld [vmem:[%s6244_s0 + $0x130] sm:$0xff] }
 0x135   :  { %v4713_v51 = vpop.f32.mrf.mxu3 }
 0x139   :  { %3623 = vmatmul.msk.f32.gmra.mxu2 %vm67_vm0, %v4541_v40  ;;  %v4721_v56 = vpop.f32.mrf.mxu0  ;;  %v3640_v40 = vld [vmem:[%s6244_s0 + $0x131] sm:$0xff]  ;;  %v840_v13 = vpop.f32.mrf.mxu1  ;;  %s3934_s0 = smov 88  }
 0x13a   :  { %3659 = vmatmul.msk.f32.gmra.mxu3 %vm67_vm0, %v4552_v49  ;;  %6260 = vst [vmem:[#allocation12_spill] sm:$0xff] %v4721_v56 }
 0x13c   :  { %v4723_v6 = vpop.f32.mrf.mxu2  ;;  %3695 = vmatmul.msk.f32.gmra.mxu0 %vm67_vm0, %v4557_v50 }
 0x13d   :  { %6261 = vst [vmem:[#allocation13_spill] sm:$0xff] %v4723_v6  ;;  %v4725_v55 = vpop.f32.mrf.mxu3 }
 0x13e   :  { %6262 = vst [vmem:[#allocation14_spill] sm:$0xff] %v4725_v55 }
 0x141   :  { %3624 = vmatmul.msk.f32.gmra.mxu2 %vm67_vm0, %v3604_v18  ;;  %v4737_v49 = vpop.f32.mrf.mxu0  ;;  %v843_v0 = vpop.f32.mrf.mxu1 }
 0x142   :  { %3660 = vmatmul.msk.f32.gmra.mxu3 %vm67_vm0, %v3640_v40  ;;  %6263 = vst [vmem:[#allocation15_spill] sm:$0xff] %v4737_v49 }
 0x144   :  { %v4742_v50 = vpop.f32.mrf.mxu2  ;;  %3696 = vmatmul.msk.f32.gmra.mxu0 %vm67_vm0, %v3676_v28 }
 0x145   :  { %6264 = vst [vmem:[#allocation16_spill] sm:$0xff] %v4742_v50  ;;  %v4744_v5 = vpop.f32.mrf.mxu3 }
 0x146   :  { %6265 = vst [vmem:[#allocation17_spill] sm:$0xff] %v4744_v5 }
 0x149   :  { %v4747_v53 = vpop.f32.mrf.mxu0  ;;  %v846_v58 = vpop.f32.mrf.mxu1 }
 0x14c   :  { %v982_v54 = vpop.f32.mrf.mxu2 }
 0x14d   :  { %v1132_v60 = vpop.f32.mrf.mxu3 }
 0x151   :  { %v4749_v63 = vpop.f32.mrf.mxu0  ;;  %v849_v42 = vpop.f32.mrf.mxu1 }
 0x154   :  { %v985_v7 = vpop.f32.mrf.mxu2 }
 0x155   :  { %v1135_v24 = vpop.f32.mrf.mxu3 }
 0x159   :  { %v4751_v57 = vpop.f32.mrf.mxu0  ;;  %v852_v15 = vpop.f32.mrf.mxu1 }
 0x15c   :  { %v988_v4 = vpop.f32.mrf.mxu2 }
 0x15d   :  { %v1138_v34 = vpop.f32.mrf.mxu3 }
 0x161   :  { %v4753_v8 = vpop.f32.mrf.mxu0  ;;  %v855_v30 = vpop.f32.mrf.mxu1 }
 0x164   :  { %v991_v21 = vpop.f32.mrf.mxu2 }
 0x165   :  { %v1141_v9 = vpop.f32.mrf.mxu3 }
 0x169   :  { %v4755_v1 = vpop.f32.mrf.mxu0  ;;  %v858_v5 = vpop.f32.mrf.mxu1 }
 0x16a   :  { %6266 = vst [vmem:[#allocation18_spill] sm:$0xff] %v4755_v1 }
 0x16c   :  { %v994_v17 = vpop.f32.mrf.mxu2 }
 0x16d   :  { %v4757_v11 = vpop.f32.mrf.mxu3 }
 0x171   :  { %v4759_v62 = vpop.f32.mrf.mxu0 }
 0x172   :  { %6267 = vst [vmem:[#allocation19_spill] sm:$0xff] %v4759_v62  ;;  %v4779_v62 = vpop.f32.mrf.mxu1 }
 0x173   :  { %6275 = vst [vmem:[#allocation27_spill] sm:$0xff] %v4779_v62  ;;  %v6283_v62 = vld [vmem:[#allocation3_spill] sm:$0xff] }
 0x174   :  { %v997_v38 = vpop.f32.mrf.mxu2 }
 0x175   :  { %v4761_v39 = vpop.f32.mrf.mxu3 }
 0x179   :  { %v4763_v18 = vpop.f32.mrf.mxu0 }
 0x17a   :  { %6268 = vst [vmem:[#allocation20_spill] sm:$0xff] %v4763_v18 }
 0x17c   :  { %v1000_v40 = vpop.f32.mrf.mxu2 }
 0x17d   :  { %v4765_v28 = vpop.f32.mrf.mxu3 }
 0x17e   :  { %6269 = vst [vmem:[#allocation21_spill] sm:$0xff] %v4765_v28 }
 0x181   :  { %v4767_v49 = vpop.f32.mrf.mxu0 }
 0x182   :  { %6270 = vst [vmem:[#allocation22_spill] sm:$0xff] %v4767_v49  ;;  %v4787_v49 = vpop.f32.mrf.mxu1 }
 0x183   :  { %6279 = vst [vmem:[#allocation31_spill] sm:$0xff] %v4787_v49 }
 0x184   :  { %v4769_v50 = vpop.f32.mrf.mxu2 }
 0x185   :  { %v4771_v14 = vpop.f32.mrf.mxu3 }
 0x186   :  { %6271 = vst [vmem:[#allocation23_spill] sm:$0xff] %v4771_v14 }
 0x189   :  { %v4773_v56 = vpop.f32.mrf.mxu0 }
 0x18a   :  { %6272 = vst [vmem:[#allocation24_spill] sm:$0xff] %v4773_v56  ;;  %v880_v56 = vadd.f32 %v834_v52, %v4581_v59  ;;  %v4803_v49 = vpop.f32.mrf.mxu1 }
 0x18c   :  { %v4775_v55 = vpop.f32.mrf.mxu2 }
 0x18d   :  { %6273 = vst [vmem:[#allocation25_spill] sm:$0xff] %v4775_v55  ;;  %v4777_v61 = vpop.f32.mrf.mxu3 }
 0x18e   :  { %6274 = vst [vmem:[#allocation26_spill] sm:$0xff] %v4777_v61  ;;  %v879_v61 = vadd.f32 %v4691_v46, %v4572_v29  ;;  %v6284_v46 = vld [vmem:[#allocation4_spill] sm:$0xff] }
 0x191   :  { %v4781_v45 = vpop.f32.mrf.mxu0 }
 0x192   :  { %6276 = vst [vmem:[#allocation28_spill] sm:$0xff] %v4781_v45  ;;  %v436_v45 = vadd.f32 %v4649_v22, %v4432_v19  ;;  %v438_v19 = vadd.f32 %v4673_v32, %v6284_v46 }
 0x194   :  { %v4783_v18 = vpop.f32.mrf.mxu2  ;;  %v587_v52 = vadd.f32 %v4651_v47, %v436_v45 }
 0x195   :  { %6277 = vst [vmem:[#allocation29_spill] sm:$0xff] %v4783_v18  ;;  %v4785_v28 = vpop.f32.mrf.mxu3  ;;  %v437_v18 = vadd.f32 %v4661_v26, %v6283_v62 }
 0x196   :  { %6278 = vst [vmem:[#allocation30_spill] sm:$0xff] %v4785_v28  ;;  %v881_v28 = vadd.f32 %v837_v43, %v4590_v12  ;;  %v883_v12 = vadd.f32 %v843_v0, %v4608_v16  ;;  %v885_v16 = vadd.f32 %v849_v42, %v4632_v10  ;;  %v6287_v0 = vld [vmem:[#allocation7_spill] sm:$0xff] }
 0x197   :  { %v588_v29 = vadd.f32 %v4663_v25, %v437_v18  ;;  %v737_v25 = vadd.f32 %v4647_v2, %v587_v52  ;;  %v6292_v18 = vld [vmem:[#allocation25_spill] sm:$0xff] }
 0x198   :  { %v1032_v59 = vadd.f32 %v988_v4, %v881_v28  ;;  %v1034_v45 = vadd.f32 %v994_v17, %v883_v12  ;;  %v6286_v4 = vld [vmem:[#allocation6_spill] sm:$0xff]  ;;  %v6288_v17 = vld [vmem:[#allocation8_spill] sm:$0xff] }
 0x199   :  { %v4789_v1 = vpop.f32.mrf.mxu0  ;;  %v738_v32 = vadd.f32 %v4659_v41, %v588_v29  ;;  %v440_v62 = vadd.f32 %v4699_v44, %v6286_v4  ;;  %v441_v41 = vadd.f32 %v4711_v27, %v6287_v0  ;;  %v870_v44 = vpop.f32.mrf.mxu1  ;;  %v6294_v28 = vld [vmem:[#allocation10_spill] sm:$0xff]  ;;  %v6295_v29 = vld [vmem:[#allocation19_spill] sm:$0xff]  ;;  %v6301_v4 = vld [vmem:[#allocation20_spill] sm:$0xff] }
 0x19a   :  { %6280 = vst [vmem:[#allocation32_spill] sm:$0xff] %v4789_v1  ;;  %v1031_v1 = vadd.f32 %v985_v7, %v880_v56  ;;  %v6285_v7 = vld [vmem:[#allocation5_spill] sm:$0xff]  ;;  %v1182_v47 = vadd.f32 %v1138_v34, %v1032_v59 }
 0x19b   :  { %v888_v34 = vadd.f32 %v858_v5, %v738_v32  ;;  %v592_v5 = vadd.f32 %v4713_v51, %v441_v41 }
 0x19c   :  { %v4791_v6 = vpop.f32.mrf.mxu2  ;;  %v1181_v56 = vadd.f32 %v1135_v24, %v1031_v1  ;;  %v4839_v10 = vadd.f32 %v4751_v57, %v1182_v47  ;;  %v1036_v24 = vadd.f32 %v1000_v40, %v885_v16  ;;  %v6293_v40 = vld [vmem:[#allocation27_spill] sm:$0xff]  ;;  %v6302_v16 = vld [vmem:[#allocation26_spill] sm:$0xff] }
 0x19d   :  { %6281 = vst [vmem:[#allocation33_spill] sm:$0xff] %v4791_v6  ;;  %v4793_v14 = vpop.f32.mrf.mxu3  ;;  %v1030_v6 = vadd.f32 %v982_v54, %v879_v61  ;;  %v439_v61 = vadd.f32 %v4685_v37, %v6285_v7  ;;  %v589_v54 = vadd.f32 %v4675_v31, %v438_v19  ;;  %v6296_v19 = vld [vmem:[#allocation23_spill] sm:$0xff] }
 0x19e   :  { %6282 = vst [vmem:[#allocation34_spill] sm:$0xff] %v4793_v14  ;;  %v882_v14 = vadd.f32 %v840_v13, %v4599_v23  ;;  %v884_v13 = vadd.f32 %v846_v58, %v4617_v33  ;;  %v886_v33 = vadd.f32 %v852_v15, %v4641_v3  ;;  %v887_v58 = vadd.f32 %v855_v30, %v737_v25  ;;  %v6291_v30 = vld [vmem:[#allocation21_spill] sm:$0xff] }
 0x19f   :  { %v1180_v23 = vadd.f32 %v1132_v60, %v1030_v6  ;;  %v590_v2 = vadd.f32 %v4687_v36, %v439_v61  ;;  %v739_v3 = vadd.f32 %v4671_v20, %v589_v54  ;;  %v591_v36 = vadd.f32 %v4701_v48, %v440_v62  ;;  %v6289_v20 = vld [vmem:[#allocation13_spill] sm:$0xff]  ;;  %v6298_v61 = vld [vmem:[#allocation31_spill] sm:$0xff] }
 0x1a0   :  { %v1033_v43 = vadd.f32 %v991_v21, %v882_v14  ;;  %v4827_v14 = vadd.f32 %v4749_v63, %v1181_v56  ;;  %v1035_v6 = vadd.f32 %v997_v38, %v884_v13  ;;  %v1184_v63 = vadd.f32 %v4757_v11, %v1034_v45  ;;  %v6290_v38 = vld [vmem:[#allocation18_spill] sm:$0xff]  ;;  %v6297_v56 = vld [vmem:[#allocation29_spill] sm:$0xff]  ;;  %v6299_v13 = vld [vmem:[#allocation11_spill] sm:$0xff] }
 0x1a1   :  { %v4805_v55 = vpop.f32.mrf.mxu0  ;;  %v4836_v31 = vadd.f32 %v4747_v53, %v1180_v23  ;;  %v1037_v42 = vadd.f32 %v4769_v50, %v886_v33  ;;  %v740_v1 = vadd.f32 %v4683_v35, %v590_v2  ;;  %v442_v11 = vadd.f32 %v6289_v20, %v6288_v17  ;;  %v6300_v45 = vld [vmem:[#allocation14_spill] sm:$0xff]  ;;  %v6307_v17 = vld [vmem:[#allocation9_spill] sm:$0xff]  ;;  %v6308_v20 = vld [vmem:[#allocation16_spill] sm:$0xff] }
 0x1a2   :  { %v1183_v37 = vadd.f32 %v1141_v9, %v1033_v43  ;;  %v1350_v27 = vsel %vm1348_vm1, %v4827_v14, 0.0  ;;  %v1185_v57 = vadd.f32 %v4761_v39, %v1035_v6  ;;  %v1352_v15 = vsel %vm1348_vm1, %v4839_v10, 0.0 }
 0x1a3   :  { %v1349_v48 = vsel %vm1348_vm1, %v4836_v31, 0.0  ;;  %v1186_v39 = vadd.f32 %v6291_v30, %v1036_v24  ;;  %v1038_v50 = vadd.f32 %v6292_v18, %v887_v58  ;;  %v889_v35 = vadd.f32 %v6293_v40, %v739_v3  ;;  %v6304_v58 = vld [vmem:[#allocation22_spill] sm:$0xff] }
 0x1a4   :  { %v4812_v22 = vpop.f32.mrf.mxu2  ;;  %v4847_v53 = vadd.f32 %v4753_v8, %v1183_v37  ;;  %v4860_v8 = vadd.f32 %v6290_v38, %v1184_v63  ;;  %v741_v51 = vadd.f32 %v6294_v28, %v591_v36  ;;  %v1351_v59 = vadd.f32 %v1350_v27, %v1349_v48  ;;  %v6303_v6 = vld [vmem:[#allocation33_spill] sm:$0xff]  ;;  %v6305_v3 = vld [vmem:[#allocation30_spill] sm:$0xff] }
 0x1a5   :  { %v4814_v26 = vpop.f32.mrf.mxu3  ;;  %v4869_v46 = vadd.f32 %v6295_v29, %v1185_v57  ;;  %v1187_v12 = vadd.f32 %v6296_v19, %v1037_v42  ;;  %v1039_v43 = vadd.f32 %v6297_v56, %v888_v34  ;;  %v890_v23 = vadd.f32 %v6298_v61, %v740_v1  ;;  %v6306_v42 = vld [vmem:[#allocation12_spill] sm:$0xff]  ;;  %v6310_v30 = vld [vmem:[#allocation34_spill] sm:$0xff] }
 0x1a6   :  { %v1354_v52 = vsel %vm1348_vm1, %v4847_v53, 0.0  ;;  %v742_v47 = vadd.f32 %v6299_v13, %v592_v5  ;;  %v593_v25 = vadd.f32 %v6300_v45, %v442_v11  ;;  %v1353_v32 = vadd.f32 %v1352_v15, %v1351_v59  ;;  %v873_v5 = vpop.f32.mrf.mxu1  ;;  %v6309_v15 = vld [vmem:[#allocation24_spill] sm:$0xff] }
 0x1a7   :  { %v1356_v54 = vsel %vm1348_vm1, %v4860_v8, 0.0  ;;  %v4879_v62 = vadd.f32 %v6301_v4, %v1186_v39  ;;  %v1188_v37 = vadd.f32 %v6302_v16, %v1038_v50  ;;  %v1040_v33 = vadd.f32 %v6303_v6, %v889_v35 }
 0x1a8   :  { %v891_v2 = vadd.f32 %v4803_v49, %v741_v51  ;;  %v1355_v0 = vadd.f32 %v1354_v52, %v1353_v32  ;;  %v1358_v24 = vsel %vm1348_vm1, %v4869_v46, 0.0  ;;  %v4887_v34 = vadd.f32 %v6304_v58, %v1187_v12  ;;  %v6312_v52 = vld [vmem:[#allocation17_spill] sm:$0xff]  ;;  %v6313_v12 = vld [vmem:[#allocation32_spill] sm:$0xff] }
 0x1a9   :  { %v4829_v60 = vpop.f32.mrf.mxu0  ;;  %v1189_v36 = vadd.f32 %v6305_v3, %v1039_v43  ;;  %v1041_v27 = vadd.f32 %v4812_v22, %v890_v23  ;;  %v892_v57 = vadd.f32 %v870_v44, %v742_v47  ;;  %v743_v1 = vadd.f32 %v6306_v42, %v593_v25  ;;  %v6311_v44 = vld [vmem:[#allocation28_spill] sm:$0xff] }
 0x1aa   :  { %v443_v49 = vadd.f32 %v6308_v20, %v6307_v17  ;;  %v1357_v11 = vadd.f32 %v1356_v54, %v1355_v0  ;;  %v1360_v48 = vsel %vm1348_vm1, %v4879_v62, 0.0  ;;  %v4897_v38 = vadd.f32 %v6309_v15, %v1188_v37  ;;  %v6314_v54 = vld [vmem:[#allocation15_spill] sm:$0xff] }
 0x1ab   :  { %v1190_v39 = vadd.f32 %v6310_v30, %v1040_v33  ;;  %v1362_v22 = vsel %vm1348_vm1, %v4887_v34, 0.0  ;;  %v4903_v40 = vadd.f32 %v6311_v44, %v1189_v36  ;;  %v1191_v35 = vadd.f32 %v4814_v26, %v1041_v27 }
 0x1ac   :  { %v1018_v21 = vpop.f32.mrf.mxu2  ;;  %v1359_v50 = vadd.f32 %v1358_v24, %v1357_v11  ;;  %v893_v51 = vadd.f32 %v873_v5, %v743_v1  ;;  %v594_v29 = vadd.f32 %v6312_v52, %v443_v49  ;;  %v1364_v19 = vsel %vm1348_vm1, %v4897_v38, 0.0 }
 0x1ad   :  { %v1168_v9 = vpop.f32.mrf.mxu3  ;;  %v1042_v18 = vadd.f32 %v1018_v21, %v891_v2  ;;  %v4910_v56 = vadd.f32 %v6313_v12, %v1190_v39  ;;  %v1366_v47 = vsel %vm1348_vm1, %v4903_v40, 0.0  ;;  %v4915_v26 = vadd.f32 %v4805_v55, %v1191_v35 }
 0x1ae   :  { %v1361_v59 = vadd.f32 %v1360_v48, %v1359_v50  ;;  %v744_v4 = vadd.f32 %v6314_v54, %v594_v29  ;;  %v876_v6 = vpop.f32.mrf.mxu1 }
 0x1af   :  { %v1192_v21 = vadd.f32 %v1168_v9, %v1042_v18  ;;  %v1368_v16 = vsel %vm1348_vm1, %v4910_v56, 0.0  ;;  %v1370_v2 = vsel %vm1348_vm1, %v4915_v26, 0.0 }
 0x1b0   :  { %v1363_v61 = vadd.f32 %v1362_v22, %v1361_v59 }
 0x1b1   :  { %v1321_v7 = vpop.f32.mrf.mxu0  ;;  %v4921_v9 = vadd.f32 %v4829_v60, %v1192_v21 }
 0x1b2   :  { %v1365_v32 = vadd.f32 %v1364_v19, %v1363_v61 }
 0x1b4   :  { %v1021_v41 = vpop.f32.mrf.mxu2  ;;  %v1367_v33 = vadd.f32 %v1366_v47, %v1365_v32 }
 0x1b5   :  { %v1171_v63 = vpop.f32.mrf.mxu3  ;;  %v1043_v28 = vadd.f32 %v1021_v41, %v892_v57  ;;  %v894_v41 = vadd.f32 %v876_v6, %v744_v4 }
 0x1b6   :  { %v1369_v55 = vadd.f32 %v1368_v16, %v1367_v33 }
 0x1b7   :  { %v1193_v45 = vadd.f32 %v1171_v63, %v1043_v28  ;;  %v1372_v63 = vsel %vm1348_vm1, %v4921_v9, 0.0 }
 0x1b8   :  { %v1371_v58 = vadd.f32 %v1370_v2, %v1369_v55 }
 0x1b9   :  { %v1324_v43 = vpop.f32.mrf.mxu0  ;;  %v4925_v0 = vadd.f32 %v1321_v7, %v1193_v45 }
 0x1ba   :  { %v1373_v57 = vadd.f32 %v1372_v63, %v1371_v58 }
 0x1bb   :  { %v1374_v60 = vsel %vm1348_vm1, %v4925_v0, 0.0 }
 0x1bc   :  { %v1024_v23 = vpop.f32.mrf.mxu2  ;;  %v1375_v5 = vadd.f32 %v1374_v60, %v1373_v57 }
 0x1bd   :  { %v1174_v13 = vpop.f32.mrf.mxu3  ;;  %v1044_v25 = vadd.f32 %v1024_v23, %v893_v51 }
 0x1bf   :  { %v1194_v37 = vadd.f32 %v1174_v13, %v1044_v25 }
 0x1c1   :  { %v4929_v24 = vadd.f32 %v1324_v43, %v1194_v37  ;;  %v1327_v42 = vpop.f32.mrf.mxu0 }
 0x1c3   :  { %v1376_v7 = vsel %vm1348_vm1, %v4929_v24, 0.0 }
 0x1c4   :  { %v1027_v3 = vpop.f32.mrf.mxu2  ;;  %v1377_v20 = vadd.f32 %v1376_v7, %v1375_v5 }
 0x1c5   :  { %v1177_v36 = vpop.f32.mrf.mxu3  ;;  %v1045_v27 = vadd.f32 %v1027_v3, %v894_v41 }
 0x1c7   :  { %v1195_v1 = vadd.f32 %v1177_v36, %v1045_v27 }
 0x1c9   :  { %v4935_v17 = vadd.f32 %v1327_v42, %v1195_v1 }
 0x1cb   :  { %v1378_v49 = vsel %vm1348_vm1, %v4935_v17, 0.0 }
 0x1cc   :  { %v1379_v11 = vadd.f32 %v1378_v49, %v1377_v20 }
 0x1ce   :  { %v1380_v48 = vrot.slane %v1379_v11, 4 }
 0x1d0   :  { %v1381_v15 = vadd.f32 %v1380_v48, %v1379_v11 }
 0x1d2   :  { %v1382_v30 = vrot.slane %v1381_v15, 2 }
 0x1d4   :  { %v1383_v39 = vadd.f32 %v1382_v30, %v1381_v15 }
 0x1d6   :  { %v1384_v18 = vrot.slane %v1383_v39, 1 }
 0x1d8   :  { %v1385_v50 = vadd.f32 %v1384_v18, %v1383_v39 }
 0x1da   :  { %1403 = vrot.lane.b32.xlu2 %v1385_v50, %s3934_s0  ;;  %1395 = vrot.lane.b32.xlu1 %v1385_v50, %s3935_s30 }
 0x1db   :  { %1387 = vrot.lane.b32.xlu0 %v1385_v50, %s3936_s8 }
 0x1e2   :  { %1407 = vrot.lane.b32.xlu2 %v1385_v50, %s3937_s9  ;;  %1399 = vrot.lane.b32.xlu1 %v1385_v50, %s3938_s10 }
 0x1e3   :  { %1391 = vrot.lane.b32.xlu0 %v1385_v50, %s3939_s11 }
 0x1eb   :  { %1411 = vrot.lane.b32.xlu0 %v1385_v50, %s3940_s12 }
 0x234   :  { %v1404_v35 = vpop.permute.xlu2 %1403 }
 0x23c   :  { %v1408_v21 = vpop.permute.xlu2 %1407 }
 0x24c   :  { %v1396_v44 = vpop.permute.xlu1 %1395 }
 0x24d   :  { %v1388_v22 = vpop.permute.xlu0 %1387 }
 0x24e   :  { %v1390_v28 = vadd.f32 %v1388_v22, %v1385_v50 }
 0x254   :  { %v1400_v29 = vpop.permute.xlu1 %1399 }
 0x255   :  { %v1392_v51 = vpop.permute.xlu0 %1391 }
 0x256   :  { %v1394_v59 = vadd.f32 %v1392_v51, %v1390_v28 }
 0x258   :  { %v1398_v52 = vadd.f32 %v1396_v44, %v1394_v59 }
 0x25a   :  { %v1402_v19 = vadd.f32 %v1400_v29, %v1398_v52 }
 0x25c   :  { %v1406_v12 = vadd.f32 %v1404_v35, %v1402_v19 }
 0x25d   :  { %v1412_v61 = vpop.permute.xlu0 %1411 }
 0x25e   :  { %v1410_v43 = vadd.f32 %v1408_v21, %v1406_v12 }
 0x260   :  { %v1414_v23 = vadd.f32 %v1412_v61, %v1410_v43 }
 0x262   :  { %v1415_v13 = vmul.f32 0.0009765625, %v1414_v23 }
 0x264   :  { %1423 = vrot.lane.b32.xlu0 %v1415_v13, %s3941_s13  ;;  %1420 = vrot.lane.b32.xlu2 %v1415_v13, %s3942_s14 }
 0x265   :  { %1417 = vrot.lane.b32.xlu1 %v1415_v13, %s3943_s15 }
 0x26c   :  { %1432 = vrot.lane.b32.xlu0 %v1415_v13, %s3944_s16  ;;  %1429 = vrot.lane.b32.xlu2 %v1415_v13, %s3945_s17 }
 0x26d   :  { %1426 = vrot.lane.b32.xlu1 %v1415_v13, %s3946_s18 }
 0x275   :  { %1435 = vrot.lane.b32.xlu1 %v1415_v13, %s3947_s19 }
 0x2be   :  { %v1421_v45 = vpop.permute.xlu2 %1420 }
 0x2c6   :  { %v1430_v6 = vpop.permute.xlu2 %1429 }
 0x2d6   :  { %v1424_v32 = vpop.permute.xlu0 %1423 }
 0x2d7   :  { %v1418_v47 = vpop.permute.xlu1 %1417 }
 0x2d8   :  { %v1439_v25 = vsel %vm1438_vm2, %v1415_v13, %v1418_v47 }
 0x2d9   :  { %v1441_v54 = vsel %vm1440_vm3, %v1439_v25, %v1421_v45 }
 0x2da   :  { %v1443_v16 = vsel %vm1442_vm4, %v1441_v54, %v1424_v32 }
 0x2de   :  { %v1433_v2 = vpop.permute.xlu0 %1432 }
 0x2df   :  { %v1427_v4 = vpop.permute.xlu1 %1426 }
 0x2e0   :  { %v1444_v37 = vsel %vm67_vm0, %v1443_v16, %v1427_v4 }
 0x2e1   :  { %v1446_v33 = vsel %vm1445_vm5, %v1444_v37, %v1430_v6 }
 0x2e2   :  { %v1448_v55 = vsel %vm1447_vm6, %v1446_v33, %v1433_v2 }
 0x2e7   :  { %v1436_v41 = vpop.permute.xlu1 %1435 }
 0x2e8   :  { %v1450_v63 = vsel %vm1449_vm7, %v1448_v55, %v1436_v41 }
 0x2e9   :  { %v1451_v58 = vperm.slane %v1450_v63, 0 }
 0x2eb   :  { %v4961_v3 = vsub.f32 %v4836_v31, %v1451_v58  ;;  %v4964_v36 = vsub.f32 %v4827_v14, %v1451_v58  ;;  %v4967_v60 = vsub.f32 %v4839_v10, %v1451_v58  ;;  %v4970_v27 = vsub.f32 %v4847_v53, %v1451_v58 }
 0x2ec   :  { %v4977_v7 = vsub.f32 %v4860_v8, %v1451_v58  ;;  %v4982_v14 = vsub.f32 %v4869_v46, %v1451_v58  ;;  %v4989_v20 = vsub.f32 %v4879_v62, %v1451_v58  ;;  %v4995_v46 = vsub.f32 %v4887_v34, %v1451_v58 }
 0x2ed   :  { %v1468_v57 = vmul.f32 %v4961_v3, %v4961_v3  ;;  %v1469_v42 = vmul.f32 %v4964_v36, %v4964_v36  ;;  %v1470_v31 = vmul.f32 %v4967_v60, %v4967_v60  ;;  %v1471_v10 = vmul.f32 %v4970_v27, %v4970_v27 }
 0x2ee   :  { %v1472_v8 = vmul.f32 %v4977_v7, %v4977_v7  ;;  %v1473_v48 = vmul.f32 %v4982_v14, %v4982_v14  ;;  %v5001_v39 = vsub.f32 %v4897_v38, %v1451_v58  ;;  %v1474_v62 = vmul.f32 %v4989_v20, %v4989_v20 }
 0x2ef   :  { %v1484_v53 = vsel %vm1348_vm1, %v1468_v57, 0.0  ;;  %v1485_v1 = vsel %vm1348_vm1, %v1469_v42, 0.0  ;;  %v1487_v49 = vsel %vm1348_vm1, %v1470_v31, 0.0  ;;  %v1489_v15 = vsel %vm1348_vm1, %v1471_v10, 0.0 }
 0x2f0   :  { %v1486_v5 = vadd.f32 %v1485_v1, %v1484_v53  ;;  %v1491_v18 = vsel %vm1348_vm1, %v1472_v8, 0.0  ;;  %v5007_v22 = vsub.f32 %v4903_v40, %v1451_v58  ;;  %v1475_v34 = vmul.f32 %v4995_v46, %v4995_v46 }
 0x2f1   :  { %v1493_v44 = vsel %vm1348_vm1, %v1473_v48, 0.0  ;;  %v5013_v28 = vsub.f32 %v4910_v56, %v1451_v58  ;;  %v1476_v38 = vmul.f32 %v5001_v39, %v5001_v39  ;;  %v1495_v51 = vsel %vm1348_vm1, %v1474_v62, 0.0 }
 0x2f2   :  { %v1488_v11 = vadd.f32 %v1487_v49, %v1486_v5  ;;  %v5019_v52 = vsub.f32 %v4915_v26, %v1451_v58  ;;  %v1477_v40 = vmul.f32 %v5007_v22, %v5007_v22  ;;  %v1497_v29 = vsel %vm1348_vm1, %v1475_v34, 0.0  ;;  %v3928_v5 = vld [vmem:[%s6245_s3] ss:$0 sm:$0xff] }
 0x2f3   :  { %v5025_v12 = vsub.f32 %v4921_v9, %v1451_v58  ;;  %v1478_v56 = vmul.f32 %v5013_v28, %v5013_v28  ;;  %v1499_v21 = vsel %vm1348_vm1, %v1476_v38, 0.0  ;;  %v5031_v61 = vsub.f32 %v4925_v0, %v1451_v58 }
 0x2f4   :  { %v1490_v30 = vadd.f32 %v1489_v15, %v1488_v11  ;;  %v1479_v26 = vmul.f32 %v5019_v52, %v5019_v52  ;;  %v1501_v23 = vsel %vm1348_vm1, %v1477_v40, 0.0  ;;  %v5037_v47 = vsub.f32 %v4929_v24, %v1451_v58 }
 0x2f5   :  { %v1480_v9 = vmul.f32 %v5025_v12, %v5025_v12  ;;  %v1503_v45 = vsel %vm1348_vm1, %v1478_v56, 0.0  ;;  %v5043_v32 = vsub.f32 %v4935_v17, %v1451_v58  ;;  %v1481_v0 = vmul.f32 %v5031_v61, %v5031_v61 }
 0x2f6   :  { %v1492_v50 = vadd.f32 %v1491_v18, %v1490_v30  ;;  %v1505_v54 = vsel %vm1348_vm1, %v1479_v26, 0.0  ;;  %v1482_v16 = vmul.f32 %v5037_v47, %v5037_v47  ;;  %v3703_v26 = vld [vmem:[%s6246_s4 + $0x70] sm:$0xff] }
 0x2f7   :  { %v1507_v24 = vsel %vm1348_vm1, %v1480_v9, 0.0  ;;  %v1483_v6 = vmul.f32 %v5043_v32, %v5043_v32  ;;  %v1509_v33 = vsel %vm1348_vm1, %v1481_v0, 0.0 }
 0x2f8   :  { %v1494_v35 = vadd.f32 %v1493_v44, %v1492_v50  ;;  %v1511_v17 = vsel %vm1348_vm1, %v1482_v16, 0.0  ;;  %v3699_v16 = vld [vmem:[%s6246_s4 + $0x50] sm:$0xff] }
 0x2f9   :  { %v1513_v41 = vsel %vm1348_vm1, %v1483_v6, 0.0  ;;  %v1753_v6 = vld [vmem:[%s6246_s4 + $0x30] sm:$0xff] }
 0x2fa   :  { %v1496_v59 = vadd.f32 %v1495_v51, %v1494_v35 }
 0x2fc   :  { %v1498_v19 = vadd.f32 %v1497_v29, %v1496_v59 }
 0x2fe   :  { %v1500_v43 = vadd.f32 %v1499_v21, %v1498_v19  ;;  %v3704_v19 = vld [vmem:[%s6246_s4 + $0x78] sm:$0xff] }
 0x2ff   :  { %1836 = vmatpush.msra.mxu1 %v3704_v19 }
 0x300   :  { %v1502_v13 = vadd.f32 %v1501_v23, %v1500_v43  ;;  %v3702_v23 = vld [vmem:[%s6246_s4 + $0x68] sm:$0xff] }
 0x301   :  { %1837 = vmatpush.msra.mxu1 %v3703_v26  ;;  %v1347_v26 = vld [vmem:[%s6245_s3] sm:$0x1] }
 0x302   :  { %v1504_v25 = vadd.f32 %v1503_v45, %v1502_v13  ;;  %v1346_v13 = vld [vmem:[%s6247_s2] sm:$0x1] }
 0x303   :  { %v3701_v45 = vld [vmem:[%s6246_s4 + $0x60] sm:$0xff]  ;;  %1838 = vmatpush.msra.mxu1 %v3702_v23 }
 0x304   :  { %v1506_v4 = vadd.f32 %v1505_v54, %v1504_v25  ;;  %v3700_v54 = vld [vmem:[%s6246_s4 + $0x58] sm:$0xff] }
 0x305   :  { %1839 = vmatpush.msra.mxu1 %v3701_v45 }
 0x306   :  { %v1508_v37 = vadd.f32 %v1507_v24, %v1506_v4  ;;  %v3698_v24 = vld [vmem:[%s6246_s4 + $0x48] sm:$0xff] }
 0x307   :  { %1840 = vmatpush.msra.mxu1 %v3700_v54 }
 0x308   :  { %v1510_v2 = vadd.f32 %v1509_v33, %v1508_v37  ;;  %v1754_v37 = vld [vmem:[%s6246_s4 + $0x38] sm:$0xff] }
 0x309   :  { %1841 = vmatpush.msra.mxu1 %v3699_v16  ;;  %v3744_v33 = vld [vmem:[%s6246_s4 + $0xb8] sm:$0xff]  ;;  %1949 = vmatpush.msrb.mxu2 %v1754_v37 }
 0x30a   :  { %v1512_v55 = vadd.f32 %v1511_v17, %v1510_v2  ;;  %2087 = vmatpush.msrb.mxu3 %v3744_v33  ;;  %v3743_v2 = vld [vmem:[%s6246_s4 + $0xb0] sm:$0xff]  ;;  %v3697_v17 = vld [vmem:[%s6246_s4 + $0x40] sm:$0xff] }
 0x30b   :  { %1842 = vmatpush.msra.mxu1 %v3698_v24  ;;  %1950 = vmatpush.msrb.mxu2 %v1753_v6 }
 0x30c   :  { %v1514_v63 = vadd.f32 %v1513_v41, %v1512_v55  ;;  %v1752_v55 = vld [vmem:[%s6246_s4 + $0x28] sm:$0xff]  ;;  %2088 = vmatpush.msrb.mxu3 %v3743_v2  ;;  %v3791_v2 = vld [vmem:[%s6246_s4 + $0x130] sm:$0xff] }
 0x30d   :  { %1843 = vmatpush.msra.mxu1 %v3697_v17  ;;  %1951 = vmatpush.msrb.mxu2 %v1752_v55 }
 0x30e   :  { %v1515_v58 = vrot.slane %v1514_v63, 4 }
 0x310   :  { %v1516_v57 = vadd.f32 %v1515_v58, %v1514_v63  ;;  %v1751_v63 = vld [vmem:[%s6246_s4 + $0x20] sm:$0xff]  ;;  %v3742_v58 = vld [vmem:[%s6246_s4 + $0xa8] sm:$0xff] }
 0x311   :  { %1952 = vmatpush.msrb.mxu2 %v1751_v63  ;;  %2089 = vmatpush.msrb.mxu3 %v3742_v58 }
 0x312   :  { %v1517_v42 = vrot.slane %v1516_v57, 2 }
 0x314   :  { %v1518_v31 = vadd.f32 %v1517_v42, %v1516_v57  ;;  %v1750_v57 = vld [vmem:[%s6246_s4 + $0x18] sm:$0xff]  ;;  %v3741_v42 = vld [vmem:[%s6246_s4 + $0xa0] sm:$0xff] }
 0x315   :  { %1953 = vmatpush.msrb.mxu2 %v1750_v57  ;;  %2090 = vmatpush.msrb.mxu3 %v3741_v42 }
 0x316   :  { %v1519_v10 = vrot.slane %v1518_v31, 1 }
 0x318   :  { %v1520_v53 = vadd.f32 %v1519_v10, %v1518_v31  ;;  %v1749_v31 = vld [vmem:[%s6246_s4 + $0x10] sm:$0xff]  ;;  %v3740_v10 = vld [vmem:[%s6246_s4 + $0x98] sm:$0xff] }
 0x319   :  { %1954 = vmatpush.msrb.mxu2 %v1749_v31  ;;  %2091 = vmatpush.msrb.mxu3 %v3740_v10 }
 0x31a   :  { %1530 = vrot.lane.b32.xlu1 %v1520_v53, %s3935_s30  ;;  %1526 = vrot.lane.b32.xlu0 %v1520_v53, %s3939_s11 }
 0x31b   :  { %1522 = vrot.lane.b32.xlu2 %v1520_v53, %s3936_s8 }
 0x322   :  { %1542 = vrot.lane.b32.xlu1 %v1520_v53, %s3937_s9  ;;  %1538 = vrot.lane.b32.xlu0 %v1520_v53, %s3934_s0 }
 0x323   :  { %1534 = vrot.lane.b32.xlu2 %v1520_v53, %s3938_s10 }
 0x32a   :  { %1612 = vrot.lane.b32.xlu0 %v3928_v5, %s3943_s15  ;;  %1618 = vrot.lane.b32.xlu1 %v3928_v5, %s3941_s13 }
 0x32b   :  { %1546 = vrot.lane.b32.xlu2 %v1520_v53, %s3940_s12 }
 0x332   :  { %1621 = vrot.lane.b32.xlu0 %v3928_v5, %s3946_s18 }
 0x333   :  { %1615 = vrot.lane.b32.xlu2 %v3928_v5, %s3942_s14 }
 0x375   :  { %v1523_v1 = vpop.permute.xlu2 %1522 }
 0x376   :  { %v1525_v8 = vadd.f32 %v1523_v1, %v1520_v53  ;;  %v1748_v1 = vld [vmem:[%s6246_s4 + $0x8] sm:$0xff] }
 0x377   :  { %1955 = vmatpush.msrb.mxu2 %v1748_v1 }
 0x37d   :  { %v1535_v15 = vpop.permute.xlu2 %1534 }
 0x385   :  { %v1547_v35 = vpop.permute.xlu2 %1546 }
 0x38c   :  { %v1531_v49 = vpop.permute.xlu1 %1530  ;;  %v1527_v11 = vpop.permute.xlu0 %1526 }
 0x38d   :  { %v1529_v48 = vadd.f32 %v1527_v11, %v1525_v8  ;;  %v3948_v8 = vmov 0.0   ;;  %v5159_v11 = vpop.permute.xlu2 %1615 }
 0x38e   :  { %1673 = vst.msk [vmem:[#allocation2] sm:$0xff] %vm1348_vm1, %v3948_v8 }
 0x38f   :  { %v1533_v30 = vadd.f32 %v1531_v49, %v1529_v48  ;;  %1676 = vst.msk [vmem:[#allocation2 + $0x10] sm:$0xff] %vm1348_vm1, %v3948_v8  ;;  %v1747_v48 = vld [vmem:[%s6246_s4] sm:$0xff] }
 0x390   :  { %1678 = vst.msk [vmem:[#allocation2 + $0x20] sm:$0xff] %vm1348_vm1, %v3948_v8  ;;  %1956 = vmatpush.msrb.mxu2 %v1747_v48 }
 0x391   :  { %v1537_v62 = vadd.f32 %v1535_v15, %v1533_v30  ;;  %1680 = vst.msk [vmem:[#allocation2 + $0x30] sm:$0xff] %vm1348_vm1, %v3948_v8  ;;  %v3738_v15 = vld [vmem:[%s6246_s4 + $0x88] sm:$0xff]  ;;  %v3768_v30 = vld [vmem:[%s6246_s4 + $0xf8] sm:$0xff] }
 0x392   :  { %1682 = vst.msk [vmem:[#allocation2 + $0x40] sm:$0xff] %vm1348_vm1, %v3948_v8  ;;  %2241 = vmatpush.msrb.mxu0 %v3768_v30 }
 0x393   :  { %1684 = vst.msk [vmem:[#allocation2 + $0x50] sm:$0xff] %vm1348_vm1, %v3948_v8 }
 0x394   :  { %v1539_v18 = vpop.permute.xlu0 %1538  ;;  %v1543_v34 = vpop.permute.xlu1 %1542  ;;  %1686 = vst.msk [vmem:[#allocation2 + $0x60] sm:$0xff] %vm1348_vm1, %v3948_v8 }
 0x395   :  { %v1541_v50 = vadd.f32 %v1539_v18, %v1537_v62  ;;  %v3737_v62 = vld [vmem:[%s6246_s4 + $0x80] sm:$0xff]  ;;  %v3767_v18 = vld [vmem:[%s6246_s4 + $0xf0] sm:$0xff]  ;;  %1688 = vst.msk [vmem:[#allocation2 + $0x70] sm:$0xff] %vm1348_vm1, %v3948_v8 }
 0x396   :  { %1690 = vst.msk [vmem:[#allocation2 + $0x80] sm:$0xff] %vm1348_vm1, %v3948_v8  ;;  %2242 = vmatpush.msrb.mxu0 %v3767_v18 }
 0x397   :  { %v1545_v44 = vadd.f32 %v1543_v34, %v1541_v50  ;;  %v1731_v50 = vld [vmem:[#allocation2] sm:$0xff]  ;;  %v3766_v34 = vld [vmem:[%s6246_s4 + $0xe8] sm:$0xff]  ;;  %1692 = vst.msk [vmem:[#allocation2 + $0x90] sm:$0xff] %vm1348_vm1, %v3948_v8 }
 0x398   :  { %3721 = vmatmul.msk.f32.vlgmr.msrb.gmra.mxu2 %vm1348_vm1, %v1731_v50  ;;  %1694 = vst.msk [vmem:[#allocation2 + $0xa0] sm:$0xff] %vm1348_vm1, %v3948_v8  ;;  %2243 = vmatpush.msrb.mxu0 %v3766_v34 }
 0x399   :  { %v1549_v38 = vadd.f32 %v1547_v35, %v1545_v44  ;;  %v3792_v44 = vld [vmem:[%s6246_s4 + $0x138] sm:$0xff]  ;;  %v3765_v35 = vld [vmem:[%s6246_s4 + $0xe0] sm:$0xff]  ;;  %1696 = vst.msk [vmem:[#allocation2 + $0xb0] sm:$0xff] %vm1348_vm1, %v3948_v8 }
 0x39a   :  { %2395 = vmatpush.msrb.mxu1 %v3792_v44  ;;  %1698 = vst.msk [vmem:[#allocation2 + $0xc0] sm:$0xff] %vm1348_vm1, %v3948_v8  ;;  %2244 = vmatpush.msrb.mxu0 %v3765_v35 }
 0x39b   :  { %v1550_v51 = vmul.f32 0.0009765625, %v1549_v38  ;;  %1700 = vst.msk [vmem:[#allocation2 + $0xd0] sm:$0xff] %vm1348_vm1, %v3948_v8 }
 0x39c   :  { %v5125_v41 = vpop.permute.xlu0 %1612  ;;  %v5145_v53 = vpop.permute.xlu1 %1618  ;;  %1702 = vst.msk [vmem:[#allocation2 + $0xe0] sm:$0xff] %vm1348_vm1, %v3948_v8  ;;  %2396 = vmatpush.msrb.mxu1 %v3791_v2 }
 0x39d   :  { %v1551_v59 = vadd.f32 1e-05, %v1550_v51  ;;  %1704 = vst.msk [vmem:[#allocation2 + $0xf0] sm:$0xff] %vm1348_vm1, %v3948_v8 }
 0x39e   :  { %1706 = vst.msk [vmem:[#allocation2 + $0x100] sm:$0xff] %vm1348_vm1, %v3948_v8 }
 0x39f   :  { %3930 = vrsqrt.f32 %v1551_v59  ;;  %vm1558_vm9 = vweird.f32 %v1551_v59  ;;  %1708 = vst.msk [vmem:[#allocation2 + $0x110] sm:$0xff] %vm1348_vm1, %v3948_v8 }
 0x3a0   :  { %1710 = vst.msk [vmem:[#allocation2 + $0x120] sm:$0xff] %vm1348_vm1, %v3948_v8 }
 0x3a1   :  { %1712 = vst.msk [vmem:[#allocation2 + $0x130] sm:$0xff] %vm1348_vm1, %v3948_v8 }
 0x3a2   :  { %1675 = vst.msk [vmem:[#allocation2 + $0x8] sm:$0x3] %vm1674_vm11, %v3948_v8 }
 0x3a3   :  { %1677 = vst.msk [vmem:[#allocation2 + $0x18] sm:$0x3] %vm1674_vm11, %v3948_v8 }
 0x3a4   :  { %v5155_v49 = vpop.permute.xlu0 %1621  ;;  %1679 = vst.msk [vmem:[#allocation2 + $0x28] sm:$0x3] %vm1674_vm11, %v3948_v8 }
 0x3a5   :  { %v3931_v40 = vpop.eup %3930  ;;  %1681 = vst.msk [vmem:[#allocation2 + $0x38] sm:$0x3] %vm1674_vm11, %v3948_v8 }
 0x3a6   :  { %v1553_v29 = vmul.f32 %v3931_v40, %v1551_v59  ;;  %vm1559_vm8 = vweird.f32 %v3931_v40  ;;  %v3764_v59 = vld [vmem:[%s6246_s4 + $0xd8] sm:$0xff]  ;;  %1683 = vst.msk [vmem:[#allocation2 + $0x48] sm:$0x3] %vm1674_vm11, %v3948_v8 }
 0x3a7   :  { %vm1560_vm10 = vmor %vm1558_vm9, %vm1559_vm8  ;;  %2245 = vmatpush.msrb.mxu0 %v3764_v59  ;;  %1685 = vst.msk [vmem:[#allocation2 + $0x58] sm:$0x3] %vm1674_vm11, %v3948_v8 }
 0x3a8   :  { %v1554_v56 = vmul.f32 %v3931_v40, %v1553_v29  ;;  %v3763_v29 = vld [vmem:[%s6246_s4 + $0xd0] sm:$0xff]  ;;  %1687 = vst.msk [vmem:[#allocation2 + $0x68] sm:$0x3] %vm1674_vm11, %v3948_v8 }
 0x3a9   :  { %2246 = vmatpush.msrb.mxu0 %v3763_v29  ;;  %v2006_v6 = vld [vmem:[#allocation2 + $0x2] sm:$0xff]  ;;  %1689 = vst.msk [vmem:[#allocation2 + $0x78] sm:$0x3] %vm1674_vm11, %v3948_v8 }
 0x3aa   :  { %v1555_v21 = vmul.f32 0.5, %v1554_v56  ;;  %v3762_v56 = vld [vmem:[%s6246_s4 + $0xc8] sm:$0xff]  ;;  %1691 = vst.msk [vmem:[#allocation2 + $0x88] sm:$0x3] %vm1674_vm11, %v3948_v8 }
 0x3ab   :  { %2247 = vmatpush.msrb.mxu0 %v3762_v56  ;;  %v1755_v33 = vld [vmem:[#allocation2 + $0x1] sm:$0xff]  ;;  %1693 = vst.msk [vmem:[#allocation2 + $0x98] sm:$0x3] %vm1674_vm11, %v3948_v8 }
 0x3ac   :  { %v1556_v43 = vsub.f32 1.5, %v1555_v21  ;;  %3705 = vmatmul.msk.f32.vlgmr.msra.gmra.mxu1 %vm1348_vm1, %v1755_v33  ;;  %1695 = vst.msk [vmem:[#allocation2 + $0xa8] sm:$0x3] %vm1674_vm11, %v3948_v8 }
 0x3ad   :  { %1697 = vst.msk [vmem:[#allocation2 + $0xb8] sm:$0x3] %vm1674_vm11, %v3948_v8 }
 0x3ae   :  { %v1557_v9 = vmul.f32 %v3931_v40, %v1556_v43  ;;  %v3761_v43 = vld [vmem:[%s6246_s4 + $0xc0] sm:$0xff]  ;;  %1699 = vst.msk [vmem:[#allocation2 + $0xc8] sm:$0x3] %vm1674_vm11, %v3948_v8 }
 0x3af   :  { %2248 = vmatpush.msrb.mxu0 %v3761_v43  ;;  %1701 = vst.msk [vmem:[#allocation2 + $0xd8] sm:$0x3] %vm1674_vm11, %v3948_v8 }
 0x3b0   :  { %v1561_v25 = vsel %vm1560_vm10, %v3931_v40, %v1557_v9  ;;  %v1633_v9 = vsel %vm1438_vm2, %v1347_v26, %v5125_v41  ;;  %1703 = vst.msk [vmem:[#allocation2 + $0xe8] sm:$0x3] %vm1674_vm11, %v3948_v8 }
 0x3b1   :  { %v5085_v0 = vmul.f32 %v1561_v25, %v1346_v13  ;;  %v1634_v54 = vsel %vm1440_vm3, %v1633_v9, %v5159_v11  ;;  %1705 = vst.msk [vmem:[#allocation2 + $0xf8] sm:$0x3] %vm1674_vm11, %v3948_v8 }
 0x3b2   :  { %v1635_v24 = vsel %vm1442_vm4, %v1634_v54, %v5145_v53  ;;  %1707 = vst.msk [vmem:[#allocation2 + $0x108] sm:$0x3] %vm1674_vm11, %v3948_v8 }
 0x3b3   :  { %v1564_v4 = vperm.slane %v5085_v0, 0  ;;  %v1636_v55 = vsel %vm67_vm0, %v1635_v24, %v5155_v49  ;;  %1709 = vst.msk [vmem:[#allocation2 + $0x118] sm:$0x3] %vm1674_vm11, %v3948_v8 }
 0x3b4   :  { %1711 = vst.msk [vmem:[#allocation2 + $0x128] sm:$0x3] %vm1674_vm11, %v3948_v8 }
 0x3b5   :  { %1571 = vrot.lane.b32.xlu2 %v1564_v4, %s3941_s13  ;;  %1568 = vrot.lane.b32.xlu1 %v1564_v4, %s3942_s14  ;;  %1713 = vst.msk [vmem:[#allocation2 + $0x138] sm:$0x3] %vm1674_vm11, %v3948_v8 }
 0x3b6   :  { %1565 = vrot.lane.b32.xlu0 %v1564_v4, %s3943_s15 }
 0x3bd   :  { %1580 = vrot.lane.b32.xlu2 %v1564_v4, %s3944_s16  ;;  %1574 = vrot.lane.b32.xlu1 %v1564_v4, %s3946_s18 }
 0x3be   :  { %1577 = vrot.lane.b32.xlu0 %v1564_v4, %s3945_s17 }
 0x3c5   :  { %1583 = vrot.lane.b32.xlu1 %v1564_v4, %s3947_s19  ;;  %1624 = vrot.lane.b32.xlu2 %v3928_v5, %s3945_s17 }
 0x3c6   :  { %1627 = vrot.lane.b32.xlu0 %v3928_v5, %s3944_s16 }
 0x3cd   :  { %1630 = vrot.lane.b32.xlu1 %v3928_v5, %s3947_s19  ;;  %v3739_v5 = vld [vmem:[%s6246_s4 + $0x90] sm:$0xff] }
 0x3ce   :  { %2092 = vmatpush.msrb.mxu3 %v3739_v5 }
 0x3d0   :  { %2093 = vmatpush.msrb.mxu3 %v3738_v15 }
 0x3d2   :  { %2094 = vmatpush.msrb.mxu3 %v3737_v62 }
 0x3d3   :  { %3745 = vmatmul.msk.f32.vlgmr.msrb.gmra.mxu3 %vm1348_vm1, %v2006_v6 }
 0x40f   :  { %v1572_v40 = vpop.permute.xlu2 %1571 }
 0x427   :  { %v1569_v38 = vpop.permute.xlu1 %1568 }
 0x428   :  { %v1566_v51 = vpop.permute.xlu0 %1565 }
 0x429   :  { %v1586_v19 = vsel %vm1438_vm2, %v5085_v0, %v1566_v51  ;;  %v1581_v0 = vpop.permute.xlu2 %1580 }
 0x42a   :  { %v1587_v21 = vsel %vm1440_vm3, %v1586_v19, %v1569_v38 }
 0x42b   :  { %v1588_v13 = vsel %vm1442_vm4, %v1587_v21, %v1572_v40 }
 0x42f   :  { %v1575_v23 = vpop.permute.xlu1 %1574 }
 0x430   :  { %v1589_v45 = vsel %vm67_vm0, %v1588_v13, %v1575_v23  ;;  %v1578_v25 = vpop.permute.xlu0 %1577 }
 0x431   :  { %v1590_v4 = vsel %vm1445_vm5, %v1589_v45, %v1578_v25  ;;  %v1625_v41 = vpop.permute.xlu2 %1624 }
 0x432   :  { %v1591_v37 = vsel %vm1447_vm6, %v1590_v4, %v1581_v0  ;;  %v1637_v57 = vsel %vm1445_vm5, %v1636_v55, %v1625_v41  ;;  %v3789_v55 = vld [vmem:[%s6246_s4 + $0x120] sm:$0xff] }
 0x437   :  { %v1584_v16 = vpop.permute.xlu1 %1583 }
 0x438   :  { %v1592_v17 = vsel %vm1449_vm7, %v1591_v37, %v1584_v16  ;;  %v1628_v58 = vpop.permute.xlu0 %1627 }
 0x439   :  { %v5280_v63 = vperm.slane %v1592_v17, 0  ;;  %v1638_v42 = vsel %vm1447_vm6, %v1637_v57, %v1628_v58 }
 0x43b   :  { %v1594_v53 = vmul.f32 %v5280_v63, %v4961_v3  ;;  %v1595_v5 = vmul.f32 %v5280_v63, %v4964_v36  ;;  %v1596_v49 = vmul.f32 %v5280_v63, %v4967_v60  ;;  %v1597_v11 = vmul.f32 %v5280_v63, %v4970_v27 }
 0x43c   :  { %v1598_v48 = vmul.f32 %v5280_v63, %v4977_v7  ;;  %v1599_v3 = vmul.f32 %v5280_v63, %v4982_v14  ;;  %v1600_v15 = vmul.f32 %v5280_v63, %v4989_v20  ;;  %v1601_v7 = vmul.f32 %v5280_v63, %v4995_v46  ;;  %v3790_v46 = vld [vmem:[%s6246_s4 + $0x128] sm:$0xff] }
 0x43d   :  { %v1602_v14 = vmul.f32 %v5280_v63, %v5001_v39  ;;  %v1603_v51 = vmul.f32 %v5280_v63, %v5007_v22  ;;  %v1604_v40 = vmul.f32 %v5280_v63, %v5013_v28  ;;  %v1605_v19 = vmul.f32 %v5280_v63, %v5019_v52  ;;  %2397 = vmatpush.msrb.mxu1 %v3790_v46  ;;  %v3814_v46 = vld [vmem:[%s6246_s4 + $0x168] sm:$0xff] }
 0x43e   :  { %v1606_v21 = vmul.f32 %v5280_v63, %v5025_v12  ;;  %v1607_v26 = vmul.f32 %v5280_v63, %v5031_v61  ;;  %v1608_v52 = vmul.f32 %v5280_v63, %v5037_v47  ;;  %v1609_v12 = vmul.f32 %v5280_v63, %v5043_v32 }
 0x43f   :  { %v1631_v31 = vpop.permute.xlu1 %1630  ;;  %2398 = vmatpush.msrb.mxu1 %v3789_v55 }
 0x440   :  { %v1639_v10 = vsel %vm1449_vm7, %v1638_v42, %v1631_v31 }
 0x441   :  { %v1640_v1 = vperm.slane %v1639_v10, 0  ;;  %v3788_v10 = vld [vmem:[%s6246_s4 + $0x118] sm:$0xff] }
 0x442   :  { %2399 = vmatpush.msrb.mxu1 %v3788_v10 }
 0x443   :  { %v1641_v36 = vadd.f32 %v1640_v1, %v1594_v53  ;;  %v1642_v60 = vadd.f32 %v1640_v1, %v1595_v5  ;;  %v1643_v30 = vadd.f32 %v1640_v1, %v1596_v49  ;;  %v1644_v62 = vadd.f32 %v1640_v1, %v1597_v11 }
 0x444   :  { %v1645_v27 = vadd.f32 %v1640_v1, %v1598_v48  ;;  %v1646_v18 = vadd.f32 %v1640_v1, %v1599_v3  ;;  %v1647_v44 = vadd.f32 %v1640_v1, %v1600_v15  ;;  %v1648_v38 = vadd.f32 %v1640_v1, %v1601_v7  ;;  %v3787_v3 = vld [vmem:[%s6246_s4 + $0x110] sm:$0xff]  ;;  %v3786_v7 = vld [vmem:[%s6246_s4 + $0x108] sm:$0xff] }
 0x445   :  { %v1657_v50 = vmax.f32 %v1641_v36, 0.0  ;;  %v1658_v20 = vmax.f32 %v1642_v60, 0.0  ;;  %v1659_v34 = vmax.f32 %v1643_v30, 0.0  ;;  %v1660_v35 = vmax.f32 %v1644_v62, 0.0  ;;  %2400 = vmatpush.msrb.mxu1 %v3787_v3  ;;  %v1763_v30 = vld [vmem:[#allocation2 + $0xa1] sm:$0xff] }
 0x446   :  { %v1661_v8 = vmax.f32 %v1645_v27, 0.0  ;;  %v1649_v59 = vadd.f32 %v1640_v1, %v1602_v14  ;;  %v1662_v39 = vmax.f32 %v1646_v18, 0.0  ;;  %v1650_v29 = vadd.f32 %v1640_v1, %v1603_v51  ;;  %v1739_v62 = vld [vmem:[#allocation2 + $0xa0] sm:$0xff]  ;;  %v3816_v51 = vld [vmem:[%s6246_s4 + $0x178] sm:$0xff]  ;;  %v3858_v3 = vld [vmem:[%s6246_s4 + $0x1c8] sm:$0xff] }
 0x447   :  { %1715 = vst.msk [vmem:[#allocation2 + $0x11] sm:$0xff] %vm1348_vm1, %v1657_v50  ;;  %v1663_v22 = vmax.f32 %v1647_v44, 0.0  ;;  %v1651_v56 = vadd.f32 %v1640_v1, %v1604_v40  ;;  %v1664_v28 = vmax.f32 %v1648_v38, 0.0  ;;  %v1652_v43 = vadd.f32 %v1640_v1, %v1605_v19  ;;  %v2014_v27 = vld [vmem:[#allocation2 + $0xa2] sm:$0xff]  ;;  %2401 = vmatpush.msrb.mxu1 %v3786_v7  ;;  %2549 = vmatpush.msra.mxu2 %v3816_v51  ;;  %v3839_v40 = vld [vmem:[%s6246_s4 + $0x1b0] sm:$0xff] }
 0x448   :  { %1716 = vst.msk [vmem:[#allocation2 + $0x21] sm:$0xff] %vm1348_vm1, %v1658_v20  ;;  %v1665_v23 = vmax.f32 %v1649_v59, 0.0  ;;  %v1653_v13 = vadd.f32 %v1640_v1, %v1606_v21  ;;  %v1666_v9 = vmax.f32 %v1650_v29, 0.0  ;;  %v1654_v45 = vadd.f32 %v1640_v1, %v1607_v26  ;;  %v3785_v38 = vld [vmem:[%s6246_s4 + $0x100] sm:$0xff]  ;;  %v3815_v59 = vld [vmem:[%s6246_s4 + $0x170] sm:$0xff]  ;;  %v3864_v26 = vld [vmem:[%s6246_s4 + $0x1f8] sm:$0xff] }
 0x449   :  { %1717 = vst.msk [vmem:[#allocation2 + $0x31] sm:$0xff] %vm1348_vm1, %v1659_v34  ;;  %v1667_v25 = vmax.f32 %v1651_v56, 0.0  ;;  %v1655_v0 = vadd.f32 %v1640_v1, %v1608_v52  ;;  %v1668_v16 = vmax.f32 %v1652_v43, 0.0  ;;  %v1656_v47 = vadd.f32 %v1640_v1, %v1609_v12  ;;  %2402 = vmatpush.msrb.mxu1 %v3785_v38  ;;  %2550 = vmatpush.msra.mxu2 %v3815_v59  ;;  %v3837_v56 = vld [vmem:[%s6246_s4 + $0x1a0] sm:$0xff]  ;;  %v3836_v43 = vld [vmem:[%s6246_s4 + $0x198] sm:$0xff]  ;;  %v3835_v52 = vld [vmem:[%s6246_s4 + $0x190] sm:$0xff] }
 0x44a   :  { %1718 = vst.msk [vmem:[#allocation2 + $0x41] sm:$0xff] %vm1348_vm1, %v1660_v35  ;;  %v1669_v32 = vmax.f32 %v1653_v13, 0.0  ;;  %v1670_v24 = vmax.f32 %v1654_v45, 0.0  ;;  %2858 = vmatpush.msra.mxu0 %v3864_v26  ;;  %v3811_v13 = vld [vmem:[%s6246_s4 + $0x150] sm:$0xff] }
 0x44b   :  { %1719 = vst.msk [vmem:[#allocation2 + $0x51] sm:$0xff] %vm1348_vm1, %v1661_v8  ;;  %v1671_v37 = vmax.f32 %v1655_v0, 0.0  ;;  %v1672_v6 = vmax.f32 %v1656_v47, 0.0  ;;  %v3840_v8 = vld [vmem:[%s6246_s4 + $0x1b8] sm:$0xff]  ;;  %2551 = vmatpush.msra.mxu2 %v3814_v46  ;;  %v3834_v0 = vld [vmem:[%s6246_s4 + $0x188] sm:$0xff]  ;;  %v3809_v47 = vld [vmem:[%s6246_s4 + $0x140] sm:$0xff] }
 0x44c   :  { %1720 = vst.msk [vmem:[#allocation2 + $0x61] sm:$0xff] %vm1348_vm1, %v1662_v39  ;;  %2704 = vmatpush.msra.mxu3 %v3840_v8  ;;  %v3838_v39 = vld [vmem:[%s6246_s4 + $0x1a8] sm:$0xff]  ;;  %v3887_v38 = vld [vmem:[%s6246_s4 + $0x230] sm:$0xff] }
 0x44d   :  { %1721 = vst.msk [vmem:[#allocation2 + $0x71] sm:$0xff] %vm1348_vm1, %v1663_v22  ;;  %v3813_v22 = vld [vmem:[%s6246_s4 + $0x160] sm:$0xff] }
 0x44e   :  { %v5345_v54 = vld [vmem:[#allocation2 + $0x11] sm:$0xff]  ;;  %1722 = vst.msk [vmem:[#allocation2 + $0x81] sm:$0xff] %vm1348_vm1, %v1664_v28  ;;  %2705 = vmatpush.msra.mxu3 %v3839_v40  ;;  %2552 = vmatpush.msra.mxu2 %v3813_v22  ;;  %v5642_v40 = vpop.f32.mrf.mxu1  ;;  %v5657_v22 = vpop.f32.mrf.mxu2 }
 0x44f   :  { %v1732_v61 = vld [vmem:[#allocation2 + $0x10] sm:$0xff]  ;;  %3706 = vmatmul.msk.f32.gmra.mxu1 %vm1348_vm1, %v5345_v54  ;;  %1723 = vst.msk [vmem:[#allocation2 + $0xb1] sm:$0xff] %vm1348_vm1, %v1665_v23  ;;  %v5363_v33 = vld [vmem:[#allocation2 + $0x21] sm:$0xff]  ;;  %v3812_v28 = vld [vmem:[%s6246_s4 + $0x158] sm:$0xff] }
 0x450   :  { %v5347_v4 = vld [vmem:[#allocation2 + $0x12] sm:$0xff]  ;;  %3722 = vmatmul.msk.f32.gmra.mxu2 %vm1348_vm1, %v1732_v61  ;;  %3769 = vmatmul.msk.f32.vlgmr.msrb.gmra.mxu0 %vm1348_vm1, %v1732_v61  ;;  %1724 = vst.msk [vmem:[#allocation2 + $0xc1] sm:$0xff] %vm1348_vm1, %v1666_v9  ;;  %v5365_v2 = vld [vmem:[#allocation2 + $0x20] sm:$0xff]  ;;  %v3862_v9 = vld [vmem:[%s6246_s4 + $0x1e8] sm:$0xff] }
 0x451   :  { %3746 = vmatmul.msk.f32.gmra.mxu3 %vm1348_vm1, %v5347_v4  ;;  %1725 = vst.msk [vmem:[#allocation2 + $0xd1] sm:$0xff] %vm1348_vm1, %v1667_v25  ;;  %v5372_v17 = vld [vmem:[#allocation2 + $0x22] sm:$0xff]  ;;  %v5381_v41 = vld [vmem:[#allocation2 + $0x31] sm:$0xff]  ;;  %2553 = vmatpush.msra.mxu2 %v3812_v28 }
 0x452   :  { %1726 = vst.msk [vmem:[#allocation2 + $0xe1] sm:$0xff] %vm1348_vm1, %v1668_v16  ;;  %v5383_v63 = vld [vmem:[#allocation2 + $0x30] sm:$0xff]  ;;  %v5395_v57 = vld [vmem:[#allocation2 + $0x41] sm:$0xff]  ;;  %2706 = vmatpush.msra.mxu3 %v3838_v39 }
 0x453   :  { %1727 = vst.msk [vmem:[#allocation2 + $0xf1] sm:$0xff] %vm1348_vm1, %v1669_v32  ;;  %v5389_v58 = vld [vmem:[#allocation2 + $0x32] sm:$0xff]  ;;  %v5397_v42 = vld [vmem:[#allocation2 + $0x40] sm:$0xff]  ;;  %2554 = vmatpush.msra.mxu2 %v3811_v13  ;;  %v3810_v25 = vld [vmem:[%s6246_s4 + $0x148] sm:$0xff] }
 0x454   :  { %1728 = vst.msk [vmem:[#allocation2 + $0x101] sm:$0xff] %vm1348_vm1, %v1670_v24  ;;  %v5403_v31 = vld [vmem:[#allocation2 + $0x42] sm:$0xff]  ;;  %v5412_v53 = vld [vmem:[#allocation2 + $0x51] sm:$0xff]  ;;  %2707 = vmatpush.msra.mxu3 %v3837_v56 }
 0x455   :  { %1729 = vst.msk [vmem:[#allocation2 + $0x111] sm:$0xff] %vm1348_vm1, %v1671_v37  ;;  %v5414_v1 = vld [vmem:[#allocation2 + $0x50] sm:$0xff]  ;;  %v5426_v49 = vld [vmem:[#allocation2 + $0x61] sm:$0xff]  ;;  %v3888_v24 = vld [vmem:[%s6246_s4 + $0x238] sm:$0xff]  ;;  %2555 = vmatpush.msra.mxu2 %v3810_v25 }
 0x456   :  { %1730 = vst.msk [vmem:[#allocation2 + $0x121] sm:$0xff] %vm1348_vm1, %v1672_v6  ;;  %v5420_v5 = vld [vmem:[#allocation2 + $0x52] sm:$0xff]  ;;  %v5428_v11 = vld [vmem:[#allocation2 + $0x60] sm:$0xff]  ;;  %2708 = vmatpush.msra.mxu3 %v3836_v43  ;;  %3012 = vmatpush.msra.mxu1 %v3888_v24  ;;  %v3886_v39 = vld [vmem:[%s6246_s4 + $0x228] sm:$0xff]  ;;  %v5659_v56 = vpop.f32.mrf.mxu3 }
 0x457   :  { %3707 = vmatmul.msk.f32.gmra.mxu1 %vm1348_vm1, %v5363_v33  ;;  %v5434_v48 = vld [vmem:[#allocation2 + $0x62] sm:$0xff]  ;;  %v5443_v15 = vld [vmem:[#allocation2 + $0x71] sm:$0xff]  ;;  %2556 = vmatpush.msra.mxu2 %v3809_v47 }
 0x458   :  { %3723 = vmatmul.msk.f32.gmra.mxu2 %vm1348_vm1, %v5365_v2  ;;  %3770 = vmatmul.msk.f32.gmra.mxu0 %vm1348_vm1, %v5365_v2  ;;  %v5445_v36 = vld [vmem:[#allocation2 + $0x70] sm:$0xff]  ;;  %v5459_v18 = vld [vmem:[#allocation2 + $0x80] sm:$0xff]  ;;  %v3860_v37 = vld [vmem:[%s6246_s4 + $0x1d8] sm:$0xff] }
 0x459   :  { %3747 = vmatmul.msk.f32.gmra.mxu3 %vm1348_vm1, %v5372_v17  ;;  %v5451_v60 = vld [vmem:[#allocation2 + $0x72] sm:$0xff]  ;;  %v5477_v34 = vld [vmem:[#allocation2 + $0xc1] sm:$0xff]  ;;  %3013 = vmatpush.msra.mxu1 %v3887_v38 }
 0x45a   :  { %v5467_v14 = vld [vmem:[#allocation2 + $0xb1] sm:$0xff]  ;;  %v5479_v44 = vld [vmem:[#allocation2 + $0xc0] sm:$0xff]  ;;  %2709 = vmatpush.msra.mxu3 %v3835_v52 }
 0x45b   :  { %v1740_v50 = vld [vmem:[#allocation2 + $0xb0] sm:$0xff]  ;;  %v5485_v35 = vld [vmem:[#allocation2 + $0xc2] sm:$0xff]  ;;  %3014 = vmatpush.msra.mxu1 %v3886_v39 }
 0x45c   :  { %v5472_v20 = vld [vmem:[#allocation2 + $0xb2] sm:$0xff]  ;;  %v5553_v45 = vld [vmem:[#allocation2 + $0xe1] sm:$0xff]  ;;  %2710 = vmatpush.msra.mxu3 %v3834_v0 }
 0x45d   :  { %v5512_v29 = vld [vmem:[#allocation2 + $0xd1] sm:$0xff]  ;;  %v5555_v12 = vld [vmem:[#allocation2 + $0xe0] sm:$0xff] }
 0x45e   :  { %v5514_v19 = vld [vmem:[#allocation2 + $0xd0] sm:$0xff]  ;;  %v5567_v61 = vld [vmem:[#allocation2 + $0xe2] sm:$0xff] }
 0x45f   :  { %3708 = vmatmul.msk.f32.gmra.mxu1 %vm1348_vm1, %v5381_v41  ;;  %v5526_v21 = vld [vmem:[#allocation2 + $0xd2] sm:$0xff]  ;;  %v3861_v16 = vld [vmem:[%s6246_s4 + $0x1e0] sm:$0xff] }
 0x460   :  { %3724 = vmatmul.msk.f32.gmra.mxu2 %vm1348_vm1, %v5383_v63  ;;  %3771 = vmatmul.msk.f32.gmra.mxu0 %vm1348_vm1, %v5383_v63  ;;  %v3863_v23 = vld [vmem:[%s6246_s4 + $0x1f0] sm:$0xff]  ;;  %v3833_v32 = vld [vmem:[%s6246_s4 + $0x180] sm:$0xff] }
 0x461   :  { %3748 = vmatmul.msk.f32.gmra.mxu3 %vm1348_vm1, %v5389_v58  ;;  %2859 = vmatpush.msra.mxu0 %v3863_v23  ;;  %v3859_v6 = vld [vmem:[%s6246_s4 + $0x1d0] sm:$0xff]  ;;  %v5613_v7 = vld [vmem:[#allocation2 + $0x100] sm:$0xff] }
 0x462   :  { %2711 = vmatpush.msra.mxu3 %v3833_v32  ;;  %v5591_v55 = vld [vmem:[#allocation2 + $0xf1] sm:$0xff]  ;;  %v5644_v46 = vld [vmem:[#allocation2 + $0x120] sm:$0xff] }
 0x463   :  { %2860 = vmatpush.msra.mxu0 %v3862_v9  ;;  %v5593_v10 = vld [vmem:[#allocation2 + $0xf0] sm:$0xff] }
 0x464   :  { %v5628_v51 = vld [vmem:[#allocation2 + $0x111] sm:$0xff] }
 0x465   :  { %2861 = vmatpush.msra.mxu0 %v3861_v16  ;;  %v5630_v8 = vld [vmem:[#allocation2 + $0x110] sm:$0xff] }
 0x466   :  { %v5636_v59 = vld [vmem:[#allocation2 + $0x112] sm:$0xff] }
 0x467   :  { %3709 = vmatmul.msk.f32.gmra.mxu1 %vm1348_vm1, %v5395_v57  ;;  %2862 = vmatpush.msra.mxu0 %v3860_v37 }
 0x468   :  { %3725 = vmatmul.msk.f32.gmra.mxu2 %vm1348_vm1, %v5397_v42  ;;  %3772 = vmatmul.msk.f32.gmra.mxu0 %vm1348_vm1, %v5397_v42 }
 0x469   :  { %3749 = vmatmul.msk.f32.gmra.mxu3 %vm1348_vm1, %v5403_v31  ;;  %2863 = vmatpush.msra.mxu0 %v3859_v6 }
 0x46b   :  { %2864 = vmatpush.msra.mxu0 %v3858_v3 }
 0x46f   :  { %3710 = vmatmul.msk.f32.gmra.mxu1 %vm1348_vm1, %v5412_v53 }
 0x470   :  { %3726 = vmatmul.msk.f32.gmra.mxu2 %vm1348_vm1, %v5414_v1  ;;  %3773 = vmatmul.msk.f32.gmra.mxu0 %vm1348_vm1, %v5414_v1 }
 0x471   :  { %3750 = vmatmul.msk.f32.gmra.mxu3 %vm1348_vm1, %v5420_v5 }
 0x477   :  { %3711 = vmatmul.msk.f32.gmra.mxu1 %vm1348_vm1, %v5426_v49 }
 0x478   :  { %3727 = vmatmul.msk.f32.gmra.mxu2 %vm1348_vm1, %v5428_v11  ;;  %3774 = vmatmul.msk.f32.gmra.mxu0 %vm1348_vm1, %v5428_v11 }
 0x479   :  { %3751 = vmatmul.msk.f32.gmra.mxu3 %vm1348_vm1, %v5434_v48 }
 0x47f   :  { %3712 = vmatmul.msk.f32.gmra.mxu1 %vm1348_vm1, %v5443_v15 }
 0x480   :  { %3728 = vmatmul.msk.f32.gmra.mxu2 %vm1348_vm1, %v5445_v36  ;;  %3775 = vmatmul.msk.f32.gmra.mxu0 %vm1348_vm1, %v5445_v36 }
 0x481   :  { %3752 = vmatmul.msk.f32.gmra.mxu3 %vm1348_vm1, %v5451_v60 }
 0x487   :  { %3713 = vmatmul.msk.f32.gmra.mxu1 %vm1348_vm1, %v1763_v30  ;;  %v5602_v30 = vld [vmem:[#allocation2 + $0xf2] sm:$0xff] }
 0x488   :  { %3729 = vmatmul.msk.f32.gmra.mxu2 %vm1348_vm1, %v1739_v62  ;;  %3776 = vmatmul.msk.f32.gmra.mxu0 %vm1348_vm1, %v5459_v18  ;;  %v3857_v62 = vld [vmem:[%s6246_s4 + $0x1c0] sm:$0xff] }
 0x489   :  { %3753 = vmatmul.msk.f32.gmra.mxu3 %vm1348_vm1, %v2014_v27  ;;  %2865 = vmatpush.msra.mxu0 %v3857_v62  ;;  %v5611_v27 = vld [vmem:[#allocation2 + $0x101] sm:$0xff] }
 0x48f   :  { %3714 = vmatmul.msk.f32.gmra.mxu1 %vm1348_vm1, %v5467_v14 }
 0x490   :  { %3730 = vmatmul.msk.f32.gmra.mxu2 %vm1348_vm1, %v1740_v50  ;;  %3777 = vmatmul.msk.f32.gmra.mxu0 %vm1348_vm1, %v1740_v50  ;;  %v5619_v50 = vld [vmem:[#allocation2 + $0x102] sm:$0xff] }
 0x491   :  { %3754 = vmatmul.msk.f32.gmra.mxu3 %vm1348_vm1, %v5472_v20 }
 0x497   :  { %3715 = vmatmul.msk.f32.gmra.mxu1 %vm1348_vm1, %v5477_v34 }
 0x498   :  { %3731 = vmatmul.msk.f32.gmra.mxu2 %vm1348_vm1, %v5479_v44  ;;  %3778 = vmatmul.msk.f32.gmra.mxu0 %vm1348_vm1, %v5479_v44 }
 0x499   :  { %3755 = vmatmul.msk.f32.gmra.mxu3 %vm1348_vm1, %v5485_v35 }
 0x49f   :  { %3716 = vmatmul.msk.f32.gmra.mxu1 %vm1348_vm1, %v5512_v29 }
 0x4a0   :  { %3732 = vmatmul.msk.f32.gmra.mxu2 %vm1348_vm1, %v5514_v19  ;;  %3779 = vmatmul.msk.f32.gmra.mxu0 %vm1348_vm1, %v5514_v19 }
 0x4a1   :  { %3756 = vmatmul.msk.f32.gmra.mxu3 %vm1348_vm1, %v5526_v21 }
 0x4a7   :  { %3717 = vmatmul.msk.f32.gmra.mxu1 %vm1348_vm1, %v5553_v45 }
 0x4a8   :  { %3733 = vmatmul.msk.f32.gmra.mxu2 %vm1348_vm1, %v5555_v12  ;;  %3780 = vmatmul.msk.f32.gmra.mxu0 %vm1348_vm1, %v5555_v12 }
 0x4a9   :  { %3757 = vmatmul.msk.f32.gmra.mxu3 %vm1348_vm1, %v5567_v61 }
 0x4af   :  { %3718 = vmatmul.msk.f32.gmra.mxu1 %vm1348_vm1, %v5591_v55 }
 0x4b0   :  { %3734 = vmatmul.msk.f32.gmra.mxu2 %vm1348_vm1, %v5593_v10  ;;  %3781 = vmatmul.msk.f32.gmra.mxu0 %vm1348_vm1, %v5593_v10 }
 0x4b1   :  { %3758 = vmatmul.msk.f32.gmra.mxu3 %vm1348_vm1, %v5602_v30 }
 0x4b7   :  { %3719 = vmatmul.msk.f32.gmra.mxu1 %vm1348_vm1, %v5611_v27 }
 0x4b8   :  { %3735 = vmatmul.msk.f32.gmra.mxu2 %vm1348_vm1, %v5613_v7  ;;  %3782 = vmatmul.msk.f32.gmra.mxu0 %vm1348_vm1, %v5613_v7 }
 0x4b9   :  { %3759 = vmatmul.msk.f32.gmra.mxu3 %vm1348_vm1, %v5619_v50 }
 0x4bf   :  { %3720 = vmatmul.msk.f32.gmra.mxu1 %vm1348_vm1, %v5628_v51 }
 0x4c0   :  { %3736 = vmatmul.msk.f32.gmra.mxu2 %vm1348_vm1, %v5630_v8  ;;  %3783 = vmatmul.msk.f32.gmra.mxu0 %vm1348_vm1, %v5630_v8 }
 0x4c1   :  { %3760 = vmatmul.msk.f32.gmra.mxu3 %vm1348_vm1, %v5636_v59 }
 0x4c7   :  { %3793 = vmatmul.msk.f32.vlgmr.msrb.gmra.mxu1 %vm1348_vm1, %v5345_v54 }
 0x4c8   :  { %3817 = vmatmul.msk.f32.vlgmr.msra.gmra.mxu2 %vm1348_vm1, %v5347_v4  ;;  %3784 = vmatmul.msk.f32.gmra.mxu0 %vm1348_vm1, %v5644_v46 }
 0x4c9   :  { %3841 = vmatmul.msk.f32.vlgmr.msra.gmra.mxu3 %vm1348_vm1, %v5365_v2 }
 0x4cc   :  { %v1848_v28 = vpop.f32.mrf.mxu1 }
 0x4cd   :  { %v5661_v54 = vpop.f32.mrf.mxu0 }
 0x4cf   :  { %3794 = vmatmul.msk.f32.gmra.mxu1 %vm1348_vm1, %v5363_v33 }
 0x4d0   :  { %3818 = vmatmul.msk.f32.gmra.mxu2 %vm1348_vm1, %v5372_v17  ;;  %3865 = vmatmul.msk.f32.vlgmr.msra.gmra.mxu0 %vm1348_vm1, %v5363_v33  ;;  %v3885_v33 = vld [vmem:[%s6246_s4 + $0x220] sm:$0xff] }
 0x4d1   :  { %3842 = vmatmul.msk.f32.gmra.mxu3 %vm1348_vm1, %v5383_v63  ;;  %3015 = vmatpush.msra.mxu1 %v3885_v33 }
 0x4d3   :  { %v1961_v4 = vpop.f32.mrf.mxu2 }
 0x4d4   :  { %v1962_v2 = vadd.f32 %v1961_v4, %v1848_v28  ;;  %v2099_v43 = vpop.f32.mrf.mxu3  ;;  %v1851_v26 = vpop.f32.mrf.mxu1 }
 0x4d5   :  { %v5673_v13 = vpop.f32.mrf.mxu0 }
 0x4d6   :  { %v5671_v23 = vadd.f32 %v2099_v43, %v1962_v2 }
 0x4d7   :  { %3795 = vmatmul.msk.f32.gmra.mxu1 %vm1348_vm1, %v5381_v41 }
 0x4d8   :  { %3819 = vmatmul.msk.f32.gmra.mxu2 %vm1348_vm1, %v5389_v58  ;;  %3866 = vmatmul.msk.f32.gmra.mxu0 %vm1348_vm1, %v5381_v41 }
 0x4d9   :  { %3843 = vmatmul.msk.f32.gmra.mxu3 %vm1348_vm1, %v5397_v42 }
 0x4db   :  { %v1964_v63 = vpop.f32.mrf.mxu2 }
 0x4dc   :  { %v1965_v52 = vadd.f32 %v1964_v63, %v1851_v26  ;;  %v2102_v9 = vpop.f32.mrf.mxu3  ;;  %v1854_v25 = vpop.f32.mrf.mxu1 }
 0x4dd   :  { %v5688_v16 = vpop.f32.mrf.mxu0 }
 0x4de   :  { %v5686_v0 = vadd.f32 %v2102_v9, %v1965_v52 }
 0x4df   :  { %3796 = vmatmul.msk.f32.gmra.mxu1 %vm1348_vm1, %v5395_v57 }
 0x4e0   :  { %3820 = vmatmul.msk.f32.gmra.mxu2 %vm1348_vm1, %v5403_v31  ;;  %3867 = vmatmul.msk.f32.gmra.mxu0 %vm1348_vm1, %v5395_v57  ;;  %v3884_v57 = vld [vmem:[%s6246_s4 + $0x218] sm:$0xff] }
 0x4e1   :  { %3844 = vmatmul.msk.f32.gmra.mxu3 %vm1348_vm1, %v5414_v1  ;;  %3016 = vmatpush.msra.mxu1 %v3884_v57 }
 0x4e3   :  { %v1967_v41 = vpop.f32.mrf.mxu2 }
 0x4e4   :  { %v1968_v42 = vadd.f32 %v1967_v41, %v1854_v25  ;;  %v2105_v47 = vpop.f32.mrf.mxu3  ;;  %v1857_v32 = vpop.f32.mrf.mxu1  ;;  %v2630_v25 = vld [vmem:[#allocation2 + $0x90] sm:$0xff]  ;;  %v2321_v41 = vld [vmem:[#allocation2 + $0x81] sm:$0xff] }
 0x4e5   :  { %v5700_v37 = vpop.f32.mrf.mxu0 }
 0x4e6   :  { %v5698_v24 = vadd.f32 %v2105_v47, %v1968_v42  ;;  %v5744_v42 = vld [vmem:[#allocation2 + $0x82] sm:$0xff] }
 0x4e7   :  { %3797 = vmatmul.msk.f32.gmra.mxu1 %vm1348_vm1, %v5412_v53 }
 0x4e8   :  { %3821 = vmatmul.msk.f32.gmra.mxu2 %vm1348_vm1, %v5420_v5  ;;  %3868 = vmatmul.msk.f32.gmra.mxu0 %vm1348_vm1, %v5412_v53 }
 0x4e9   :  { %3845 = vmatmul.msk.f32.gmra.mxu3 %vm1348_vm1, %v5428_v11 }
 0x4eb   :  { %v1970_v1 = vpop.f32.mrf.mxu2 }
 0x4ec   :  { %v1971_v6 = vadd.f32 %v1970_v1, %v1857_v32  ;;  %v2108_v3 = vpop.f32.mrf.mxu3  ;;  %v1860_v62 = vpop.f32.mrf.mxu1 }
 0x4ed   :  { %v5715_v39 = vpop.f32.mrf.mxu0 }
 0x4ee   :  { %v5713_v38 = vadd.f32 %v2108_v3, %v1971_v6  ;;  %v2784_v6 = vld [vmem:[#allocation2 + $0x91] sm:$0xff]  ;;  %v3882_v3 = vld [vmem:[%s6246_s4 + $0x208] sm:$0xff] }
 0x4ef   :  { %3798 = vmatmul.msk.f32.gmra.mxu1 %vm1348_vm1, %v5426_v49 }
 0x4f0   :  { %3822 = vmatmul.msk.f32.gmra.mxu2 %vm1348_vm1, %v5434_v48  ;;  %3869 = vmatmul.msk.f32.gmra.mxu0 %vm1348_vm1, %v5426_v49  ;;  %v3883_v49 = vld [vmem:[%s6246_s4 + $0x210] sm:$0xff] }
 0x4f1   :  { %3846 = vmatmul.msk.f32.gmra.mxu3 %vm1348_vm1, %v5445_v36  ;;  %3017 = vmatpush.msra.mxu1 %v3883_v49 }
 0x4f3   :  { %v1973_v53 = vpop.f32.mrf.mxu2  ;;  %3018 = vmatpush.msra.mxu1 %v3882_v3 }
 0x4f4   :  { %v1974_v11 = vadd.f32 %v1973_v53, %v1860_v62  ;;  %v2111_v28 = vpop.f32.mrf.mxu3  ;;  %v1863_v4 = vpop.f32.mrf.mxu1 }
 0x4f5   :  { %v5727_v43 = vpop.f32.mrf.mxu0 }
 0x4f6   :  { %v5725_v2 = vadd.f32 %v2111_v28, %v1974_v11 }
 0x4f7   :  { %3799 = vmatmul.msk.f32.gmra.mxu1 %vm1348_vm1, %v5443_v15 }
 0x4f8   :  { %3823 = vmatmul.msk.f32.gmra.mxu2 %vm1348_vm1, %v5451_v60  ;;  %3870 = vmatmul.msk.f32.gmra.mxu0 %vm1348_vm1, %v5443_v15 }
 0x4f9   :  { %3847 = vmatmul.msk.f32.gmra.mxu3 %vm1348_vm1, %v5459_v18 }
 0x4fb   :  { %v1976_v36 = vpop.f32.mrf.mxu2 }
 0x4fc   :  { %v1977_v26 = vadd.f32 %v1976_v36, %v1863_v4  ;;  %v2114_v33 = vpop.f32.mrf.mxu3  ;;  %v1866_v63 = vpop.f32.mrf.mxu1 }
 0x4fd   :  { %v5742_v9 = vpop.f32.mrf.mxu0 }
 0x4fe   :  { %v5740_v52 = vadd.f32 %v2114_v33, %v1977_v26 }
 0x4ff   :  { %3800 = vmatmul.msk.f32.gmra.mxu1 %vm1348_vm1, %v2321_v41 }
 0x500   :  { %3824 = vmatmul.msk.f32.gmra.mxu2 %vm1348_vm1, %v5744_v42  ;;  %3871 = vmatmul.msk.f32.gmra.mxu0 %vm1348_vm1, %v2321_v41 }
 0x501   :  { %3848 = vmatmul.msk.f32.gmra.mxu3 %vm1348_vm1, %v2630_v25 }
 0x503   :  { %v1979_v15 = vpop.f32.mrf.mxu2 }
 0x504   :  { %v1980_v18 = vadd.f32 %v1979_v15, %v1866_v63  ;;  %v2117_v47 = vpop.f32.mrf.mxu3  ;;  %v1869_v32 = vpop.f32.mrf.mxu1 }
 0x505   :  { %v5753_v1 = vpop.f32.mrf.mxu0 }
 0x506   :  { %v5751_v57 = vadd.f32 %v2117_v47, %v1980_v18 }
 0x507   :  { %3801 = vmatmul.msk.f32.gmra.mxu1 %vm1348_vm1, %v5467_v14 }
 0x508   :  { %3825 = vmatmul.msk.f32.gmra.mxu2 %vm1348_vm1, %v5472_v20  ;;  %3872 = vmatmul.msk.f32.gmra.mxu0 %vm1348_vm1, %v2784_v6 }
 0x509   :  { %3849 = vmatmul.msk.f32.gmra.mxu3 %vm1348_vm1, %v5479_v44 }
 0x50b   :  { %v1982_v62 = vpop.f32.mrf.mxu2 }
 0x50c   :  { %v1983_v53 = vadd.f32 %v1982_v62, %v1869_v32  ;;  %v2120_v11 = vpop.f32.mrf.mxu3  ;;  %v1872_v28 = vpop.f32.mrf.mxu1 }
 0x50d   :  { %v2274_v49 = vpop.f32.mrf.mxu0 }
 0x50e   :  { %v2152_v4 = vadd.f32 %v2120_v11, %v1983_v53 }
 0x50f   :  { %3802 = vmatmul.msk.f32.gmra.mxu1 %vm1348_vm1, %v5477_v34 }
 0x510   :  { %v5765_v14 = vadd.f32 %v2274_v49, %v2152_v4  ;;  %3826 = vmatmul.msk.f32.gmra.mxu2 %vm1348_vm1, %v5485_v35  ;;  %3873 = vmatmul.msk.f32.gmra.mxu0 %vm1348_vm1, %v5477_v34  ;;  %v3881_v34 = vld [vmem:[%s6246_s4 + $0x200] sm:$0xff] }
 0x511   :  { %3850 = vmatmul.msk.f32.gmra.mxu3 %vm1348_vm1, %v5514_v19  ;;  %3019 = vmatpush.msra.mxu1 %v3881_v34 }
 0x513   :  { %v1985_v20 = vpop.f32.mrf.mxu2 }
 0x514   :  { %v1986_v44 = vadd.f32 %v1985_v20, %v1872_v28  ;;  %v2123_v36 = vpop.f32.mrf.mxu3  ;;  %v1875_v26 = vpop.f32.mrf.mxu1 }
 0x515   :  { %v2277_v63 = vpop.f32.mrf.mxu0 }
 0x516   :  { %v2153_v33 = vadd.f32 %v2123_v36, %v1986_v44 }
 0x517   :  { %3803 = vmatmul.msk.f32.gmra.mxu1 %vm1348_vm1, %v5512_v29 }
 0x518   :  { %v5775_v25 = vadd.f32 %v2277_v63, %v2153_v33  ;;  %3827 = vmatmul.msk.f32.gmra.mxu2 %vm1348_vm1, %v5526_v21  ;;  %3874 = vmatmul.msk.f32.gmra.mxu0 %vm1348_vm1, %v5512_v29 }
 0x519   :  { %3851 = vmatmul.msk.f32.gmra.mxu3 %vm1348_vm1, %v5555_v12 }
 0x51b   :  { %v1988_v19 = vpop.f32.mrf.mxu2 }
 0x51c   :  { %v1989_v41 = vadd.f32 %v1988_v19, %v1875_v26  ;;  %v2126_v15 = vpop.f32.mrf.mxu3  ;;  %v1878_v18 = vpop.f32.mrf.mxu1 }
 0x51d   :  { %v2280_v32 = vpop.f32.mrf.mxu0 }
 0x51e   :  { %v2154_v47 = vadd.f32 %v2126_v15, %v1989_v41 }
 0x51f   :  { %3804 = vmatmul.msk.f32.gmra.mxu1 %vm1348_vm1, %v5553_v45 }
 0x520   :  { %v5788_v6 = vadd.f32 %v2280_v32, %v2154_v47  ;;  %3828 = vmatmul.msk.f32.gmra.mxu2 %vm1348_vm1, %v5567_v61  ;;  %3875 = vmatmul.msk.f32.gmra.mxu0 %vm1348_vm1, %v5553_v45  ;;  %v2638_v32 = vld [vmem:[#allocation2 + $0x130] sm:$0xff] }
 0x521   :  { %3852 = vmatmul.msk.f32.gmra.mxu3 %vm1348_vm1, %v5593_v10 }
 0x523   :  { %v1991_v29 = vpop.f32.mrf.mxu2 }
 0x524   :  { %v1992_v12 = vadd.f32 %v1991_v29, %v1878_v18  ;;  %v2129_v3 = vpop.f32.mrf.mxu3  ;;  %v1881_v62 = vpop.f32.mrf.mxu1  ;;  %v2329_v29 = vld [vmem:[#allocation2 + $0x121] sm:$0xff] }
 0x525   :  { %v2283_v11 = vpop.f32.mrf.mxu0 }
 0x526   :  { %v2155_v53 = vadd.f32 %v2129_v3, %v1992_v12  ;;  %v5828_v12 = vld [vmem:[#allocation2 + $0x122] sm:$0xff] }
 0x527   :  { %3805 = vmatmul.msk.f32.gmra.mxu1 %vm1348_vm1, %v5591_v55 }
 0x528   :  { %v5798_v28 = vadd.f32 %v2283_v11, %v2155_v53  ;;  %3829 = vmatmul.msk.f32.gmra.mxu2 %vm1348_vm1, %v5602_v30  ;;  %3876 = vmatmul.msk.f32.gmra.mxu0 %vm1348_vm1, %v5591_v55 }
 0x529   :  { %3853 = vmatmul.msk.f32.gmra.mxu3 %vm1348_vm1, %v5613_v7 }
 0x52b   :  { %v1994_v45 = vpop.f32.mrf.mxu2 }
 0x52c   :  { %v1995_v10 = vadd.f32 %v1994_v45, %v1881_v62  ;;  %v2132_v4 = vpop.f32.mrf.mxu3  ;;  %v1884_v49 = vpop.f32.mrf.mxu1 }
 0x52d   :  { %v2286_v44 = vpop.f32.mrf.mxu0 }
 0x52e   :  { %v2156_v20 = vadd.f32 %v2132_v4, %v1995_v10 }
 0x52f   :  { %3806 = vmatmul.msk.f32.gmra.mxu1 %vm1348_vm1, %v5611_v27 }
 0x530   :  { %v5808_v36 = vadd.f32 %v2286_v44, %v2156_v20  ;;  %3830 = vmatmul.msk.f32.gmra.mxu2 %vm1348_vm1, %v5619_v50  ;;  %3877 = vmatmul.msk.f32.gmra.mxu0 %vm1348_vm1, %v5611_v27 }
 0x531   :  { %3854 = vmatmul.msk.f32.gmra.mxu3 %vm1348_vm1, %v5630_v8 }
 0x533   :  { %v1997_v55 = vpop.f32.mrf.mxu2 }
 0x534   :  { %v1998_v7 = vadd.f32 %v1997_v55, %v1884_v49  ;;  %v2135_v26 = vpop.f32.mrf.mxu3  ;;  %v1887_v33 = vpop.f32.mrf.mxu1  ;;  %v2792_v49 = vld [vmem:[#allocation2 + $0x131] sm:$0xff] }
 0x535   :  { %v2289_v34 = vpop.f32.mrf.mxu0 }
 0x536   :  { %v2157_v63 = vadd.f32 %v2135_v26, %v1998_v7 }
 0x537   :  { %3807 = vmatmul.msk.f32.gmra.mxu1 %vm1348_vm1, %v5628_v51 }
 0x538   :  { %v5818_v19 = vadd.f32 %v2289_v34, %v2157_v63  ;;  %3831 = vmatmul.msk.f32.gmra.mxu2 %vm1348_vm1, %v5636_v59  ;;  %3878 = vmatmul.msk.f32.gmra.mxu0 %vm1348_vm1, %v5628_v51  ;;  %v1959_v51 = vadd.f32 %v5657_v22, %v5642_v40 }
 0x539   :  { %3855 = vmatmul.msk.f32.gmra.mxu3 %vm1348_vm1, %v5644_v46 }
 0x53a   :  { %v2144_v45 = vadd.f32 %v5659_v56, %v1959_v51  ;;  %v2299_v56 = vadd.f32 %v5673_v13, %v5671_v23 }
 0x53b   :  { %v2000_v27 = vpop.f32.mrf.mxu2 }
 0x53c   :  { %v2001_v8 = vadd.f32 %v2000_v27, %v1887_v33  ;;  %v2138_v41 = vpop.f32.mrf.mxu3  ;;  %v1890_v15 = vpop.f32.mrf.mxu1  ;;  %v2298_v20 = vadd.f32 %v5661_v54, %v2144_v45 }
 0x53d   :  { %v2292_v47 = vpop.f32.mrf.mxu0 }
 0x53e   :  { %v2158_v18 = vadd.f32 %v2138_v41, %v2001_v8 }
 0x53f   :  { %3808 = vmatmul.msk.f32.gmra.mxu1 %vm1348_vm1, %v2329_v29 }
 0x540   :  { %v5830_v3 = vadd.f32 %v2292_v47, %v2158_v18  ;;  %3832 = vmatmul.msk.f32.gmra.mxu2 %vm1348_vm1, %v5828_v12  ;;  %3879 = vmatmul.msk.f32.gmra.mxu0 %vm1348_vm1, %v2329_v29  ;;  %v2300_v47 = vadd.f32 %v5688_v16, %v5686_v0 }
 0x541   :  { %3856 = vmatmul.msk.f32.gmra.mxu3 %vm1348_vm1, %v2638_v32 }
 0x543   :  { %v2003_v46 = vpop.f32.mrf.mxu2 }
 0x544   :  { %v2004_v62 = vadd.f32 %v2003_v46, %v1890_v15  ;;  %v2141_v53 = vpop.f32.mrf.mxu3  ;;  %v2404_v11 = vpop.f32.mrf.mxu1 }
 0x545   :  { %v2295_v4 = vpop.f32.mrf.mxu0  ;;  %v2452_v55 = vadd.f32 %v2404_v11, %v2298_v20  ;;  %v2302_v20 = vadd.f32 %v5715_v39, %v5713_v38 }
 0x546   :  { %v2159_v10 = vadd.f32 %v2141_v53, %v2004_v62  ;;  %v2301_v53 = vadd.f32 %v5700_v37, %v5698_v24 }
 0x547   :  { %3889 = vmatmul.msk.f32.vlgmr.msra.gmra.mxu1 %vm1348_vm1, %v5372_v17 }
 0x548   :  { %v5841_v44 = vadd.f32 %v2295_v4, %v2159_v10  ;;  %3880 = vmatmul.msk.f32.gmra.mxu0 %vm1348_vm1, %v2792_v49 }
 0x54b   :  { %v2558_v40 = vpop.f32.mrf.mxu2 }
 0x54c   :  { %v2606_v22 = vadd.f32 %v2558_v40, %v2452_v55  ;;  %v2713_v7 = vpop.f32.mrf.mxu3  ;;  %v2407_v26 = vpop.f32.mrf.mxu1 }
 0x54d   :  { %v2867_v63 = vpop.f32.mrf.mxu0  ;;  %v2453_v54 = vadd.f32 %v2407_v26, %v2299_v56 }
 0x54e   :  { %v2761_v33 = vadd.f32 %v2713_v7, %v2606_v22 }
 0x54f   :  { %3890 = vmatmul.msk.f32.gmra.mxu1 %vm1348_vm1, %v5389_v58 }
 0x550   :  { %v5848_v34 = vadd.f32 %v2867_v63, %v2761_v33 }
 0x553   :  { %v2561_v27 = vpop.f32.mrf.mxu2 }
 0x554   :  { %v2607_v17 = vadd.f32 %v2561_v27, %v2453_v54  ;;  %v2716_v8 = vpop.f32.mrf.mxu3  ;;  %v2410_v41 = vpop.f32.mrf.mxu1 }
 0x555   :  { %v2870_v18 = vpop.f32.mrf.mxu0  ;;  %v2454_v23 = vadd.f32 %v2410_v41, %v2300_v47 }
 0x556   :  { %v2762_v15 = vadd.f32 %v2716_v8, %v2607_v17 }
 0x557   :  { %3891 = vmatmul.msk.f32.gmra.mxu1 %vm1348_vm1, %v5403_v31 }
 0x558   :  { %v5854_v32 = vadd.f32 %v2870_v18, %v2762_v15 }
 0x55b   :  { %v2564_v13 = vpop.f32.mrf.mxu2 }
 0x55c   :  { %v2608_v29 = vadd.f32 %v2564_v13, %v2454_v23  ;;  %v2719_v51 = vpop.f32.mrf.mxu3  ;;  %v2413_v58 = vpop.f32.mrf.mxu1 }
 0x55d   :  { %v2873_v62 = vpop.f32.mrf.mxu0  ;;  %v2455_v0 = vadd.f32 %v2413_v58, %v2301_v53 }
 0x55e   :  { %v2763_v46 = vadd.f32 %v2719_v51, %v2608_v29 }
 0x55f   :  { %3892 = vmatmul.msk.f32.gmra.mxu1 %vm1348_vm1, %v5420_v5 }
 0x560   :  { %v2917_v11 = vadd.f32 %v2873_v62, %v2763_v46 }
 0x563   :  { %v2567_v16 = vpop.f32.mrf.mxu2 }
 0x564   :  { %v2609_v45 = vadd.f32 %v2567_v16, %v2455_v0  ;;  %v2722_v10 = vpop.f32.mrf.mxu3  ;;  %v2416_v4 = vpop.f32.mrf.mxu1 }
 0x565   :  { %v2876_v49 = vpop.f32.mrf.mxu0  ;;  %v2456_v40 = vadd.f32 %v2416_v4, %v2302_v20 }
 0x566   :  { %v2764_v31 = vadd.f32 %v2722_v10, %v2609_v45 }
 0x567   :  { %3893 = vmatmul.msk.f32.gmra.mxu1 %vm1348_vm1, %v5434_v48  ;;  %v2938_v48 = vld [vmem:[#allocation2 + $0x92] sm:$0xff] }
 0x568   :  { %v2918_v55 = vadd.f32 %v2876_v49, %v2764_v31 }
 0x56b   :  { %v2570_v24 = vpop.f32.mrf.mxu2 }
 0x56c   :  { %v2610_v37 = vadd.f32 %v2570_v24, %v2456_v40  ;;  %v2725_v22 = vpop.f32.mrf.mxu3  ;;  %v5866_v7 = vpop.f32.mrf.mxu1 }
 0x56d   :  { %v2879_v26 = vpop.f32.mrf.mxu0 }
 0x56e   :  { %v2765_v5 = vadd.f32 %v2725_v22, %v2610_v37 }
 0x56f   :  { %3894 = vmatmul.msk.f32.gmra.mxu1 %vm1348_vm1, %v5451_v60 }
 0x570   :  { %v2919_v33 = vadd.f32 %v2879_v26, %v2765_v5 }
 0x573   :  { %v2573_v41 = vpop.f32.mrf.mxu2 }
 0x574   :  { %v5870_v63 = vpop.f32.mrf.mxu1 }
 0x575   :  { %v2882_v47 = vpop.f32.mrf.mxu0 }
 0x577   :  { %3895 = vmatmul.msk.f32.gmra.mxu1 %vm1348_vm1, %v5744_v42 }
 0x57b   :  { %v2576_v23 = vpop.f32.mrf.mxu2 }
 0x57c   :  { %v5874_v38 = vpop.f32.mrf.mxu1 }
 0x57d   :  { %v2885_v51 = vpop.f32.mrf.mxu0 }
 0x57f   :  { %3896 = vmatmul.msk.f32.gmra.mxu1 %vm1348_vm1, %v2938_v48 }
 0x583   :  { %v2579_v58 = vpop.f32.mrf.mxu2 }
 0x584   :  { %v2428_v39 = vpop.f32.mrf.mxu1 }
 0x585   :  { %v5878_v56 = vadd.f32 %v2428_v39, %v5765_v14  ;;  %v2888_v53 = vpop.f32.mrf.mxu0  ;;  %v2303_v39 = vadd.f32 %v5727_v43, %v5725_v2 }
 0x587   :  { %3897 = vmatmul.msk.f32.gmra.mxu1 %vm1348_vm1, %v5485_v35 }
 0x58b   :  { %v2582_v0 = vpop.f32.mrf.mxu2 }
 0x58c   :  { %v2431_v54 = vpop.f32.mrf.mxu1 }
 0x58d   :  { %v5883_v60 = vadd.f32 %v2431_v54, %v5775_v25  ;;  %v2891_v45 = vpop.f32.mrf.mxu0 }
 0x58f   :  { %3898 = vmatmul.msk.f32.gmra.mxu1 %vm1348_vm1, %v5526_v21 }
 0x593   :  { %v2585_v10 = vpop.f32.mrf.mxu2 }
 0x594   :  { %v2434_v42 = vpop.f32.mrf.mxu1 }
 0x595   :  { %v5888_v27 = vadd.f32 %v2434_v42, %v5788_v6  ;;  %v2894_v49 = vpop.f32.mrf.mxu0  ;;  %v2304_v42 = vadd.f32 %v5742_v9, %v5740_v52  ;;  %v2615_v9 = vadd.f32 %v2585_v10, %v5883_v60 }
 0x597   :  { %3899 = vmatmul.msk.f32.gmra.mxu1 %vm1348_vm1, %v5567_v61 }
 0x59b   :  { %v2588_v20 = vpop.f32.mrf.mxu2 }
 0x59c   :  { %v2437_v17 = vpop.f32.mrf.mxu1 }
 0x59d   :  { %v5893_v14 = vadd.f32 %v2437_v17, %v5798_v28  ;;  %v2897_v24 = vpop.f32.mrf.mxu0  ;;  %v2457_v17 = vadd.f32 %v5866_v7, %v2303_v39 }
 0x59f   :  { %3900 = vmatmul.msk.f32.gmra.mxu1 %vm1348_vm1, %v5602_v30 }
 0x5a3   :  { %v2591_v37 = vpop.f32.mrf.mxu2 }
 0x5a4   :  { %v2440_v35 = vpop.f32.mrf.mxu1 }
 0x5a5   :  { %v5898_v25 = vadd.f32 %v2440_v35, %v5808_v36  ;;  %v2946_v36 = vld [vmem:[#allocation2 + $0x132] sm:$0xff]  ;;  %v2900_v26 = vpop.f32.mrf.mxu0  ;;  %v2305_v35 = vadd.f32 %v5753_v1, %v5751_v57 }
 0x5a7   :  { %3901 = vmatmul.msk.f32.gmra.mxu1 %vm1348_vm1, %v5619_v50 }
 0x5ac   :  { %v2443_v21 = vpop.f32.mrf.mxu1 }
 0x5ad   :  { %v5903_v6 = vadd.f32 %v2443_v21, %v5818_v19  ;;  %v2611_v21 = vadd.f32 %v2573_v41, %v2457_v17 }
 0x5af   :  { %3902 = vmatmul.msk.f32.gmra.mxu1 %vm1348_vm1, %v5636_v59 }
 0x5b4   :  { %v2446_v61 = vpop.f32.mrf.mxu1 }
 0x5b5   :  { %v5908_v28 = vadd.f32 %v2446_v61, %v5830_v3  ;;  %v2728_v3 = vpop.f32.mrf.mxu3  ;;  %v2458_v61 = vadd.f32 %v5870_v63, %v2304_v42  ;;  %v2617_v42 = vadd.f32 %v2591_v37, %v5893_v14 }
 0x5b7   :  { %3903 = vmatmul.msk.f32.gmra.mxu1 %vm1348_vm1, %v5828_v12 }
 0x5bc   :  { %v2449_v30 = vpop.f32.mrf.mxu1 }
 0x5bd   :  { %v5913_v8 = vadd.f32 %v2449_v30, %v5841_v44  ;;  %v2731_v13 = vpop.f32.mrf.mxu3  ;;  %v2903_v30 = vpop.f32.mrf.mxu0 }
 0x5bf   :  { %3904 = vmatmul.msk.f32.gmra.mxu1 %vm1348_vm1, %v2946_v36 }
 0x5c4   :  { %v3021_v50 = vpop.f32.mrf.mxu1 }
 0x5c5   :  { %v5917_v19 = vadd.f32 %v3021_v50, %v5848_v34  ;;  %v2734_v62 = vpop.f32.mrf.mxu3 }
 0x5c7   :  { %v3087_v63 = vsel %vm1348_vm1, %v5917_v19, 0.0 }
 0x5cc   :  { %v3024_v59 = vpop.f32.mrf.mxu1 }
 0x5cd   :  { %v5920_v15 = vadd.f32 %v3024_v59, %v5854_v32  ;;  %v2737_v16 = vpop.f32.mrf.mxu3  ;;  %v2612_v59 = vadd.f32 %v2576_v23, %v2458_v61 }
 0x5cf   :  { %v2767_v43 = vadd.f32 %v2731_v13, %v2612_v59  ;;  %v3088_v52 = vsel %vm1348_vm1, %v5920_v15, 0.0 }
 0x5d1   :  { %v2921_v13 = vadd.f32 %v2885_v51, %v2767_v43 }
 0x5d4   :  { %v3027_v18 = vpop.f32.mrf.mxu1 }
 0x5d5   :  { %v5922_v12 = vadd.f32 %v3027_v18, %v2917_v11  ;;  %v2740_v11 = vpop.f32.mrf.mxu3  ;;  %v2459_v18 = vadd.f32 %v5874_v38, %v2305_v35  ;;  %v2616_v38 = vadd.f32 %v2588_v20, %v5888_v27 }
 0x5d6   :  { %v2770_v60 = vadd.f32 %v2740_v11, %v2615_v9 }
 0x5d7   :  { %v2613_v2 = vadd.f32 %v2579_v58, %v2459_v18  ;;  %v3090_v41 = vsel %vm1348_vm1, %v5922_v12, 0.0 }
 0x5d9   :  { %v2768_v7 = vadd.f32 %v2734_v62, %v2613_v2 }
 0x5db   :  { %v2922_v39 = vadd.f32 %v2888_v53, %v2768_v7 }
 0x5dc   :  { %v3030_v44 = vpop.f32.mrf.mxu1 }
 0x5dd   :  { %v5924_v29 = vadd.f32 %v3030_v44, %v2918_v55  ;;  %v2743_v40 = vpop.f32.mrf.mxu3  ;;  %v2766_v44 = vadd.f32 %v2728_v3, %v2611_v21  ;;  %v3089_v3 = vadd.f32 %v3088_v52, %v3087_v63  ;;  %v2924_v21 = vadd.f32 %v2894_v49, %v2770_v60 }
 0x5de   :  { %v2771_v20 = vadd.f32 %v2743_v40, %v2616_v38 }
 0x5df   :  { %v2920_v1 = vadd.f32 %v2882_v47, %v2766_v44  ;;  %v3092_v58 = vsel %vm1348_vm1, %v5924_v29, 0.0  ;;  %v2906_v47 = vpop.f32.mrf.mxu0  ;;  %v3091_v10 = vadd.f32 %v3090_v41, %v3089_v3 }
 0x5e0   :  { %v2925_v40 = vadd.f32 %v2897_v24, %v2771_v20 }
 0x5e1   :  { %v3093_v51 = vadd.f32 %v3092_v58, %v3091_v10 }
 0x5e4   :  { %v3033_v46 = vpop.f32.mrf.mxu1 }
 0x5e5   :  { %v5926_v34 = vadd.f32 %v3033_v46, %v2919_v33  ;;  %v2746_v5 = vpop.f32.mrf.mxu3  ;;  %v2594_v33 = vpop.f32.mrf.mxu2  ;;  %v2614_v46 = vadd.f32 %v2582_v0, %v5878_v56 }
 0x5e6   :  { %v2618_v35 = vadd.f32 %v2594_v33, %v5898_v25  ;;  %v2772_v53 = vadd.f32 %v2746_v5, %v2617_v42 }
 0x5e7   :  { %v2769_v56 = vadd.f32 %v2737_v16, %v2614_v46  ;;  %v3094_v17 = vsel %vm1348_vm1, %v5926_v34, 0.0  ;;  %v2909_v24 = vpop.f32.mrf.mxu0 }
 0x5e8   :  { %v3095_v61 = vadd.f32 %v3094_v17, %v3093_v51  ;;  %v2926_v44 = vadd.f32 %v2900_v26, %v2772_v53 }
 0x5e9   :  { %v2923_v16 = vadd.f32 %v2891_v45, %v2769_v56 }
 0x5ec   :  { %v3036_v32 = vpop.f32.mrf.mxu1 }
 0x5ed   :  { %v2749_v54 = vpop.f32.mrf.mxu3  ;;  %v2597_v36 = vpop.f32.mrf.mxu2  ;;  %v5950_v0 = vadd.f32 %v3036_v32, %v2920_v1 }
 0x5ee   :  { %v2619_v14 = vadd.f32 %v2597_v36, %v5903_v6  ;;  %v2773_v25 = vadd.f32 %v2749_v54, %v2618_v35 }
 0x5ef   :  { %v3096_v32 = vsel %vm1348_vm1, %v5950_v0, 0.0  ;;  %v2912_v56 = vpop.f32.mrf.mxu0 }
 0x5f0   :  { %v3097_v45 = vadd.f32 %v3096_v32, %v3095_v61  ;;  %v2927_v54 = vadd.f32 %v2903_v30, %v2773_v25 }
 0x5f4   :  { %v3039_v4 = vpop.f32.mrf.mxu1 }
 0x5f5   :  { %v2752_v57 = vpop.f32.mrf.mxu3  ;;  %v2600_v62 = vpop.f32.mrf.mxu2  ;;  %v5955_v27 = vadd.f32 %v3039_v4, %v2921_v13 }
 0x5f6   :  { %v2620_v33 = vadd.f32 %v2600_v62, %v5908_v28  ;;  %v2774_v6 = vadd.f32 %v2752_v57, %v2619_v14 }
 0x5f7   :  { %v3098_v37 = vsel %vm1348_vm1, %v5955_v27, 0.0 }
 0x5f8   :  { %v3099_v5 = vadd.f32 %v3098_v37, %v3097_v45  ;;  %v2928_v9 = vadd.f32 %v2906_v47, %v2774_v6 }
 0x5fc   :  { %v3042_v31 = vpop.f32.mrf.mxu1 }
 0x5fd   :  { %v5960_v11 = vadd.f32 %v3042_v31, %v2922_v39  ;;  %v2755_v59 = vpop.f32.mrf.mxu3  ;;  %v2603_v2 = vpop.f32.mrf.mxu2 }
 0x5fe   :  { %v2775_v46 = vadd.f32 %v2755_v59, %v2620_v33  ;;  %v2621_v26 = vadd.f32 %v2603_v2, %v5913_v8 }
 0x5ff   :  { %v3100_v31 = vsel %vm1348_vm1, %v5960_v11, 0.0 }
 0x600   :  { %v3101_v43 = vadd.f32 %v3100_v31, %v3099_v5  ;;  %v2929_v41 = vadd.f32 %v2909_v24, %v2775_v46 }
 0x604   :  { %v3045_v55 = vpop.f32.mrf.mxu1 }
 0x605   :  { %v5965_v4 = vadd.f32 %v3045_v55, %v2923_v16 }
 0x607   :  { %v3102_v36 = vsel %vm1348_vm1, %v5965_v4, 0.0 }
 0x60c   :  { %v3048_v22 = vpop.f32.mrf.mxu1 }
 0x60d   :  { %v5970_v49 = vadd.f32 %v3048_v22, %v2924_v21  ;;  %v3103_v22 = vadd.f32 %v3102_v36, %v3101_v43 }
 0x60f   :  { %v3104_v28 = vsel %vm1348_vm1, %v5970_v49, 0.0 }
 0x610   :  { %v3105_v7 = vadd.f32 %v3104_v28, %v3103_v22 }
 0x614   :  { %v5928_v48 = vpop.f32.mrf.mxu1 }
 0x615   :  { %v5975_v55 = vadd.f32 %v5928_v48, %v2925_v40  ;;  %v2758_v48 = vpop.f32.mrf.mxu3 }
 0x616   :  { %v2776_v3 = vadd.f32 %v2758_v48, %v2621_v26 }
 0x617   :  { %v3106_v57 = vsel %vm1348_vm1, %v5975_v55, 0.0 }
 0x618   :  { %v2930_v47 = vadd.f32 %v2912_v56, %v2776_v3 }
 0x61c   :  { %v3054_v50 = vpop.f32.mrf.mxu1 }
 0x61d   :  { %v5979_v52 = vadd.f32 %v3054_v50, %v2926_v44  ;;  %v3107_v50 = vadd.f32 %v3106_v57, %v3105_v7 }
 0x61f   :  { %v3108_v30 = vsel %vm1348_vm1, %v5979_v52, 0.0 }
 0x620   :  { %v3109_v58 = vadd.f32 %v3108_v30, %v3107_v50 }
 0x624   :  { %v3057_v23 = vpop.f32.mrf.mxu1 }
 0x625   :  { %v5984_v1 = vadd.f32 %v3057_v23, %v2927_v54 }
 0x627   :  { %v3110_v13 = vsel %vm1348_vm1, %v5984_v1, 0.0 }
 0x628   :  { %v3111_v60 = vadd.f32 %v3110_v13, %v3109_v58 }
 0x62c   :  { %v3060_v18 = vpop.f32.mrf.mxu1 }
 0x62d   :  { %v5988_v38 = vadd.f32 %v3060_v18, %v2928_v9 }
 0x62f   :  { %v3112_v23 = vsel %vm1348_vm1, %v5988_v38, 0.0 }
 0x630   :  { %v3113_v10 = vadd.f32 %v3112_v23, %v3111_v60 }
 0x634   :  { %v3063_v63 = vpop.f32.mrf.mxu1 }
 0x635   :  { %v5992_v8 = vadd.f32 %v3063_v63, %v2929_v41 }
 0x637   :  { %v3114_v62 = vsel %vm1348_vm1, %v5992_v8, 0.0 }
 0x638   :  { %v3115_v17 = vadd.f32 %v3114_v62, %v3113_v10 }
 0x63c   :  { %v3066_v39 = vpop.f32.mrf.mxu1 }
 0x63d   :  { %v5998_v42 = vadd.f32 %v3066_v39, %v2930_v47 }
 0x63f   :  { %v3116_v20 = vsel %vm1348_vm1, %v5998_v42, 0.0 }
 0x640   :  { %v3117_v51 = vadd.f32 %v3116_v20, %v3115_v17 }
 0x642   :  { %v3118_v16 = vrot.slane %v3117_v51, 4 }
 0x644   :  { %v3119_v35 = vadd.f32 %v3118_v16, %v3117_v51 }
 0x646   :  { %v3120_v32 = vrot.slane %v3119_v35, 2 }
 0x648   :  { %v3121_v21 = vadd.f32 %v3120_v32, %v3119_v35 }
 0x64a   :  { %v3122_v61 = vrot.slane %v3121_v21, 1 }
 0x64c   :  { %v3123_v53 = vadd.f32 %v3122_v61, %v3121_v21 }
 0x64e   :  { %3133 = vrot.lane.b32.xlu1 %v3123_v53, %s3935_s30  ;;  %3129 = vrot.lane.b32.xlu0 %v3123_v53, %s3939_s11 }
 0x64f   :  { %3125 = vrot.lane.b32.xlu2 %v3123_v53, %s3936_s8 }
 0x656   :  { %3145 = vrot.lane.b32.xlu1 %v3123_v53, %s3937_s9  ;;  %3141 = vrot.lane.b32.xlu0 %v3123_v53, %s3934_s0 }
 0x657   :  { %3137 = vrot.lane.b32.xlu2 %v3123_v53, %s3938_s10 }
 0x65f   :  { %3149 = vrot.lane.b32.xlu2 %v3123_v53, %s3940_s12 }
 0x6a9   :  { %v3126_v14 = vpop.permute.xlu2 %3125 }
 0x6aa   :  { %v3128_v37 = vadd.f32 %v3126_v14, %v3123_v53 }
 0x6b1   :  { %v3138_v18 = vpop.permute.xlu2 %3137 }
 0x6b9   :  { %v3150_v36 = vpop.permute.xlu2 %3149 }
 0x6c0   :  { %v3134_v40 = vpop.permute.xlu1 %3133  ;;  %v3130_v59 = vpop.permute.xlu0 %3129 }
 0x6c1   :  { %v3132_v45 = vadd.f32 %v3130_v59, %v3128_v37 }
 0x6c3   :  { %v3136_v25 = vadd.f32 %v3134_v40, %v3132_v45 }
 0x6c5   :  { %v3140_v33 = vadd.f32 %v3138_v18, %v3136_v25 }
 0x6c8   :  { %v3142_v31 = vpop.permute.xlu0 %3141  ;;  %v3146_v44 = vpop.permute.xlu1 %3145 }
 0x6c9   :  { %v3144_v5 = vadd.f32 %v3142_v31, %v3140_v33 }
 0x6cb   :  { %v3148_v6 = vadd.f32 %v3146_v44, %v3144_v5 }
 0x6cd   :  { %v3152_v24 = vadd.f32 %v3150_v36, %v3148_v6 }
 0x6cf   :  { %v3153_v2 = vmul.f32 0.0009765625, %v3152_v24 }
 0x6d1   :  { %3161 = vrot.lane.b32.xlu2 %v3153_v2, %s3941_s13  ;;  %3158 = vrot.lane.b32.xlu1 %v3153_v2, %s3942_s14 }
 0x6d2   :  { %3155 = vrot.lane.b32.xlu0 %v3153_v2, %s3943_s15 }
 0x6d9   :  { %3170 = vrot.lane.b32.xlu2 %v3153_v2, %s3944_s16  ;;  %3167 = vrot.lane.b32.xlu1 %v3153_v2, %s3945_s17 }
 0x6da   :  { %3164 = vrot.lane.b32.xlu0 %v3153_v2, %s3946_s18 }
 0x6e2   :  { %3173 = vrot.lane.b32.xlu0 %v3153_v2, %s3947_s19 }
 0x72b   :  { %v3162_v28 = vpop.permute.xlu2 %3161 }
 0x733   :  { %v3171_v63 = vpop.permute.xlu2 %3170 }
 0x743   :  { %v3159_v43 = vpop.permute.xlu1 %3158 }
 0x744   :  { %v3156_v54 = vpop.permute.xlu0 %3155 }
 0x745   :  { %v3176_v46 = vsel %vm1438_vm2, %v3153_v2, %v3156_v54 }
 0x746   :  { %v3177_v22 = vsel %vm1440_vm3, %v3176_v46, %v3159_v43 }
 0x747   :  { %v3178_v26 = vsel %vm1442_vm4, %v3177_v22, %v3162_v28 }
 0x74b   :  { %v3168_v57 = vpop.permute.xlu1 %3167 }
 0x74c   :  { %v3165_v9 = vpop.permute.xlu0 %3164 }
 0x74d   :  { %v3179_v48 = vsel %vm67_vm0, %v3178_v26, %v3165_v9 }
 0x74e   :  { %v3180_v7 = vsel %vm1445_vm5, %v3179_v48, %v3168_v57 }
 0x74f   :  { %v3181_v41 = vsel %vm1447_vm6, %v3180_v7, %v3171_v63 }
 0x754   :  { %v3174_v30 = vpop.permute.xlu0 %3173 }
 0x755   :  { %v3182_v50 = vsel %vm1449_vm7, %v3181_v41, %v3174_v30 }
 0x756   :  { %v3183_v3 = vperm.slane %v3182_v50, 0 }
 0x758   :  { %v6024_v13 = vsub.f32 %v5917_v19, %v3183_v3  ;;  %v6027_v56 = vsub.f32 %v5920_v15, %v3183_v3  ;;  %v6030_v58 = vsub.f32 %v5922_v12, %v3183_v3  ;;  %v6033_v23 = vsub.f32 %v5924_v29, %v3183_v3 }
 0x759   :  { %v6040_v62 = vsub.f32 %v5926_v34, %v3183_v3  ;;  %v6045_v15 = vsub.f32 %v5950_v0, %v3183_v3  ;;  %v6052_v17 = vsub.f32 %v5955_v27, %v3183_v3  ;;  %v6058_v0 = vsub.f32 %v5960_v11, %v3183_v3 }
 0x75a   :  { %v3200_v60 = vmul.f32 %v6024_v13, %v6024_v13  ;;  %v3201_v47 = vmul.f32 %v6027_v56, %v6027_v56  ;;  %v3202_v19 = vmul.f32 %v6030_v58, %v6030_v58  ;;  %v3203_v12 = vmul.f32 %v6033_v23, %v6033_v23 }
 0x75b   :  { %v3204_v34 = vmul.f32 %v6040_v62, %v6040_v62  ;;  %v3205_v16 = vmul.f32 %v6045_v15, %v6045_v15  ;;  %v6064_v21 = vsub.f32 %v5965_v4, %v3183_v3  ;;  %v3206_v27 = vmul.f32 %v6052_v17, %v6052_v17 }
 0x75c   :  { %v3216_v29 = vsel %vm1348_vm1, %v3200_v60, 0.0  ;;  %v3217_v10 = vsel %vm1348_vm1, %v3201_v47, 0.0  ;;  %v3219_v20 = vsel %vm1348_vm1, %v3202_v19, 0.0  ;;  %v3221_v35 = vsel %vm1348_vm1, %v3203_v12, 0.0 }
 0x75d   :  { %v3218_v39 = vadd.f32 %v3217_v10, %v3216_v29  ;;  %v3223_v61 = vsel %vm1348_vm1, %v3204_v34, 0.0  ;;  %v6070_v14 = vsub.f32 %v5970_v49, %v3183_v3  ;;  %v3207_v11 = vmul.f32 %v6058_v0, %v6058_v0 }
 0x75e   :  { %v3225_v37 = vsel %vm1348_vm1, %v3205_v16, 0.0  ;;  %v6076_v59 = vsub.f32 %v5975_v55, %v3183_v3  ;;  %v3208_v4 = vmul.f32 %v6064_v21, %v6064_v21  ;;  %v3227_v45 = vsel %vm1348_vm1, %v3206_v27, 0.0  ;;  %v3929_v16 = vld [vmem:[%s6248_s6] ss:$0 sm:$0xff] }
 0x75f   :  { %v3220_v51 = vadd.f32 %v3219_v20, %v3218_v39  ;;  %v6082_v25 = vsub.f32 %v5979_v52, %v3183_v3  ;;  %v3209_v49 = vmul.f32 %v6070_v14, %v6070_v14  ;;  %v3229_v33 = vsel %vm1348_vm1, %v3207_v11, 0.0 }
 0x760   :  { %v6088_v5 = vsub.f32 %v5984_v1, %v3183_v3  ;;  %v3210_v55 = vmul.f32 %v6076_v59, %v6076_v59  ;;  %v3231_v44 = vsel %vm1348_vm1, %v3208_v4, 0.0  ;;  %v6094_v36 = vsub.f32 %v5988_v38, %v3183_v3 }
 0x761   :  { %v3222_v32 = vadd.f32 %v3221_v35, %v3220_v51  ;;  %v3211_v52 = vmul.f32 %v6082_v25, %v6082_v25  ;;  %v3233_v24 = vsel %vm1348_vm1, %v3209_v49, 0.0  ;;  %v6100_v43 = vsub.f32 %v5992_v8, %v3183_v3 }
 0x762   :  { %v3212_v1 = vmul.f32 %v6088_v5, %v6088_v5  ;;  %v3235_v54 = vsel %vm1348_vm1, %v3210_v55, 0.0  ;;  %v6106_v28 = vsub.f32 %v5998_v42, %v3183_v3  ;;  %v3213_v38 = vmul.f32 %v6094_v36, %v6094_v36 }
 0x763   :  { %v3224_v53 = vadd.f32 %v3223_v61, %v3222_v32  ;;  %v3237_v22 = vsel %vm1348_vm1, %v3211_v52, 0.0  ;;  %v3214_v26 = vmul.f32 %v6100_v43, %v6100_v43 }
 0x764   :  { %v3239_v8 = vsel %vm1348_vm1, %v3212_v1, 0.0  ;;  %v3215_v48 = vmul.f32 %v6106_v28, %v6106_v28  ;;  %v3241_v7 = vsel %vm1348_vm1, %v3213_v38, 0.0 }
 0x765   :  { %v3226_v40 = vadd.f32 %v3225_v37, %v3224_v53  ;;  %v3243_v42 = vsel %vm1348_vm1, %v3214_v26, 0.0 }
 0x766   :  { %v3245_v30 = vsel %vm1348_vm1, %v3215_v48, 0.0  ;;  %v3086_v48 = vld [vmem:[%s6248_s6] sm:$0x1] }
 0x767   :  { %v3228_v18 = vadd.f32 %v3227_v45, %v3226_v40 }
 0x769   :  { %v3230_v31 = vadd.f32 %v3229_v33, %v3228_v18 }
 0x76b   :  { %v3232_v6 = vadd.f32 %v3231_v44, %v3230_v31 }
 0x76d   :  { %v3234_v2 = vadd.f32 %v3233_v24, %v3232_v6  ;;  %v3085_v6 = vld [vmem:[%s6249_s5] sm:$0x1] }
 0x76f   :  { %v3236_v46 = vadd.f32 %v3235_v54, %v3234_v2 }
 0x771   :  { %v3238_v9 = vadd.f32 %v3237_v22, %v3236_v46 }
 0x773   :  { %v3240_v57 = vadd.f32 %v3239_v8, %v3238_v9 }
 0x775   :  { %v3242_v63 = vadd.f32 %v3241_v7, %v3240_v57 }
 0x777   :  { %v3244_v41 = vadd.f32 %v3243_v42, %v3242_v63 }
 0x779   :  { %v3246_v50 = vadd.f32 %v3245_v30, %v3244_v41 }
 0x77b   :  { %v3247_v3 = vrot.slane %v3246_v50, 4 }
 0x77d   :  { %v3248_v60 = vadd.f32 %v3247_v3, %v3246_v50 }
 0x77f   :  { %v3249_v47 = vrot.slane %v3248_v60, 2 }
 0x781   :  { %v3250_v19 = vadd.f32 %v3249_v47, %v3248_v60 }
 0x783   :  { %v3251_v12 = vrot.slane %v3250_v19, 1 }
 0x785   :  { %v3252_v29 = vadd.f32 %v3251_v12, %v3250_v19 }
 0x787   :  { %3262 = vrot.lane.b32.xlu0 %v3252_v29, %s3935_s30  ;;  %3258 = vrot.lane.b32.xlu2 %v3252_v29, %s3939_s11 }
 0x788   :  { %3254 = vrot.lane.b32.xlu1 %v3252_v29, %s3936_s8 }
 0x78f   :  { %3274 = vrot.lane.b32.xlu0 %v3252_v29, %s3937_s9  ;;  %3270 = vrot.lane.b32.xlu2 %v3252_v29, %s3934_s0 }
 0x790   :  { %3266 = vrot.lane.b32.xlu1 %v3252_v29, %s3938_s10 }
 0x797   :  { %3344 = vrot.lane.b32.xlu2 %v3929_v16, %s3943_s15  ;;  %3350 = vrot.lane.b32.xlu0 %v3929_v16, %s3941_s13 }
 0x798   :  { %3278 = vrot.lane.b32.xlu1 %v3252_v29, %s3940_s12 }
 0x79f   :  { %3353 = vrot.lane.b32.xlu2 %v3929_v16, %s3946_s18 }
 0x7a0   :  { %3347 = vrot.lane.b32.xlu1 %v3929_v16, %s3942_s14 }
 0x7e1   :  { %v3259_v10 = vpop.permute.xlu2 %3258 }
 0x7e9   :  { %v3271_v61 = vpop.permute.xlu2 %3270 }
 0x7f1   :  { %v3345_v54 = vpop.permute.xlu2 %3344 }
 0x7f2   :  { %v3365_v41 = vsel %vm1438_vm2, %v3086_v48, %v3345_v54 }
 0x7f9   :  { %v3263_v51 = vpop.permute.xlu0 %3262  ;;  %v3354_v22 = vpop.permute.xlu2 %3353 }
 0x7fa   :  { %v3255_v39 = vpop.permute.xlu1 %3254 }
 0x7fb   :  { %v3257_v34 = vadd.f32 %v3255_v39, %v3252_v29 }
 0x7fd   :  { %v3261_v20 = vadd.f32 %v3259_v10, %v3257_v34 }
 0x7ff   :  { %v3265_v35 = vadd.f32 %v3263_v51, %v3261_v20 }
 0x801   :  { %v3275_v11 = vpop.permute.xlu0 %3274 }
 0x802   :  { %v3267_v32 = vpop.permute.xlu1 %3266 }
 0x803   :  { %v3269_v27 = vadd.f32 %v3267_v32, %v3265_v35 }
 0x805   :  { %v3273_v53 = vadd.f32 %v3271_v61, %v3269_v27 }
 0x807   :  { %v3277_v37 = vadd.f32 %v3275_v11, %v3273_v53 }
 0x809   :  { %v3351_v38 = vpop.permute.xlu0 %3350 }
 0x80a   :  { %v3279_v40 = vpop.permute.xlu1 %3278 }
 0x80b   :  { %v3281_v4 = vadd.f32 %v3279_v40, %v3277_v37 }
 0x80d   :  { %v3282_v45 = vmul.f32 0.0009765625, %v3281_v4 }
 0x80f   :  { %v3283_v18 = vadd.f32 1e-05, %v3282_v45 }
 0x811   :  { %3932 = vrsqrt.f32 %v3283_v18  ;;  %vm3290_vm13 = vweird.f32 %v3283_v18 }
 0x812   :  { %v3348_v46 = vpop.permute.xlu1 %3347 }
 0x813   :  { %v3366_v60 = vsel %vm1440_vm3, %v3365_v41, %v3348_v46 }
 0x814   :  { %v3367_v12 = vsel %vm1442_vm4, %v3366_v60, %v3351_v38 }
 0x815   :  { %v3368_v34 = vsel %vm67_vm0, %v3367_v12, %v3354_v22 }
 0x817   :  { %v3933_v49 = vpop.eup %3932 }
 0x818   :  { %v3285_v33 = vmul.f32 %v3933_v49, %v3283_v18  ;;  %vm3291_vm12 = vweird.f32 %v3933_v49 }
 0x819   :  { %vm3292_vm14 = vmor %vm3290_vm13, %vm3291_vm12 }
 0x81a   :  { %v3286_v31 = vmul.f32 %v3933_v49, %v3285_v33 }
 0x81c   :  { %v3287_v55 = vmul.f32 0.5, %v3286_v31 }
 0x81e   :  { %v3288_v44 = vsub.f32 1.5, %v3287_v55 }
 0x820   :  { %v3289_v52 = vmul.f32 %v3933_v49, %v3288_v44 }
 0x822   :  { %v3293_v24 = vsel %vm3292_vm14, %v3933_v49, %v3289_v52 }
 0x823   :  { %v3294_v2 = vmul.f32 %v3293_v24, %v3085_v6 }
 0x825   :  { %v3296_v1 = vperm.slane %v3294_v2, 0 }
 0x827   :  { %3303 = vrot.lane.b32.xlu1 %v3296_v1, %s3941_s13  ;;  %3300 = vrot.lane.b32.xlu0 %v3296_v1, %s3942_s14 }
 0x828   :  { %3297 = vrot.lane.b32.xlu2 %v3296_v1, %s3943_s15 }
 0x82f   :  { %3312 = vrot.lane.b32.xlu1 %v3296_v1, %s3944_s16  ;;  %3306 = vrot.lane.b32.xlu0 %v3296_v1, %s3946_s18 }
 0x830   :  { %3309 = vrot.lane.b32.xlu2 %v3296_v1, %s3945_s17 }
 0x837   :  { %3356 = vrot.lane.b32.xlu1 %v3929_v16, %s3945_s17  ;;  %3315 = vrot.lane.b32.xlu0 %v3296_v1, %s3947_s19 }
 0x838   :  { %3359 = vrot.lane.b32.xlu2 %v3929_v16, %s3944_s16 }
 0x83f   :  { %3362 = vrot.lane.b32.xlu0 %v3929_v16, %s3947_s19 }
 0x882   :  { %v3298_v8 = vpop.permute.xlu2 %3297 }
 0x883   :  { %v3318_v57 = vsel %vm1438_vm2, %v3294_v2, %v3298_v8 }
 0x88a   :  { %v3310_v3 = vpop.permute.xlu2 %3309 }
 0x892   :  { %v3360_v51 = vpop.permute.xlu2 %3359 }
 0x899   :  { %v3301_v9 = vpop.permute.xlu0 %3300  ;;  %v3304_v26 = vpop.permute.xlu1 %3303 }
 0x89a   :  { %v3319_v7 = vsel %vm1440_vm3, %v3318_v57, %v3301_v9 }
 0x89b   :  { %v3320_v30 = vsel %vm1442_vm4, %v3319_v7, %v3304_v26 }
 0x8a1   :  { %v3307_v63 = vpop.permute.xlu0 %3306  ;;  %v3313_v42 = vpop.permute.xlu1 %3312 }
 0x8a2   :  { %v3321_v50 = vsel %vm67_vm0, %v3320_v30, %v3307_v63 }
 0x8a3   :  { %v3322_v47 = vsel %vm1445_vm5, %v3321_v50, %v3310_v3 }
 0x8a4   :  { %v3323_v29 = vsel %vm1447_vm6, %v3322_v47, %v3313_v42 }
 0x8a9   :  { %v3316_v19 = vpop.permute.xlu0 %3315  ;;  %v3357_v10 = vpop.permute.xlu1 %3356 }
 0x8aa   :  { %v3324_v39 = vsel %vm1449_vm7, %v3323_v29, %v3316_v19  ;;  %v3369_v20 = vsel %vm1445_vm5, %v3368_v34, %v3357_v10 }
 0x8ab   :  { %v3325_v16 = vperm.slane %v3324_v39, 0  ;;  %v3370_v35 = vsel %vm1447_vm6, %v3369_v20, %v3360_v51 }
 0x8ad   :  { %v3326_v61 = vmul.f32 %v3325_v16, %v6024_v13  ;;  %v3327_v53 = vmul.f32 %v3325_v16, %v6027_v56  ;;  %v3328_v11 = vmul.f32 %v3325_v16, %v6030_v58  ;;  %v3329_v40 = vmul.f32 %v3325_v16, %v6033_v23 }
 0x8ae   :  { %v3330_v4 = vmul.f32 %v3325_v16, %v6040_v62  ;;  %v3331_v33 = vmul.f32 %v3325_v16, %v6045_v15  ;;  %v3332_v55 = vmul.f32 %v3325_v16, %v6052_v17  ;;  %v3333_v13 = vmul.f32 %v3325_v16, %v6058_v0 }
 0x8af   :  { %v3334_v56 = vmul.f32 %v3325_v16, %v6064_v21  ;;  %v3335_v62 = vmul.f32 %v3325_v16, %v6070_v14  ;;  %v3336_v54 = vmul.f32 %v3325_v16, %v6076_v59  ;;  %v3337_v17 = vmul.f32 %v3325_v16, %v6082_v25 }
 0x8b0   :  { %v3338_v14 = vmul.f32 %v3325_v16, %v6088_v5  ;;  %v3339_v22 = vmul.f32 %v3325_v16, %v6094_v36  ;;  %v3340_v26 = vmul.f32 %v3325_v16, %v6100_v43  ;;  %v3341_v57 = vmul.f32 %v3325_v16, %v6106_v28 }
 0x8b1   :  { %v3363_v32 = vpop.permute.xlu0 %3362 }
 0x8b2   :  { %v3371_v27 = vsel %vm1449_vm7, %v3370_v35, %v3363_v32 }
 0x8b3   :  { %v3372_v37 = vperm.slane %v3371_v27, 0 }
 0x8b5   :  { %v3373_v45 = vadd.f32 %v3372_v37, %v3326_v61  ;;  %v3374_v18 = vadd.f32 %v3372_v37, %v3327_v53  ;;  %v3375_v49 = vadd.f32 %v3372_v37, %v3328_v11  ;;  %v3376_v31 = vadd.f32 %v3372_v37, %v3329_v40 }
 0x8b6   :  { %v3377_v44 = vadd.f32 %v3372_v37, %v3330_v4  ;;  %v3378_v6 = vadd.f32 %v3372_v37, %v3331_v33  ;;  %v3379_v58 = vadd.f32 %v3372_v37, %v3332_v55  ;;  %v3380_v2 = vadd.f32 %v3372_v37, %v3333_v13 }
 0x8b7   :  { %v3389_v52 = vmax.f32 %v3373_v45, 0.0  ;;  %v3390_v24 = vmax.f32 %v3374_v18, 0.0  ;;  %v3391_v23 = vmax.f32 %v3375_v49, 0.0  ;;  %v3392_v1 = vmax.f32 %v3376_v31, 0.0 }
 0x8b8   :  { %v3381_v15 = vadd.f32 %v3372_v37, %v3334_v56  ;;  %v3393_v46 = vmax.f32 %v3377_v44, 0.0  ;;  %v3382_v0 = vadd.f32 %v3372_v37, %v3335_v62  ;;  %v3394_v21 = vmax.f32 %v3378_v6, 0.0 }
 0x8b9   :  { %3405 = vst.msk [vmem:[%s6250_s7] sm:$0xff] %vm1348_vm1, %v3389_v52  ;;  %v3383_v38 = vadd.f32 %v3372_v37, %v3336_v54  ;;  %v3395_v59 = vmax.f32 %v3379_v58, 0.0  ;;  %v3384_v9 = vadd.f32 %v3372_v37, %v3337_v17  ;;  %v3396_v25 = vmax.f32 %v3380_v2, 0.0 }
 0x8ba   :  { %3406 = vst.msk [vmem:[%s6250_s7 + $0x8] sm:$0xff] %vm1348_vm1, %v3390_v24  ;;  %v3385_v8 = vadd.f32 %v3372_v37, %v3338_v14  ;;  %v3397_v5 = vmax.f32 %v3381_v15, 0.0  ;;  %v3386_v48 = vadd.f32 %v3372_v37, %v3339_v22  ;;  %v3398_v36 = vmax.f32 %v3382_v0, 0.0 }
 0x8bb   :  { %3407 = vst.msk [vmem:[%s6250_s7 + $0x10] sm:$0xff] %vm1348_vm1, %v3391_v23  ;;  %v3387_v7 = vadd.f32 %v3372_v37, %v3340_v26  ;;  %v3399_v63 = vmax.f32 %v3383_v38, 0.0  ;;  %v3388_v43 = vadd.f32 %v3372_v37, %v3341_v57  ;;  %v3400_v42 = vmax.f32 %v3384_v9, 0.0 }
 0x8bc   :  { %3408 = vst.msk [vmem:[%s6250_s7 + $0x18] sm:$0xff] %vm1348_vm1, %v3392_v1  ;;  %v3401_v28 = vmax.f32 %v3385_v8, 0.0  ;;  %v3402_v41 = vmax.f32 %v3386_v48, 0.0 }
 0x8bd   :  { %3409 = vst.msk [vmem:[%s6250_s7 + $0x20] sm:$0xff] %vm1348_vm1, %v3393_v46  ;;  %v3403_v30 = vmax.f32 %v3387_v7, 0.0  ;;  %v3404_v50 = vmax.f32 %v3388_v43, 0.0 }
 0x8be   :  { %3410 = vst.msk [vmem:[%s6250_s7 + $0x28] sm:$0xff] %vm1348_vm1, %v3394_v21 }
 0x8bf   :  { %3411 = vst.msk [vmem:[%s6250_s7 + $0x30] sm:$0xff] %vm1348_vm1, %v3395_v59 }
 0x8c0   :  { %3412 = vst.msk [vmem:[%s6250_s7 + $0x38] sm:$0xff] %vm1348_vm1, %v3396_v25 }
 0x8c1   :  { %3413 = vst.msk [vmem:[%s6250_s7 + $0x40] sm:$0xff] %vm1348_vm1, %v3397_v5 }
 0x8c2   :  { %3414 = vst.msk [vmem:[%s6250_s7 + $0x48] sm:$0xff] %vm1348_vm1, %v3398_v36 }
 0x8c3   :  { %3415 = vst.msk [vmem:[%s6250_s7 + $0x50] sm:$0xff] %vm1348_vm1, %v3399_v63 }
 0x8c4   :  { %3416 = vst.msk [vmem:[%s6250_s7 + $0x58] sm:$0xff] %vm1348_vm1, %v3400_v42 }
 0x8c5   :  { %3417 = vst.msk [vmem:[%s6250_s7 + $0x60] sm:$0xff] %vm1348_vm1, %v3401_v28 }
 0x8c6   :  { %3418 = vst.msk [vmem:[%s6250_s7 + $0x68] sm:$0xff] %vm1348_vm1, %v3402_v41 }
 0x8c7   :  { %3419 = vst.msk [vmem:[%s6250_s7 + $0x70] sm:$0xff] %vm1348_vm1, %v3403_v30 }
 0x8c8   :  { %3420 = vst.msk [vmem:[%s6250_s7 + $0x78] sm:$0xff] %vm1348_vm1, %v3404_v50 }

</bundles_post_ra>
